<compile_context>
chip_gen: v5e
topology: v5e:2x2
jax: 0.10.0
libtpu: 0.0.40
codegen_flags: <defaults>
</compile_context>

<pallas_src>
import jax
import jax.numpy as jnp
from jax.experimental import pallas as pl
from jax.experimental.pallas import tpu as pltpu

D_IN = 3 * 256 * 256          # 196608, fixed by nn.Linear(256*256*3, 256)
H1, H2, H3 = 256, 64, 30
BN_EPS = 1e-5
COL_SPLIT = 2                 # w1 column halves -> 2 TensorCores on v7x
H1_HALF = H1 // COL_SPLIT     # 128 (lane-aligned)


# ---------------------------------------------------------------------------
# Kernel 1: layer-1 matmul + bias.
#   grid = (COL_SPLIT, nsteps)
#     axis 0 ("parallel"):  which 128-column half of w1 this program computes
#     axis 1 ("arbitrary"): K-reduction over the (B, D_IN) @ (D_IN, 256) matmul
#   The f32 accumulator lives in VMEM scratch; bias is added on the last step.
# ---------------------------------------------------------------------------
def layer1_kernel(x_ref, w1_ref, b1_ref, o_ref, acc_ref):
    k = pl.program_id(1)

    @pl.when(k == 0)
    def _():
        acc_ref[...] = jnp.zeros_like(acc_ref)

    acc_ref[...] += jnp.dot(x_ref[...], w1_ref[...],
                            preferred_element_type=jnp.float32)

    @pl.when(k == pl.num_programs(1) - 1)
    def _():
        o_ref[...] = acc_ref[...] + b1_ref[...]


def layer1_matmul(x2d, w1, b1, *, tk=16384, vmem_limit_bytes=32 << 20):
    """x2d: (B, D_IN) bf16, w1: (D_IN, H1) bf16, b1: (1, H1) f32 -> (B, H1) f32."""
    B, K = x2d.shape
    assert K % tk == 0, (K, tk)
    nsteps = K // tk

    # Guard VMEM: double-buffered x + w1 tiles + output/scratch + slack.
    need = (2 * B * tk * x2d.dtype.itemsize          # x double buffer
            + 2 * tk * H1_HALF * w1.dtype.itemsize   # w1 double buffer
            + 8 * B * H1                              # out + acc (f32, generous)
            + (2 << 20))                              # slack
    assert need <= vmem_limit_bytes, (
        f"VMEM budget exceeded ({need} > {vmem_limit_bytes}); lower tk or B")

    flops = 2 * B * K * H1
    bytes_accessed = (COL_SPLIT * B * K * x2d.dtype.itemsize   # x streamed per half
                      + K * H1 * w1.dtype.itemsize             # w1 (dominant)
                      + H1 * 4 + B * H1 * 4)                   # bias + output

    return pl.pallas_call(
        layer1_kernel,
        out_shape=jax.ShapeDtypeStruct((B, H1), jnp.float32),
        grid_spec=pltpu.PrefetchScalarGridSpec(
            num_scalar_prefetch=0,
            grid=(COL_SPLIT, nsteps),
            in_specs=[
                pl.BlockSpec((B, tk), lambda c, k: (0, k)),          # x tile
                pl.BlockSpec((tk, H1_HALF), lambda c, k: (k, c)),    # w1 tile
                pl.BlockSpec((1, H1_HALF), lambda c, k: (0, c)),     # b1 half
            ],
            out_specs=pl.BlockSpec((B, H1_HALF), lambda c, k: (0, c)),
            scratch_shapes=[pltpu.VMEM((B, H1_HALF), jnp.float32)],
        ),
        compiler_params=pltpu.CompilerParams(
            dimension_semantics=("parallel", "arbitrary"),
            vmem_limit_bytes=vmem_limit_bytes,
        ),
        cost_estimate=pl.CostEstimate(
            flops=flops, transcendentals=0, bytes_accessed=bytes_accessed),
    )(x2d, w1, b1)


# ---------------------------------------------------------------------------
# Kernel 2: tiny head on the (B, 256) activation, everything resident in VMEM.
#   BN1 -> ReLU -> Linear(256,64) -> BN2 -> ReLU -> Linear(64,30)
#   NOTE: batch statistics need the FULL batch resident (no B tiling here).
# ---------------------------------------------------------------------------
def head_kernel(h_ref, g1_ref, be1_ref, w2_ref, b2_ref, g2_ref, be2_ref,
                w3_ref, b3_ref, o_ref):
    h = h_ref[...]

    # BatchNorm1d(256), training mode: batch mean, biased variance.
    mu1 = jnp.mean(h, axis=0, keepdims=True)
    var1 = jnp.mean((h - mu1) ** 2, axis=0, keepdims=True)
    h = (h - mu1) * jax.lax.rsqrt(var1 + BN_EPS) * g1_ref[...] + be1_ref[...]
    h = jnp.maximum(h, 0.0)                                   # ReLU

    # Linear(256, 64)
    h = jnp.dot(h, w2_ref[...], preferred_element_type=jnp.float32,
                precision=jax.lax.Precision.HIGHEST) + b2_ref[...]

    # BatchNorm1d(64)
    mu2 = jnp.mean(h, axis=0, keepdims=True)
    var2 = jnp.mean((h - mu2) ** 2, axis=0, keepdims=True)
    h = (h - mu2) * jax.lax.rsqrt(var2 + BN_EPS) * g2_ref[...] + be2_ref[...]
    h = jnp.maximum(h, 0.0)                                   # ReLU

    # Linear(64, 30)
    o_ref[...] = jnp.dot(h, w3_ref[...], preferred_element_type=jnp.float32,
                         precision=jax.lax.Precision.HIGHEST) + b3_ref[...]


def head(h, p):
    B = h.shape[0]
    return pl.pallas_call(
        head_kernel,
        out_shape=jax.ShapeDtypeStruct((B, H3), jnp.float32),
    )(h, p["g1"], p["be1"], p["w2"], p["b2"], p["g2"], p["be2"],
      p["w3"], p["b3"])


# ---------------------------------------------------------------------------
# Parameter init (deterministic, PyTorch-style uniform(-1/sqrt(fan_in), ...)).
# w1 is stored in bf16: the kernel is HBM-bandwidth bound on streaming it.
# ---------------------------------------------------------------------------
def init_params(key):
    ks = jax.random.split(key, 6)

    def lin(kw, kb, fan_in, fan_out, w_dtype=jnp.float32):
        bound = 1.0 / jnp.sqrt(fan_in)
        w = jax.random.uniform(kw, (fan_in, fan_out), jnp.float32, -bound, bound)
        b = jax.random.uniform(kb, (1, fan_out), jnp.float32, -bound, bound)
        return w.astype(w_dtype), b

    w1, b1 = lin(ks[0], ks[1], D_IN, H1, w_dtype=jnp.bfloat16)
    w2, b2 = lin(ks[2], ks[3], H1, H2)
    w3, b3 = lin(ks[4], ks[5], H2, H3)
    # BatchNorm1d default init: weight=1, bias=0
    g1, be1 = jnp.ones((1, H1), jnp.float32), jnp.zeros((1, H1), jnp.float32)
    g2, be2 = jnp.ones((1, H2), jnp.float32), jnp.zeros((1, H2), jnp.float32)
    return dict(w1=w1, b1=b1, g1=g1, be1=be1,
                w2=w2, b2=b2, g2=g2, be2=be2,
                w3=w3, b3=b3)


@jax.jit
def dnn_forward(x, params):
    B = x.shape[0]
    # x.view(B, -1); cast the streamed activation to bf16 (bandwidth-bound path,
    # MXU would use bf16 input precision at default settings anyway).
    x2d = x.reshape(B, -1).astype(jnp.bfloat16)
    h = layer1_matmul(x2d, params["w1"], params["b1"])     # (B, 256) f32 pre-BN
    return head(h, params)                                  # (B, 30)  f32


if __name__ == "__main__":
    key = jax.random.PRNGKey(0)
    kp, kx = jax.random.split(key)
    params = init_params(kp)
    # Batch of 2 NCHW images; 3*256*256 features are fixed by the first Linear.
    x = jax.random.normal(kx, (2, 3, 256, 256), dtype=jnp.float32)
    out = dnn_forward(x, params)
    out = jax.block_until_ready(out)
    assert out.shape == (2, 30), out.shape
    assert bool(jnp.all(jnp.isfinite(out)))
    print("KERNEL_OK")
</pallas_src>

<mosaic_0001>
module attributes {stable_mosaic.version = 11 : i64} {
  func.func @layer1_kernel(%arg0: i32, %arg1: i32, %arg2: memref<2x16384xbf16, #tpu.memory_space<vmem>>, %arg3: memref<16384x128xbf16, #tpu.memory_space<vmem>>, %arg4: memref<1x128xf32, #tpu.memory_space<vmem>>, %arg5: memref<2x128xf32, #tpu.memory_space<vmem>>, %arg6: memref<2x128xf32, #tpu.memory_space<vmem>>) attributes {dimension_semantics = [#tpu.dimension_semantics<parallel>, #tpu.dimension_semantics<arbitrary>], iteration_bounds = array<i64: 2, 12>, scalar_prefetch = 0 : i64, scratch_operands = 1 : i64, tpu.core_type = #tpu.core_type<tc>, window_params = [{transform_indices = @transform_0, window_bounds = array<i64: 2, 16384>}, {transform_indices = @transform_1, window_bounds = array<i64: 16384, 128>}, {transform_indices = @transform_2, window_bounds = array<i64: 1, 128>}, {transform_indices = @transform_3, window_bounds = array<i64: 2, 128>}]} {
    %c0_i32 = arith.constant 0 : i32
    %0 = arith.cmpi eq, %arg1, %c0_i32 : i32
    %1 = arith.extui %0 : i1 to i32
    %c0_i32_0 = arith.constant 0 : i32
    %2 = arith.cmpi ne, %1, %c0_i32_0 : i32
    scf.if %2 {
      %cst_9 = arith.constant 0.000000e+00 : f32
      %12 = vector.broadcast %cst_9 : f32 to vector<2x128xf32>
      %c0_10 = arith.constant 0 : index
      %c0_11 = arith.constant 0 : index
      %13 = vector.load %arg6[%c0_10, %c0_11] : memref<2x128xf32, #tpu.memory_space<vmem>>, vector<2x128xf32>
      tpu.vector_store %arg6[%c0_10, %c0_11], %12 {strides = array<i32>} : memref<2x128xf32, #tpu.memory_space<vmem>>, vector<2x128xf32>,
    } else {
    }
    %c0 = arith.constant 0 : index
    %c0_1 = arith.constant 0 : index
    %3 = vector.load %arg6[%c0, %c0_1] : memref<2x128xf32, #tpu.memory_space<vmem>>, vector<2x128xf32>
    %c0_2 = arith.constant 0 : index
    %c0_3 = arith.constant 0 : index
    %4 = vector.load %arg2[%c0_2, %c0_3] : memref<2x16384xbf16, #tpu.memory_space<vmem>>, vector<2x16384xbf16>
    %c0_4 = arith.constant 0 : index
    %c0_5 = arith.constant 0 : index
    %5 = vector.load %arg3[%c0_4, %c0_5] : memref<16384x128xbf16, #tpu.memory_space<vmem>>, vector<16384x128xbf16>
    %cst = arith.constant dense<0.000000e+00> : vector<2x128xf32>
    %6 = tpu.matmul %4, %5, %cst {dimension_numbers = #tpu.dot_dimension_numbers<[1], [0], [0], [1], [0, 0, 1, 1], [], []>} : vector<2x16384xbf16>, vector<16384x128xbf16>, vector<2x128xf32> -> vector<2x128xf32>
    %7 = arith.addf %3, %6 : vector<2x128xf32>
    %c0_6 = arith.constant 0 : index
    %c0_7 = arith.constant 0 : index
    %8 = vector.load %arg6[%c0_6, %c0_7] : memref<2x128xf32, #tpu.memory_space<vmem>>, vector<2x128xf32>
    tpu.vector_store %arg6[%c0_6, %c0_7], %7 {strides = array<i32>} : memref<2x128xf32, #tpu.memory_space<vmem>>, vector<2x128xf32>,
    %c11_i32 = arith.constant 11 : i32
    %9 = arith.cmpi eq, %arg1, %c11_i32 : i32
    %10 = arith.extui %9 : i1 to i32
    %c0_i32_8 = arith.constant 0 : i32
    %11 = arith.cmpi ne, %10, %c0_i32_8 : i32
    scf.if %11 {
      %c0_9 = arith.constant 0 : index
      %c0_10 = arith.constant 0 : index
      %12 = vector.load %arg6[%c0_9, %c0_10] : memref<2x128xf32, #tpu.memory_space<vmem>>, vector<2x128xf32>
      %c0_11 = arith.constant 0 : index
      %c0_12 = arith.constant 0 : index
      %13 = vector.load %arg4[%c0_11, %c0_12] : memref<1x128xf32, #tpu.memory_space<vmem>>, vector<1x128xf32>
      %14 = vector.broadcast %13 : vector<1x128xf32> to vector<2x128xf32>
      %15 = arith.addf %12, %14 : vector<2x128xf32>
      %c0_13 = arith.constant 0 : index
      %c0_14 = arith.constant 0 : index
      %16 = vector.load %arg5[%c0_13, %c0_14] : memref<2x128xf32, #tpu.memory_space<vmem>>, vector<2x128xf32>
      tpu.vector_store %arg5[%c0_13, %c0_14], %15 {strides = array<i32>} : memref<2x128xf32, #tpu.memory_space<vmem>>, vector<2x128xf32>,
    } else {
    }
    return
  }
  func.func @transform_0(%arg0: i32, %arg1: i32) -> (i32, i32) {
    %c0_i32 = arith.constant 0 : i32
    %c0_i32_0 = arith.constant 0 : i32
    return %c0_i32, %arg1 : i32, i32
  }
  func.func @transform_1(%arg0: i32, %arg1: i32) -> (i32, i32) {
    %c0_i32 = arith.constant 0 : i32
    return %arg1, %arg0 : i32, i32
  }
  func.func @transform_2(%arg0: i32, %arg1: i32) -> (i32, i32) {
    %c0_i32 = arith.constant 0 : i32
    %c0_i32_0 = arith.constant 0 : i32
    return %c0_i32, %arg0 : i32, i32
  }
  func.func @transform_3(%arg0: i32, %arg1: i32) -> (i32, i32) {
    %c0_i32 = arith.constant 0 : i32
    %c0_i32_0 = arith.constant 0 : i32
    return %c0_i32, %arg0 : i32, i32
  }
}

module attributes {stable_mosaic.version = 11 : i64} {
  func.func @head_kernel(%arg0: memref<2x256xf32, #tpu.memory_space<vmem>>, %arg1: memref<1x256xf32, #tpu.memory_space<vmem>>, %arg2: memref<1x256xf32, #tpu.memory_space<vmem>>, %arg3: memref<256x64xf32, #tpu.memory_space<vmem>>, %arg4: memref<1x64xf32, #tpu.memory_space<vmem>>, %arg5: memref<1x64xf32, #tpu.memory_space<vmem>>, %arg6: memref<1x64xf32, #tpu.memory_space<vmem>>, %arg7: memref<64x30xf32, #tpu.memory_space<vmem>>, %arg8: memref<1x30xf32, #tpu.memory_space<vmem>>, %arg9: memref<2x30xf32, #tpu.memory_space<vmem>>) attributes {dimension_semantics = [], scalar_prefetch = 0 : i64, scratch_operands = 0 : i64, tpu.core_type = #tpu.core_type<tc>} {
    %c0 = arith.constant 0 : index
    %c0_0 = arith.constant 0 : index
    %0 = vector.load %arg0[%c0, %c0_0] : memref<2x256xf32, #tpu.memory_space<vmem>>, vector<2x256xf32>
    %cst = arith.constant dense<0.000000e+00> : vector<256xf32>
    %1 = vector.multi_reduction <add>, %0, %cst [0] : vector<2x256xf32> to vector<256xf32>
    %2 = vector.shape_cast %1 : vector<256xf32> to vector<1x256xf32>
    %cst_1 = arith.constant 2.000000e+00 : f32
    %3 = vector.broadcast %cst_1 : f32 to vector<1x256xf32>
    %4 = arith.divf %2, %3 : vector<1x256xf32>
    %5 = vector.broadcast %4 : vector<1x256xf32> to vector<2x256xf32>
    %6 = arith.subf %0, %5 : vector<2x256xf32>
    %7 = arith.mulf %6, %6 : vector<2x256xf32>
    %cst_2 = arith.constant dense<0.000000e+00> : vector<256xf32>
    %8 = vector.multi_reduction <add>, %7, %cst_2 [0] : vector<2x256xf32> to vector<256xf32>
    %9 = vector.shape_cast %8 : vector<256xf32> to vector<1x256xf32>
    %cst_3 = arith.constant 2.000000e+00 : f32
    %10 = vector.broadcast %cst_3 : f32 to vector<1x256xf32>
    %11 = arith.divf %9, %10 : vector<1x256xf32>
    %12 = vector.broadcast %4 : vector<1x256xf32> to vector<2x256xf32>
    %13 = arith.subf %0, %12 : vector<2x256xf32>
    %cst_4 = arith.constant 9.99999974E-6 : f32
    %14 = vector.broadcast %cst_4 : f32 to vector<1x256xf32>
    %15 = arith.addf %11, %14 : vector<1x256xf32>
    %16 = math.rsqrt %15 : vector<1x256xf32>
    %17 = vector.broadcast %16 : vector<1x256xf32> to vector<2x256xf32>
    %18 = arith.mulf %13, %17 : vector<2x256xf32>
    %c0_5 = arith.constant 0 : index
    %c0_6 = arith.constant 0 : index
    %19 = vector.load %arg1[%c0_5, %c0_6] : memref<1x256xf32, #tpu.memory_space<vmem>>, vector<1x256xf32>
    %20 = vector.broadcast %19 : vector<1x256xf32> to vector<2x256xf32>
    %21 = arith.mulf %18, %20 : vector<2x256xf32>
    %c0_7 = arith.constant 0 : index
    %c0_8 = arith.constant 0 : index
    %22 = vector.load %arg2[%c0_7, %c0_8] : memref<1x256xf32, #tpu.memory_space<vmem>>, vector<1x256xf32>
    %23 = vector.broadcast %22 : vector<1x256xf32> to vector<2x256xf32>
    %24 = arith.addf %21, %23 : vector<2x256xf32>
    %cst_9 = arith.constant 0.000000e+00 : f32
    %25 = vector.broadcast %cst_9 : f32 to vector<2x256xf32>
    %26 = arith.maximumf %24, %25 : vector<2x256xf32>
    %c0_10 = arith.constant 0 : index
    %c0_11 = arith.constant 0 : index
    %27 = vector.load %arg3[%c0_10, %c0_11] : memref<256x64xf32, #tpu.memory_space<vmem>>, vector<256x64xf32>
    %cst_12 = arith.constant dense<0.000000e+00> : vector<2x64xf32>
    %28 = tpu.matmul %26, %27, %cst_12 {dimension_numbers = #tpu.dot_dimension_numbers<[1], [0], [0], [1], [0, 0, 1, 1], [], []>, precision = #tpu.contract_precision<fp32>} : vector<2x256xf32>, vector<256x64xf32>, vector<2x64xf32> -> vector<2x64xf32>
    %c0_13 = arith.constant 0 : index
    %c0_14 = arith.constant 0 : index
    %29 = vector.load %arg4[%c0_13, %c0_14] : memref<1x64xf32, #tpu.memory_space<vmem>>, vector<1x64xf32>
    %30 = vector.broadcast %29 : vector<1x64xf32> to vector<2x64xf32>
    %31 = arith.addf %28, %30 : vector<2x64xf32>
    %cst_15 = arith.constant dense<0.000000e+00> : vector<64xf32>
    %32 = vector.multi_reduction <add>, %31, %cst_15 [0] : vector<2x64xf32> to vector<64xf32>
    %33 = vector.shape_cast %32 : vector<64xf32> to vector<1x64xf32>
    %cst_16 = arith.constant 2.000000e+00 : f32
    %34 = vector.broadcast %cst_16 : f32 to vector<1x64xf32>
    %35 = arith.divf %33, %34 : vector<1x64xf32>
    %36 = vector.broadcast %35 : vector<1x64xf32> to vector<2x64xf32>
    %37 = arith.subf %31, %36 : vector<2x64xf32>
    %38 = arith.mulf %37, %37 : vector<2x64xf32>
    %cst_17 = arith.constant dense<0.000000e+00> : vector<64xf32>
    %39 = vector.multi_reduction <add>, %38, %cst_17 [0] : vector<2x64xf32> to vector<64xf32>
    %40 = vector.shape_cast %39 : vector<64xf32> to vector<1x64xf32>
    %cst_18 = arith.constant 2.000000e+00 : f32
    %41 = vector.broadcast %cst_18 : f32 to vector<1x64xf32>
    %42 = arith.divf %40, %41 : vector<1x64xf32>
    %43 = vector.broadcast %35 : vector<1x64xf32> to vector<2x64xf32>
    %44 = arith.subf %31, %43 : vector<2x64xf32>
    %cst_19 = arith.constant 9.99999974E-6 : f32
    %45 = vector.broadcast %cst_19 : f32 to vector<1x64xf32>
    %46 = arith.addf %42, %45 : vector<1x64xf32>
    %47 = math.rsqrt %46 : vector<1x64xf32>
    %48 = vector.broadcast %47 : vector<1x64xf32> to vector<2x64xf32>
    %49 = arith.mulf %44, %48 : vector<2x64xf32>
    %c0_20 = arith.constant 0 : index
    %c0_21 = arith.constant 0 : index
    %50 = vector.load %arg5[%c0_20, %c0_21] : memref<1x64xf32, #tpu.memory_space<vmem>>, vector<1x64xf32>
    %51 = vector.broadcast %50 : vector<1x64xf32> to vector<2x64xf32>
    %52 = arith.mulf %49, %51 : vector<2x64xf32>
    %c0_22 = arith.constant 0 : index
    %c0_23 = arith.constant 0 : index
    %53 = vector.load %arg6[%c0_22, %c0_23] : memref<1x64xf32, #tpu.memory_space<vmem>>, vector<1x64xf32>
    %54 = vector.broadcast %53 : vector<1x64xf32> to vector<2x64xf32>
    %55 = arith.addf %52, %54 : vector<2x64xf32>
    %cst_24 = arith.constant 0.000000e+00 : f32
    %56 = vector.broadcast %cst_24 : f32 to vector<2x64xf32>
    %57 = arith.maximumf %55, %56 : vector<2x64xf32>
    %c0_25 = arith.constant 0 : index
    %c0_26 = arith.constant 0 : index
    %58 = vector.load %arg7[%c0_25, %c0_26] : memref<64x30xf32, #tpu.memory_space<vmem>>, vector<64x30xf32>
    %cst_27 = arith.constant dense<0.000000e+00> : vector<2x30xf32>
    %59 = tpu.matmul %57, %58, %cst_27 {dimension_numbers = #tpu.dot_dimension_numbers<[1], [0], [0], [1], [0, 0, 1, 1], [], []>, precision = #tpu.contract_precision<fp32>} : vector<2x64xf32>, vector<64x30xf32>, vector<2x30xf32> -> vector<2x30xf32>
    %c0_28 = arith.constant 0 : index
    %c0_29 = arith.constant 0 : index
    %60 = vector.load %arg8[%c0_28, %c0_29] : memref<1x30xf32, #tpu.memory_space<vmem>>, vector<1x30xf32>
    %61 = vector.broadcast %60 : vector<1x30xf32> to vector<2x30xf32>
    %62 = arith.addf %59, %61 : vector<2x30xf32>
    %c0_30 = arith.constant 0 : index
    %c0_31 = arith.constant 0 : index
    %63 = vector.load %arg9[%c0_30, %c0_31] : memref<2x30xf32, #tpu.memory_space<vmem>>, vector<2x30xf32>
    tpu.vector_store %arg9[%c0_30, %c0_31], %62 {strides = array<i32>} : memref<2x30xf32, #tpu.memory_space<vmem>>, vector<2x30xf32>,
    return
  }
}

</mosaic_0001>

<bundles_post_ra>
// kernel: dnn_forward.3
= control target key start
LH: loop header
LB: loop body
LE: loop exit
PB: predicated region body
PF: predicated region fallthrough
CT: control target
= control target key end

     0   :  { %s2006_s0 = inlined_call_operand.vmem [shape: f32[2,256], index: 0, kind: input, shape index: {}]   ;;  %s2007_s1 = inlined_call_operand.vmem [shape: f32[1,256], index: 1, kind: input, shape index: {}]   ;;  %s2008_s2 = inlined_call_operand.vmem [shape: f32[1,256], index: 2, kind: input, shape index: {}]   ;;  %s2009_s3 = inlined_call_operand.vmem [shape: f32[256,64], index: 3, kind: input, shape index: {}]   ;;  %s2010_s4 = inlined_call_operand.vmem [shape: f32[1,64], index: 4, kind: input, shape index: {}]   ;;  %s2011_s5 = inlined_call_operand.vmem [shape: f32[1,64], index: 5, kind: input, shape index: {}]   ;;  %s2012_s6 = inlined_call_operand.vmem [shape: f32[1,64], index: 6, kind: input, shape index: {}]   ;;  %s2013_s7 = inlined_call_operand.vmem [shape: f32[64,30], index: 7, kind: input, shape index: {}]   ;;  %s2014_s8 = inlined_call_operand.vmem [shape: f32[1,30], index: 8, kind: input, shape index: {}]   ;;  %s2015_s9 = inlined_call_operand.hbm [shape: f32[2,30], index: 9, kind: output, shape index: {}]  }
   0x1   :  { %v153_v0 = vld [vmem:[%s2009_s3 + $0x78] sm:$0xff]  ;;  %v152_v1 = vld [vmem:[%s2009_s3 + $0x70] sm:$0xff]  ;;  %v151_v2 = vld [vmem:[%s2009_s3 + $0x68] sm:$0xff] }
   0x2   :  { %v1276_v3 = vand.u32 4294901760, %v153_v0  ;;  %v1278_v4 = vand.u32 4294901760, %v152_v1  ;;  %v1280_v5 = vand.u32 4294901760, %v151_v2  ;;  %v150_v6 = vld [vmem:[%s2009_s3 + $0x60] sm:$0xff]  ;;  %v149_v7 = vld [vmem:[%s2009_s3 + $0x58] sm:$0xff]  ;;  %v148_v8 = vld [vmem:[%s2009_s3 + $0x50] sm:$0xff] }
   0x3   :  { %v1291_v9 = vand.u32 4294901760, %v150_v6  ;;  %v1293_v10 = vand.u32 4294901760, %v149_v7  ;;  %v1295_v11 = vand.u32 4294901760, %v148_v8  ;;  %v147_v12 = vld [vmem:[%s2009_s3 + $0x48] sm:$0xff]  ;;  %v146_v13 = vld [vmem:[%s2009_s3 + $0x40] sm:$0xff]  ;;  %v145_v25 = vld [vmem:[%s2009_s3 + $0x38] sm:$0xff] }
   0x4   :  { %v1304_v14 = vsub.f32 %v153_v0, %v1276_v3  ;;  %181 = vmatpush.msra.mxu0 %v1276_v3  ;;  %v1308_v15 = vsub.f32 %v152_v1, %v1278_v4  ;;  %377 = vmatpush.msra.mxu3 %v1276_v3  ;;  %v1312_v16 = vsub.f32 %v151_v2, %v1280_v5  ;;  %v1314_v17 = vand.u32 4294901760, %v147_v12  ;;  %v144_v28 = vld [vmem:[%s2009_s3 + $0x30] sm:$0xff]  ;;  %v143_v33 = vld [vmem:[%s2009_s3 + $0x28] sm:$0xff]  ;;  %v1361_v34 = vld [vmem:[%s2006_s0] sm:$0xf] }
   0x5   :  { %v1317_v18 = vsub.f32 %v150_v6, %v1291_v9  ;;  %v1320_v19 = vsub.f32 %v149_v7, %v1293_v10  ;;  %v1323_v20 = vsub.f32 %v148_v8, %v1295_v11  ;;  %v1330_v24 = vand.u32 4294901760, %v146_v13  ;;  %35 = vst [vmem:[#allocation1] ss:$4 sm:$0xff] %v1361_v34  ;;  %v142_v43 = vld [vmem:[%s2009_s3 + $0x20] sm:$0xff]  ;;  %v141_v48 = vld [vmem:[%s2009_s3 + $0x18] sm:$0xff] }
   0x6   :  { %324 = vmatpush.msra.mxu2 %v1304_v14  ;;  %183 = vmatpush.msra.mxu0 %v1278_v4  ;;  %v2030_v21 = vand.u32 4294901760, %v1304_v14  ;;  %v2029_v22 = vand.u32 4294901760, %v1308_v15  ;;  %v2026_v23 = vand.u32 4294901760, %v1312_v16  ;;  %v1338_v27 = vsub.f32 %v147_v12, %v1314_v17 }
   0x7   :  { %379 = vmatpush.msra.mxu3 %v1278_v4  ;;  %v2025_v26 = vand.u32 4294901760, %v1317_v18  ;;  %v2024_v32 = vand.u32 4294901760, %v1320_v19  ;;  %v2022_v35 = vand.u32 4294901760, %v1323_v20  ;;  %v1365_v36 = vand.u32 4294901760, %v145_v25 }
   0x8   :  { %327 = vmatpush.msra.mxu2 %v1308_v15  ;;  %v224_v29 = vsub.f32 %v1304_v14, %v2030_v21  ;;  %185 = vmatpush.msra.mxu0 %v1280_v5  ;;  %v230_v30 = vsub.f32 %v1308_v15, %v2029_v22  ;;  %v236_v31 = vsub.f32 %v1312_v16, %v2026_v23  ;;  %v2021_v41 = vand.u32 4294901760, %v1338_v27 }
   0x9   :  { %381 = vmatpush.msra.mxu3 %v1280_v5  ;;  %v242_v39 = vsub.f32 %v1317_v18, %v2025_v26  ;;  %v1374_v40 = vsub.f32 %v146_v13, %v1330_v24  ;;  %v1379_v42 = vsub.f32 %v145_v25, %v1365_v36  ;;  %v248_v45 = vsub.f32 %v1320_v19, %v2024_v32 }
   0xa   :  { %v225_v37 = vand.u32 4294901760, %v224_v29  ;;  %330 = vmatpush.msra.mxu2 %v1312_v16  ;;  %v231_v38 = vand.u32 4294901760, %v230_v30  ;;  %187 = vmatpush.msra.mxu0 %v1291_v9  ;;  %v237_v44 = vand.u32 4294901760, %v236_v31  ;;  %v1388_v46 = vand.u32 4294901760, %v144_v28 }
   0xb   :  { %383 = vmatpush.msra.mxu3 %v1291_v9  ;;  %v1390_v47 = vand.u32 4294901760, %v143_v33  ;;  %v254_v49 = vsub.f32 %v1323_v20, %v2022_v35 }
   0xc   :  { %226 = vmatpush.msra.mxu1 %v225_v37  ;;  %333 = vmatpush.msra.mxu2 %v1317_v18 }
   0xd   :  { %189 = vmatpush.msra.mxu0 %v1293_v10  ;;  %385 = vmatpush.msra.mxu3 %v1293_v10 }
   0xe   :  { %14 = vsyncpa [#allocation3], 0  ;;  %232 = vmatpush.msra.mxu1 %v231_v38  ;;  %336 = vmatpush.msra.mxu2 %v1320_v19  ;;  %v243_v50 = vand.u32 4294901760, %v242_v39  ;;  %v2019_v51 = vand.u32 4294901760, %v1374_v40  ;;  %v1403_v52 = vsub.f32 %v144_v28, %v1388_v46  ;;  %v1405_v53 = vand.u32 4294901760, %v142_v43  ;;  %v140_v54 = vld [vmem:[%s2009_s3 + $0x10] sm:$0xff] }
   0xf   :  { %191 = vmatpush.msra.mxu0 %v1295_v11  ;;  %387 = vmatpush.msra.mxu3 %v1295_v11  ;;  %v2017_v55 = vand.u32 4294901760, %v1379_v42  ;;  %v1413_v56 = vand.u32 4294901760, %v141_v48  ;;  %v249_v57 = vand.u32 4294901760, %v248_v45  ;;  %v260_v58 = vsub.f32 %v1338_v27, %v2021_v41  ;;  %v169_v60 = vld [vmem:[%s2009_s3 + $0xf8] sm:$0xff]  ;;  %v139_v62 = vld [vmem:[%s2009_s3 + $0x8] sm:$0xff]  ;;  %v168_v63 = vld [vmem:[%s2009_s3 + $0xf0] sm:$0xff] }
  0x10   :  { %238 = vmatpush.msra.mxu1 %v237_v44  ;;  %339 = vmatpush.msra.mxu2 %v1323_v20  ;;  %v1420_v59 = vsub.f32 %v143_v33, %v1390_v47  ;;  %v1427_v61 = vand.u32 4294901760, %v140_v54  ;;  %v255_v0 = vand.u32 4294901760, %v254_v49  ;;  %v266_v1 = vsub.f32 %v1374_v40, %v2019_v51  ;;  %v138_v7 = vld [vmem:[%s2009_s3] sm:$0xff]  ;;  %v167_v25 = vld [vmem:[%s2009_s3 + $0xe8] sm:$0xff]  ;;  %s1166_s0 = sshll.u32 %s2015_s9, 4  ;;  %s1167_s0 = int_to_ptr.hbm [resolvable:$true] %s1166_s0 }
  0x11   :  { %193 = vmatpush.msra.mxu0 %v1314_v17  ;;  %389 = vmatpush.msra.mxu3 %v1314_v17  ;;  %v2016_v2 = vand.u32 4294901760, %v1403_v52  ;;  %v1441_v6 = vsub.f32 %v142_v43, %v1405_v53  ;;  %v272_v8 = vsub.f32 %v1379_v42, %v2017_v55  ;;  %v1452_v12 = vsub.f32 %v141_v48, %v1413_v56  ;;  %v166_v33 = vld [vmem:[%s2009_s3 + $0xe0] sm:$0xff]  ;;  %v165_v43 = vld [vmem:[%s2009_s3 + $0xd8] sm:$0xff] }
  0x12   :  { %2052 = vst [vmem:[#allocation5_spill] sm:$0xff] %v1427_v61  ;;  %244 = vmatpush.msra.mxu1 %v243_v50  ;;  %342 = vmatpush.msra.mxu2 %v1338_v27  ;;  %v1454_v13 = vand.u32 4294901760, %v169_v60  ;;  %v261_v28 = vand.u32 4294901760, %v260_v58  ;;  %v2018_v29 = vand.u32 4294901760, %v1420_v59  ;;  %v1461_v30 = vand.u32 4294901760, %v139_v62  ;;  %v164_v58 = vld [vmem:[%s2009_s3 + $0xd0] sm:$0xff] }
  0x13   :  { %195 = vmatpush.msra.mxu0 %v1330_v24  ;;  %391 = vmatpush.msra.mxu3 %v1330_v24  ;;  %v1463_v31 = vand.u32 4294901760, %v168_v63  ;;  %v1471_v37 = vsub.f32 %v140_v54, %v1427_v61  ;;  %v1473_v38 = vand.u32 4294901760, %v138_v7  ;;  %v267_v44 = vand.u32 4294901760, %v266_v1 }
  0x14   :  { %2053 = vst [vmem:[#allocation6_spill] sm:$0xff] %v1454_v13  ;;  %250 = vmatpush.msra.mxu1 %v249_v57  ;;  %345 = vmatpush.msra.mxu2 %v1374_v40  ;;  %v1476_v39 = vsub.f32 %v169_v60, %v1454_v13  ;;  %v278_v45 = vsub.f32 %v1403_v52, %v2016_v2  ;;  %v2020_v48 = vand.u32 4294901760, %v1441_v6  ;;  %v1486_v49 = vand.u32 4294901760, %v167_v25 }
  0x15   :  { %2054 = vst [vmem:[#allocation7_spill] sm:$0xff] %v1461_v30  ;;  %197 = vmatpush.msra.mxu0 %v1365_v36  ;;  %393 = vmatpush.msra.mxu3 %v1365_v36  ;;  %v273_v50 = vand.u32 4294901760, %v272_v8  ;;  %v2023_v54 = vand.u32 4294901760, %v1452_v12  ;;  %v1491_v57 = vand.u32 4294901760, %v166_v33  ;;  %v284_v60 = vsub.f32 %v1420_v59, %v2018_v29 }
  0x16   :  { %2055 = vst [vmem:[#allocation8_spill] sm:$0xff] %v1473_v38  ;;  %256 = vmatpush.msra.mxu1 %v255_v0  ;;  %348 = vmatpush.msra.mxu2 %v1379_v42  ;;  %v1501_v0 = vsub.f32 %v139_v62, %v1461_v30  ;;  %v1504_v1 = vsub.f32 %v168_v63, %v1463_v31  ;;  %v1506_v8 = vand.u32 4294901760, %v165_v43  ;;  %v2028_v55 = vand.u32 4294901760, %v1476_v39 }
  0x17   :  { %2056 = vst [vmem:[#allocation9_spill] sm:$0xff] %v1476_v39  ;;  %199 = vmatpush.msra.mxu0 %v1388_v46  ;;  %395 = vmatpush.msra.mxu3 %v1388_v46  ;;  %v1512_v2 = vsub.f32 %v138_v7, %v1473_v38  ;;  %v279_v62 = vand.u32 4294901760, %v278_v45  ;;  %v290_v63 = vsub.f32 %v1441_v6, %v2020_v48  ;;  %v1522_v51 = vand.u32 4294901760, %v164_v58  ;;  %v163_v45 = vld [vmem:[%s2009_s3 + $0xc8] sm:$0xff] }
  0x18   :  { %262 = vmatpush.msra.mxu1 %v261_v28  ;;  %351 = vmatpush.msra.mxu2 %v1403_v52  ;;  %2057 = vst [vmem:[#allocation10_spill] sm:$0xff] %v1504_v1  ;;  %v2027_v28 = vand.u32 4294901760, %v1471_v37  ;;  %v1520_v29 = vsub.f32 %v167_v25, %v1486_v49  ;;  %v296_v7 = vsub.f32 %v1452_v12, %v2023_v54  ;;  %v285_v25 = vand.u32 4294901760, %v284_v60 }
  0x19   :  { %201 = vmatpush.msra.mxu0 %v1390_v47  ;;  %397 = vmatpush.msra.mxu3 %v1390_v47  ;;  %v2032_v48 = vand.u32 4294901760, %v1501_v0  ;;  %v2031_v41 = vand.u32 4294901760, %v1504_v1  ;;  %v1539_v35 = vsub.f32 %v165_v43, %v1506_v8  ;;  %v565_v60 = vsub.f32 %v1476_v39, %v2028_v55 }
  0x1a   :  { %268 = vmatpush.msra.mxu1 %v267_v44  ;;  %354 = vmatpush.msra.mxu2 %v1420_v59  ;;  %2058 = vst [vmem:[#allocation11_spill] sm:$0xff] %v1520_v29  ;;  %v1530_v44 = vsub.f32 %v166_v33, %v1491_v57  ;;  %v162_v33 = vld [vmem:[%s2009_s3 + $0xc0] sm:$0xff]  ;;  %v2033_v54 = vand.u32 4294901760, %v1512_v2  ;;  %v291_v43 = vand.u32 4294901760, %v290_v63  ;;  %v1555_v26 = vand.u32 4294901760, %v163_v45 }
  0x1b   :  { %203 = vmatpush.msra.mxu0 %v1405_v53  ;;  %399 = vmatpush.msra.mxu3 %v1405_v53  ;;  %2060 = vst [vmem:[#allocation13_spill] sm:$0xff] %v1539_v35  ;;  %v1558_v23 = vsub.f32 %v164_v58, %v1522_v51  ;;  %v1563_v55 = vand.u32 4294901760, %v162_v33  ;;  %v297_v63 = vand.u32 4294901760, %v296_v7  ;;  %v308_v58 = vsub.f32 %v1501_v0, %v2032_v48 }
  0x1c   :  { %2059 = vst [vmem:[#allocation12_spill] sm:$0xff] %v1530_v44  ;;  %274 = vmatpush.msra.mxu1 %v273_v50  ;;  %357 = vmatpush.msra.mxu2 %v1441_v6  ;;  %v302_v50 = vsub.f32 %v1471_v37, %v2027_v28  ;;  %v571_v22 = vsub.f32 %v1504_v1, %v2031_v41  ;;  %v566_v32 = vand.u32 4294901760, %v565_v60  ;;  %v2062_v41 = vand.u32 4294901760, %v1520_v29 }
  0x1d   :  { %205 = vmatpush.msra.mxu0 %v1413_v56  ;;  %401 = vmatpush.msra.mxu3 %v1413_v56  ;;  %2061 = vst [vmem:[#allocation14_spill] sm:$0xff] %v1558_v23  ;;  %v314_v7 = vsub.f32 %v1512_v2, %v2033_v54  ;;  %v1590_v21 = vsub.f32 %v163_v45, %v1555_v26  ;;  %v159_v54 = vld [vmem:[%s2009_s3 + $0xa8] sm:$0xff]  ;;  %vm40_vm0 = vcmask 1041408   ;;  %v309_v45 = vand.u32 4294901760, %v308_v58 }
  0x1e   :  { %280 = vmatpush.msra.mxu1 %v279_v62  ;;  %360 = vmatpush.msra.mxu2 %v1452_v12  ;;  %v161_v62 = vld [vmem:[%s2009_s3 + $0xb8] sm:$0xff]  ;;  %v303_v28 = vand.u32 4294901760, %v302_v50  ;;  %v577_v48 = vsub.f32 %v1520_v29, %v2062_v41  ;;  %v1603_v41 = vsub.f32 %v162_v33, %v1563_v55  ;;  %v36_v50 = vld.sshfl [vmem:[#allocation1] sm:$0xff pattern:$0x73625140]  ;;  %v572_v29 = vand.u32 4294901760, %v571_v22 }
  0x1f   :  { %207 = vmatpush.msra.mxu0 %v1427_v61  ;;  %403 = vmatpush.msra.mxu3 %v1427_v61  ;;  %v1592_v60 = vand.u32 4294901760, %v161_v62  ;;  %v2064_v39 = vand.u32 4294901760, %v1539_v35  ;;  %v315_v33 = vand.u32 4294901760, %v314_v7  ;;  %v2067_v7 = vand.u32 4294901760, %v1308_v15 }
  0x20   :  { %286 = vmatpush.msra.mxu1 %v285_v25  ;;  %363 = vmatpush.msra.mxu2 %v1471_v37  ;;  %v160_v25 = vld [vmem:[%s2009_s3 + $0xb0] sm:$0xff]  ;;  %v578_v22 = vand.u32 4294901760, %v577_v48  ;;  %v2051_v48 = vand.u32 4294901760, %v1603_v41  ;;  %v2068_v15 = vand.u32 4294901760, %v1312_v16  ;;  %vm862_vm8 = vcmask 517120  }
  0x21   :  { %209 = vmatpush.msra.mxu0 %v1461_v30  ;;  %405 = vmatpush.msra.mxu3 %v1461_v30  ;;  %v589_v30 = vsub.f32 %v1539_v35, %v2064_v39  ;;  %v1609_v61 = vand.u32 4294901760, %v160_v25  ;;  %v2066_v39 = vand.u32 4294901760, %v1558_v23  ;;  %vm916_vm12 = vcmask 523264  }
  0x22   :  { %292 = vmatpush.msra.mxu1 %v291_v43  ;;  %366 = vmatpush.msra.mxu2 %v1501_v0  ;;  %v2063_v43 = vand.u32 4294901760, %v1530_v44  ;;  %vm1157_vm13 = vcmask 238592  }
  0x23   :  { %211 = vmatpush.msra.mxu0 %v1473_v38  ;;  %407 = vmatpush.msra.mxu3 %v1473_v38  ;;  %v37_v38 = vld.sshfl [vmem:[#allocation1 + $0x8] sm:$0xff pattern:$0x73625140]  ;;  %v595_v58 = vsub.f32 %v1558_v23, %v2066_v39  ;;  %v1636_v39 = vsub.f32 %v160_v25, %v1609_v61 }
  0x24   :  { %v583_v1 = vsub.f32 %v1530_v44, %v2063_v43  ;;  %298 = vmatpush.msra.mxu1 %v297_v63  ;;  %369 = vmatpush.msra.mxu2 %v1512_v2  ;;  %v2065_v43 = vand.u32 4294901760, %v1304_v14  ;;  %v1614_v44 = vand.u32 4294901760, %v159_v54  ;;  %v158_v63 = vld [vmem:[%s2009_s3 + $0xa0] sm:$0xff]  ;;  %v157_v14 = vld [vmem:[%s2009_s3 + $0x98] sm:$0xff] }
  0x25   :  { %567 = vmatpush.msrb.mxu3 %v566_v32  ;;  %v1638_v35 = vand.u32 4294901760, %v158_v63 }
  0x26   :  { %522 = vmatpush.msrb.mxu2 %v1454_v13  ;;  %418 = vmatpush.msrb.mxu0 %v2065_v43  ;;  %v1624_v13 = vsub.f32 %v161_v62, %v1592_v60  ;;  %v584_v32 = vand.u32 4294901760, %v583_v1  ;;  %v48_v43 = vsel %vm40_vm0, %v37_v38, 0.0  ;;  %v590_v62 = vand.u32 4294901760, %v589_v30 }
  0x27   :  { %304 = vmatpush.msra.mxu1 %v303_v28  ;;  %v41_v28 = vsel %vm40_vm0, %v36_v50, 0.0  ;;  %573 = vmatpush.msrb.mxu3 %v572_v29  ;;  %v1644_v1 = vsub.f32 %v159_v54, %v1614_v44  ;;  %v1646_v50 = vand.u32 4294901760, %v157_v14  ;;  %v156_v29 = vld [vmem:[%s2009_s3 + $0x90] sm:$0xff]  ;;  %v49_v30 = vrot.slane %v48_v43, 4 }
  0x28   :  { %524 = vmatpush.msrb.mxu2 %v1463_v31  ;;  %422 = vmatpush.msrb.mxu0 %v2067_v7  ;;  %v42_v23 = vrot.slane %v41_v28, 4  ;;  %v2069_v38 = vand.u32 4294901760, %v1590_v21  ;;  %v1215_v7 = vmov 2.0   ;;  %v596_v54 = vand.u32 4294901760, %v595_v58 }
  0x29   :  { %310 = vmatpush.msra.mxu1 %v309_v45  ;;  %579 = vmatpush.msrb.mxu3 %v578_v22  ;;  %v612_v45 = vand.u32 4294901760, %v1624_v13  ;;  %1181 = vrcp.f32 %v1215_v7  ;;  %v50_v22 = vadd.f32 %v49_v30, %v48_v43  ;;  %v1675_v43 = vsub.f32 %v157_v14, %v1646_v50 }
  0x2a   :  { %526 = vmatpush.msrb.mxu2 %v1486_v49  ;;  %426 = vmatpush.msrb.mxu0 %v2068_v15  ;;  %v601_v25 = vsub.f32 %v1590_v21, %v2069_v38  ;;  %v43_v16 = vadd.f32 %v42_v23, %v41_v28  ;;  %v607_v15 = vsub.f32 %v1603_v41, %v2051_v48  ;;  %v2070_v38 = vand.u32 4294901760, %v1317_v18 }
  0x2b   :  { %316 = vmatpush.msra.mxu1 %v315_v33  ;;  %v155_v33 = vld [vmem:[%s2009_s3 + $0x88] sm:$0xff]  ;;  %585 = vmatpush.msrb.mxu3 %v584_v32  ;;  %v618_v23 = vand.u32 4294901760, %v1636_v39  ;;  %v1669_v28 = vand.u32 4294901760, %v156_v29  ;;  %v51_v18 = vrot.slane %v50_v22, 2  ;;  %v2071_v32 = vand.u32 4294901760, %v1320_v19 }
  0x2c   :  { %528 = vmatpush.msrb.mxu2 %v1491_v57  ;;  %430 = vmatpush.msrb.mxu0 %v2070_v38  ;;  %v44_v58 = vrot.slane %v43_v16, 2  ;;  %v602_v30 = vand.u32 4294901760, %v601_v25  ;;  %v1682_v38 = vand.u32 4294901760, %v155_v33  ;;  %v2072_v7 = vand.u32 4294901760, %v1323_v20 }
  0x2d   :  { %485 = vmatpush.msrb.mxu1 %v1276_v3  ;;  %v1667_v3 = vsub.f32 %v158_v63, %v1638_v35  ;;  %591 = vmatpush.msrb.mxu3 %v590_v62  ;;  %v613_v63 = vsub.f32 %v1624_v13, %v612_v45  ;;  %v52_v48 = vadd.f32 %v51_v18, %v50_v22  ;;  %v608_v19 = vand.u32 4294901760, %v607_v15 }
  0x2e   :  { %530 = vmatpush.msrb.mxu2 %v1506_v8  ;;  %434 = vmatpush.msrb.mxu0 %v2071_v32  ;;  %v619_v62 = vsub.f32 %v1636_v39, %v618_v23  ;;  %v1693_v32 = vsub.f32 %v156_v29, %v1669_v28  ;;  %v2074_v15 = vand.u32 4294901760, %v1338_v27  ;;  %v2075_v18 = vand.u32 4294901760, %v1374_v40 }
  0x2f   :  { %487 = vmatpush.msrb.mxu1 %v1278_v4  ;;  %v45_v4 = vadd.f32 %v44_v58, %v43_v16  ;;  %v1182_v14 = vpop.eup %1181  ;;  %597 = vmatpush.msrb.mxu3 %v596_v54  ;;  %v630_v25 = vand.u32 4294901760, %v1667_v3  ;;  %v636_v16 = vand.u32 4294901760, %v1675_v43  ;;  %v614_v22 = vand.u32 4294901760, %v613_v63 }
  0x30   :  { %532 = vmatpush.msrb.mxu2 %v1522_v51  ;;  %438 = vmatpush.msrb.mxu0 %v2072_v7  ;;  %v56_v54 = vmul.f32 2.0, %v1182_v14  ;;  %v1704_v58 = vsub.f32 %v155_v33, %v1682_v38  ;;  %v53_v7 = vrot.slane %v52_v48, 1  ;;  %v2076_v40 = vand.u32 4294901760, %v1379_v42 }
  0x31   :  { %489 = vmatpush.msrb.mxu1 %v1280_v5  ;;  %v2073_v5 = vand.u32 4294901760, %v1644_v1  ;;  %603 = vmatpush.msrb.mxu3 %v602_v30  ;;  %v46_v29 = vrot.slane %v45_v4, 1  ;;  %v631_v27 = vsub.f32 %v1667_v3, %v630_v25  ;;  %v642_v30 = vand.u32 4294901760, %v1693_v32 }
  0x32   :  { %534 = vmatpush.msrb.mxu2 %v1555_v26  ;;  %442 = vmatpush.msrb.mxu0 %v2074_v15  ;;  %vm60_vm1 = vweird.f32 %v1182_v14 }
  0x33   :  { %491 = vmatpush.msrb.mxu1 %v1291_v9  ;;  %v625_v20 = vsub.f32 %v1644_v1, %v2073_v5  ;;  %v57_v9 = vsub.f32 1.0, %v56_v54  ;;  %609 = vmatpush.msrb.mxu3 %v608_v19  ;;  %v620_v5 = vand.u32 4294901760, %v619_v62  ;;  %v648_v19 = vand.u32 4294901760, %v1704_v58 }
  0x34   :  { %536 = vmatpush.msrb.mxu2 %v1563_v55  ;;  %446 = vmatpush.msrb.mxu0 %v2075_v18  ;;  %v47_v62 = vadd.f32 %v46_v29, %v45_v4  ;;  %v54_v54 = vadd.f32 %v53_v7, %v52_v48  ;;  %v632_v15 = vand.u32 4294901760, %v631_v27  ;;  %v643_v42 = vsub.f32 %v1693_v32, %v642_v30  ;;  %v2086_v27 = vld [vmem:[#allocation8_spill] sm:$0xff] }
  0x35   :  { %493 = vmatpush.msrb.mxu1 %v1293_v10  ;;  %v626_v33 = vand.u32 4294901760, %v625_v20  ;;  %v637_v10 = vsub.f32 %v1675_v43, %v636_v16  ;;  %v58_v63 = vmul.f32 %v1182_v14, %v57_v9  ;;  %615 = vmatpush.msrb.mxu3 %v614_v22  ;;  %v2077_v20 = vand.u32 4294901760, %v1403_v52 }
  0x36   :  { %538 = vmatpush.msrb.mxu2 %v1592_v60  ;;  %450 = vmatpush.msrb.mxu0 %v2076_v40  ;;  %v649_v52 = vsub.f32 %v1704_v58, %v648_v19  ;;  %v2080_v7 = vand.u32 4294901760, %v1452_v12 }
  0x37   :  { %495 = vmatpush.msrb.mxu1 %v1295_v11  ;;  %v59_v11 = vadd.f32 %v1182_v14, %v58_v63  ;;  %621 = vmatpush.msrb.mxu3 %v620_v5  ;;  %v638_v4 = vand.u32 4294901760, %v637_v10 }
  0x38   :  { %540 = vmatpush.msrb.mxu2 %v1609_v61  ;;  %454 = vmatpush.msrb.mxu0 %v2077_v20  ;;  %v650_v9 = vand.u32 4294901760, %v649_v52 }
  0x39   :  { %497 = vmatpush.msrb.mxu1 %v1314_v17  ;;  %v1731_v48 = vsel %vm60_vm1, %v1182_v14, %v59_v11  ;;  %v2078_v17 = vand.u32 4294901760, %v1420_v59  ;;  %627 = vmatpush.msrb.mxu3 %v626_v33  ;;  %v644_v59 = vand.u32 4294901760, %v643_v42 }
  0x3a   :  { %542 = vmatpush.msrb.mxu2 %v1614_v44  ;;  %v62_v22 = vmul.f32 %v1731_v48, %v47_v62  ;;  %v63_v29 = vmul.f32 %v1731_v48, %v54_v54 }
  0x3b   :  { %499 = vmatpush.msrb.mxu1 %v1330_v24  ;;  %458 = vmatpush.msrb.mxu0 %v2078_v17  ;;  %v2079_v24 = vand.u32 4294901760, %v1441_v6 }
  0x3c   :  { %544 = vmatpush.msrb.mxu2 %v1638_v35  ;;  %633 = vmatpush.msrb.mxu3 %v632_v15  ;;  %v66_v14 = vrot.slane %v63_v29, 6 }
  0x3d   :  { %501 = vmatpush.msrb.mxu1 %v1365_v36  ;;  %462 = vmatpush.msrb.mxu0 %v2079_v24  ;;  %v154_v36 = vld [vmem:[%s2009_s3 + $0x80] sm:$0xff] }
  0x3e   :  { %546 = vmatpush.msrb.mxu2 %v1646_v50  ;;  %639 = vmatpush.msrb.mxu3 %v638_v4  ;;  %v67_v18 = vsel %vm40_vm0, %v62_v22, %v66_v14  ;;  %v1761_v12 = vand.u32 4294901760, %v154_v36 }
  0x3f   :  { %503 = vmatpush.msrb.mxu1 %v1388_v46  ;;  %466 = vmatpush.msrb.mxu0 %v2080_v7  ;;  %v1755_v6 = vsub.f32 %v1361_v34, %v67_v18  ;;  %v2081_v46 = vand.u32 4294901760, %v1471_v37  ;;  %v2083_v34 = vand.u32 4294901760, %v1512_v2  ;;  %v2085_v37 = vld [vmem:[#allocation7_spill] sm:$0xff] }
  0x40   :  { %548 = vmatpush.msrb.mxu2 %v1669_v28  ;;  %645 = vmatpush.msrb.mxu3 %v644_v59  ;;  %v1779_v18 = vsub.f32 %v154_v36, %v1761_v12  ;;  %v129_v36 = vld [vmem:[%s2008_s2] sm:$0x3] }
  0x41   :  { %505 = vmatpush.msrb.mxu1 %v1390_v47  ;;  %470 = vmatpush.msrb.mxu0 %v2081_v46  ;;  %v70_v5 = vmul.f32 %v1755_v6, %v1755_v6  ;;  %v2082_v47 = vand.u32 4294901760, %v1501_v0 }
  0x42   :  { %550 = vmatpush.msrb.mxu2 %v1682_v38  ;;  %651 = vmatpush.msrb.mxu3 %v650_v9 }
  0x43   :  { %507 = vmatpush.msrb.mxu1 %v1405_v53  ;;  %474 = vmatpush.msrb.mxu0 %v2082_v47  ;;  %72 = vst [vmem:[#allocation1] ss:$4 sm:$0xff] %v70_v5  ;;  %v2084_v53 = vld [vmem:[#allocation5_spill] sm:$0xff]  ;;  %v654_v47 = vand.u32 4294901760, %v1779_v18 }
  0x44   :  { %552 = vmatpush.msrb.mxu2 %v1761_v12 }
  0x45   :  { %509 = vmatpush.msrb.mxu1 %v1413_v56  ;;  %478 = vmatpush.msrb.mxu0 %v2083_v34 }
  0x47   :  { %511 = vmatpush.msrb.mxu1 %v2084_v53  ;;  %v121_v53 = vld [vmem:[%s2007_s1] sm:$0x3] }
  0x49   :  { %513 = vmatpush.msrb.mxu1 %v2085_v37 }
  0x4a   :  { %v73_v33 = vld.sshfl [vmem:[#allocation1] sm:$0xff pattern:$0x73625140]  ;;  %v74_v10 = vld.sshfl [vmem:[#allocation1 + $0x8] sm:$0xff pattern:$0x73625140] }
  0x4b   :  { %515 = vmatpush.msrb.mxu1 %v2086_v27  ;;  %v77_v0 = vsel %vm40_vm0, %v73_v33, 0.0  ;;  %v84_v63 = vsel %vm40_vm0, %v74_v10, 0.0  ;;  %v655_v27 = vsub.f32 %v1779_v18, %v654_v47 }
  0x4c   :  { %v78_v40 = vrot.slane %v77_v0, 4  ;;  %v85_v56 = vrot.slane %v84_v63, 4 }
  0x4e   :  { %v79_v62 = vadd.f32 %v78_v40, %v77_v0  ;;  %v86_v54 = vadd.f32 %v85_v56, %v84_v63  ;;  %v124_v0 = vperm.slane %v121_v53, 1  ;;  %v656_v63 = vand.u32 4294901760, %v655_v27  ;;  %v2087_v27 = vld [vmem:[#allocation6_spill] sm:$0xff] }
  0x50   :  { %v80_v11 = vrot.slane %v79_v62, 2  ;;  %v87_v20 = vrot.slane %v86_v54, 2  ;;  %657 = vmatpush.msrb.mxu3 %v656_v63 }
  0x52   :  { %v81_v2 = vadd.f32 %v80_v11, %v79_v62  ;;  %v88_v15 = vadd.f32 %v87_v20, %v86_v54  ;;  %v132_v62 = vperm.slane %v129_v36, 1  ;;  %v123_v11 = vperm.slane %v121_v53, 0 }
  0x53   :  { %v125_v20 = vrot.slane %v124_v0, 6 }
  0x54   :  { %v82_v42 = vrot.slane %v81_v2, 1  ;;  %v89_v17 = vrot.slane %v88_v15, 1 }
  0x56   :  { %v83_v4 = vadd.f32 %v82_v42, %v81_v2  ;;  %v90_v52 = vadd.f32 %v89_v17, %v88_v15  ;;  %v131_v17 = vperm.slane %v129_v36, 0  ;;  %v2088_v36 = vld [vmem:[#allocation9_spill] sm:$0xff] }
  0x58   :  { %v91_v22 = vmul.f32 %v83_v4, %v1731_v48  ;;  %v92_v29 = vmul.f32 %v90_v52, %v1731_v48  ;;  %v133_v4 = vrot.slane %v132_v62, 6 }
  0x5a   :  { %v93_v24 = vadd.f32 1e-05, %v91_v22  ;;  %v94_v59 = vadd.f32 1e-05, %v92_v29  ;;  %v126_v22 = vsel %vm40_vm0, %v123_v11, %v125_v20  ;;  %v2092_v11 = vld [vmem:[#allocation11_spill] sm:$0xff] }
  0x5b   :  { %v2093_v20 = vand.u32 4294901760, %v2092_v11 }
  0x5c   :  { %1183 = vrsqrt.f32 %v93_v24  ;;  %vm101_vm2 = vweird.f32 %v93_v24  ;;  %vm111_vm4 = vweird.f32 %v94_v59 }
  0x5d   :  { %1185 = vrsqrt.f32 %v94_v59 }
  0x62   :  { %v1184_v14 = vpop.eup %1183 }
  0x63   :  { %v1186_v7 = vpop.eup %1185  ;;  %v96_v9 = vmul.f32 %v1184_v14, %v93_v24  ;;  %vm102_vm3 = vweird.f32 %v1184_v14  ;;  %v134_v24 = vsel %vm40_vm0, %v131_v17, %v133_v4 }
  0x64   :  { %v106_v46 = vmul.f32 %v1186_v7, %v94_v59  ;;  %vm112_vm5 = vweird.f32 %v1186_v7  ;;  %vm103_vm6 = vmor %vm101_vm2, %vm102_vm3 }
  0x65   :  { %v97_v5 = vmul.f32 %v1184_v14, %v96_v9  ;;  %vm113_vm7 = vmor %vm111_vm4, %vm112_vm5 }
  0x66   :  { %v107_v34 = vmul.f32 %v1186_v7, %v106_v46 }
  0x67   :  { %v98_v37 = vmul.f32 0.5, %v97_v5 }
  0x68   :  { %v108_v33 = vmul.f32 0.5, %v107_v34 }
  0x69   :  { %v99_v10 = vsub.f32 1.5, %v98_v37 }
  0x6a   :  { %v109_v40 = vsub.f32 1.5, %v108_v33 }
  0x6b   :  { %v100_v56 = vmul.f32 %v1184_v14, %v99_v10  ;;  %v2089_v10 = vand.u32 4294901760, %v2088_v36 }
  0x6c   :  { %v110_v54 = vmul.f32 %v1186_v7, %v109_v40  ;;  %v2090_v40 = vld [vmem:[#allocation10_spill] sm:$0xff] }
  0x6d   :  { %v104_v2 = vsel %vm103_vm6, %v1184_v14, %v100_v56  ;;  %v2091_v56 = vand.u32 4294901760, %v2090_v40 }
  0x6e   :  { %v114_v15 = vsel %vm113_vm7, %v1186_v7, %v110_v54 }
  0x6f   :  { %v117_v42 = vrot.slane %v114_v15, 6 }
  0x71   :  { %v118_v52 = vsel %vm40_vm0, %v104_v2, %v117_v42  ;;  %v2094_v2 = vld [vmem:[#allocation12_spill] sm:$0xff]  ;;  %v2096_v42 = vld [vmem:[#allocation13_spill] sm:$0xff] }
  0x72   :  { %v120_v29 = vmul.f32 %v118_v52, %v1755_v6  ;;  %v2095_v15 = vand.u32 4294901760, %v2094_v2  ;;  %v2097_v17 = vand.u32 4294901760, %v2096_v42 }
  0x74   :  { %v128_v59 = vmul.f32 %v126_v22, %v120_v29  ;;  %v910_v22 = vld [vmem:[%s2013_s7 + $0x30] sm:$0xff] }
  0x76   :  { %v136_v9 = vadd.f32 %v134_v24, %v128_v59  ;;  %v1905_v59 = vand.u32 4294901760, %v910_v22 }
  0x78   :  { %v137_v46 = vmax.f32 %v136_v9, 0.0  ;;  %v909_v9 = vld [vmem:[%s2013_s7 + $0x28] sm:$0xff] }
  0x7a   :  { %175 = vst [vmem:[#allocation1] ss:$4 sm:$0xff] %v137_v46 }
  0x81   :  { %v176_v5 = vld.sshfl [vmem:[#allocation1] sm:$0xff pattern:$0x73625140]  ;;  %v177_v34 = vld.sshfl [vmem:[#allocation1 + $0x8] sm:$0xff pattern:$0x73625140] }
  0x82   :  { %v212_v53 = vand.u32 4294901760, %v176_v5  ;;  %v1795_v14 = vand.u32 4294901760, %v177_v34 }
  0x84   :  { %v213_v7 = vsub.f32 %v176_v5, %v212_v53  ;;  %318 = vmatmul.f32.vlgmr.msra.gmra.mxu1 %v212_v53  ;;  %v1798_v37 = vsub.f32 %v177_v34, %v1795_v14  ;;  %v1914_v34 = vsub.f32 %v910_v22, %v1905_v59 }
  0x85   :  { %718 = vmatpush.msra.mxu1 %v2087_v27 }
  0x86   :  { %372 = vmatmul.f32.vlgmr.msra.gmra.mxu2 %v213_v7  ;;  %v214_v6 = vand.u32 4294901760, %v213_v7  ;;  %v555_v33 = vand.u32 4294901760, %v1798_v37 }
  0x87   :  { %759 = vmatpush.msra.mxu2 %v2089_v10  ;;  %720 = vmatpush.msra.mxu1 %v1463_v31 }
  0x88   :  { %v215_v0 = vsub.f32 %v213_v7, %v214_v6  ;;  %411 = vmatmul.f32.vlgmr.msra.gmra.mxu3 %v214_v6  ;;  %v556_v63 = vsub.f32 %v1798_v37, %v555_v33 }
  0x89   :  { %763 = vmatpush.msra.mxu2 %v2091_v56  ;;  %826 = vmatpush.msra.mxu3 %v2087_v27  ;;  %v969_v27 = vand.u32 4294901760, %v1914_v34 }
  0x8a   :  { %v216_v62 = vand.u32 4294901760, %v215_v0  ;;  %v557_v54 = vand.u32 4294901760, %v556_v63  ;;  %722 = vmatpush.msra.mxu1 %v1486_v49 }
  0x8b   :  { %767 = vmatpush.msra.mxu2 %v2093_v20  ;;  %828 = vmatpush.msra.mxu3 %v1463_v31  ;;  %v2098_v31 = vld [vmem:[#allocation14_spill] sm:$0xff]  ;;  %v970_v63 = vsub.f32 %v1914_v34, %v969_v27 }
  0x8c   :  { %217 = vmatmul.f32.vlgmr.msra.gmra.mxu0 %v216_v62  ;;  %724 = vmatpush.msra.mxu1 %v1491_v57  ;;  %v2099_v4 = vand.u32 4294901760, %v2098_v31 }
  0x8d   :  { %665 = vmatpush.msra.mxu0 %v2088_v36  ;;  %771 = vmatpush.msra.mxu2 %v2095_v15  ;;  %v907_v36 = vld [vmem:[%s2013_s7 + $0x18] sm:$0xff]  ;;  %v971_v20 = vand.u32 4294901760, %v970_v63  ;;  %v1180_v63 = vld [vmem:[%s2014_s8] ss:$0 sm:$0xff] }
  0x8e   :  { %830 = vmatpush.msra.mxu3 %v1486_v49  ;;  %558 = vmatmul.f32.vlgmr.msrb.gmra.mxu2 %v557_v54  ;;  %v2100_v49 = vand.u32 4294901760, %v1590_v21  ;;  %v1947_v62 = vand.u32 4294901760, %v907_v36  ;;  %v906_v54 = vld [vmem:[%s2013_s7 + $0x10] sm:$0xff] }
  0x8f   :  { %668 = vmatpush.msra.mxu0 %v2090_v40  ;;  %775 = vmatpush.msra.mxu2 %v2097_v17  ;;  %v1957_v15 = vand.u32 4294901760, %v906_v54 }
  0x90   :  { %832 = vmatpush.msra.mxu3 %v1491_v57  ;;  %517 = vmatmul.f32.vlgmr.msrb.gmra.mxu1 %v212_v53  ;;  %v2101_v57 = vand.u32 4294901760, %v1603_v41  ;;  %v986_v17 = vsub.f32 %v907_v36, %v1947_v62 }
  0x91   :  { %671 = vmatpush.msra.mxu0 %v2092_v11  ;;  %659 = vmatmul.f32.vlgmr.msrb.gmra.mxu3 %v1795_v14 }
  0x92   :  { %779 = vmatpush.msra.mxu2 %v2099_v4  ;;  %834 = vmatpush.msra.mxu3 %v1506_v8 }
  0x93   :  { %674 = vmatpush.msra.mxu0 %v2094_v2  ;;  %726 = vmatpush.msra.mxu1 %v1506_v8 }
  0x94   :  { %480 = vmatmul.f32.vlgmr.msrb.gmra.mxu0 %v212_v53  ;;  %783 = vmatpush.msra.mxu2 %v2100_v49  ;;  %v1916_v53 = vand.u32 4294901760, %v909_v9 }
  0x95   :  { %677 = vmatpush.msra.mxu0 %v2096_v42  ;;  %836 = vmatpush.msra.mxu3 %v1522_v51 }
  0x96   :  { %728 = vmatpush.msra.mxu1 %v1522_v51  ;;  %787 = vmatpush.msra.mxu2 %v2101_v57  ;;  %v1929_v6 = vsub.f32 %v909_v9, %v1916_v53  ;;  %v992_v57 = vsub.f32 %v906_v54, %v1957_v15 }
  0x97   :  { %680 = vmatpush.msra.mxu0 %v2098_v31  ;;  %838 = vmatpush.msra.mxu3 %v1555_v26  ;;  %v905_v31 = vld [vmem:[%s2013_s7 + $0x8] sm:$0xff] }
  0x98   :  { %730 = vmatpush.msra.mxu1 %v1555_v26  ;;  %791 = vmatpush.msra.mxu2 %v612_v45  ;;  %v2102_v26 = vand.u32 4294901760, %v1644_v1  ;;  %v975_v40 = vand.u32 4294901760, %v1929_v6 }
  0x99   :  { %683 = vmatpush.msra.mxu0 %v1590_v21  ;;  %840 = vmatpush.msra.mxu3 %v1563_v55  ;;  %v1177_v21 = vld [vmem:[%s2010_s4] ss:$0 sm:$0xff] }
  0x9a   :  { %732 = vmatpush.msra.mxu1 %v1563_v55  ;;  %795 = vmatpush.msra.mxu2 %v618_v23  ;;  %v976_v2 = vsub.f32 %v1929_v6, %v975_v40 }
  0x9b   :  { %686 = vmatpush.msra.mxu0 %v1603_v41  ;;  %842 = vmatpush.msra.mxu3 %v1592_v60 }
  0x9c   :  { %734 = vmatpush.msra.mxu1 %v1592_v60  ;;  %799 = vmatpush.msra.mxu2 %v2102_v26  ;;  %v977_v49 = vand.u32 4294901760, %v976_v2  ;;  %v940_v26 = vand.u32 4294901760, %v905_v31 }
  0x9d   :  { %689 = vmatpush.msra.mxu0 %v1624_v13  ;;  %844 = vmatpush.msra.mxu3 %v1609_v61 }
  0x9e   :  { %736 = vmatpush.msra.mxu1 %v1609_v61  ;;  %803 = vmatpush.msra.mxu2 %v630_v25 }
  0x9f   :  { %692 = vmatpush.msra.mxu0 %v1636_v39  ;;  %846 = vmatpush.msra.mxu3 %v1614_v44 }
  0xa0   :  { %738 = vmatpush.msra.mxu1 %v1614_v44  ;;  %807 = vmatpush.msra.mxu2 %v636_v16 }
  0xa1   :  { %695 = vmatpush.msra.mxu0 %v1644_v1  ;;  %848 = vmatpush.msra.mxu3 %v1638_v35 }
  0xa2   :  { %740 = vmatpush.msra.mxu1 %v1638_v35  ;;  %811 = vmatpush.msra.mxu2 %v642_v30 }
  0xa3   :  { %698 = vmatpush.msra.mxu0 %v1667_v3  ;;  %850 = vmatpush.msra.mxu3 %v1646_v50 }
  0xa4   :  { %742 = vmatpush.msra.mxu1 %v1646_v50  ;;  %815 = vmatpush.msra.mxu2 %v648_v19 }
  0xa5   :  { %701 = vmatpush.msra.mxu0 %v1675_v43  ;;  %852 = vmatpush.msra.mxu3 %v1669_v28 }
  0xa6   :  { %744 = vmatpush.msra.mxu1 %v1669_v28  ;;  %819 = vmatpush.msra.mxu2 %v654_v47 }
  0xa7   :  { %704 = vmatpush.msra.mxu0 %v1693_v32  ;;  %854 = vmatpush.msra.mxu3 %v1682_v38 }
  0xa8   :  { %821 = vmatmul.f32.vlgmr.msra.gmra.mxu2 %v1795_v14  ;;  %746 = vmatpush.msra.mxu1 %v1682_v38 }
  0xa9   :  { %707 = vmatpush.msra.mxu0 %v1704_v58  ;;  %856 = vmatpush.msra.mxu3 %v1761_v12 }
  0xaa   :  { %858 = vmatmul.f32.vlgmr.msra.gmra.mxu3 %v1795_v14  ;;  %748 = vmatpush.msra.mxu1 %v1761_v12  ;;  %v908_v14 = vld [vmem:[%s2013_s7 + $0x20] sm:$0xff] }
  0xab   :  { %710 = vmatpush.msra.mxu0 %v1779_v18  ;;  %752 = vmatmul.f32.vlgmr.msra.gmra.mxu1 %v555_v33  ;;  %v911_v18 = vld [vmem:[%s2013_s7 + $0x38] sm:$0xff]  ;;  %v1933_v33 = vand.u32 4294901760, %v908_v14 }
  0xac   :  { %713 = vmatmul.f32.vlgmr.msra.gmra.mxu0 %v1798_v37  ;;  %v1897_v52 = vand.u32 4294901760, %v911_v18 }
  0xad   :  { %v1945_v56 = vsub.f32 %v908_v14, %v1933_v33 }
  0xae   :  { %v1903_v24 = vsub.f32 %v911_v18, %v1897_v52  ;;  %929 = vmatpush.msrb.mxu0 %v1897_v52  ;;  %1061 = vmatpush.msrb.mxu3 %v1897_v52 }
  0xaf   :  { %v981_v42 = vand.u32 4294901760, %v1945_v56 }
  0xb0   :  { %v963_v5 = vand.u32 4294901760, %v1903_v24  ;;  %1024 = vmatpush.msrb.mxu2 %v1903_v24  ;;  %931 = vmatpush.msrb.mxu0 %v1905_v59 }
  0xb1   :  { %1063 = vmatpush.msrb.mxu3 %v1905_v59 }
  0xb2   :  { %v964_v37 = vsub.f32 %v1903_v24, %v963_v5  ;;  %1027 = vmatpush.msrb.mxu2 %v1914_v34  ;;  %933 = vmatpush.msrb.mxu0 %v1916_v53 }
  0xb3   :  { %1065 = vmatpush.msrb.mxu3 %v1916_v53 }
  0xb4   :  { %v965_v0 = vand.u32 4294901760, %v964_v37  ;;  %1030 = vmatpush.msrb.mxu2 %v1929_v6  ;;  %935 = vmatpush.msrb.mxu0 %v1933_v33 }
  0xb5   :  { %1067 = vmatpush.msrb.mxu3 %v1933_v33 }
  0xb6   :  { %966 = vmatpush.msrb.mxu1 %v965_v0  ;;  %1033 = vmatpush.msrb.mxu2 %v1945_v56 }
  0xb7   :  { %937 = vmatpush.msrb.mxu0 %v1947_v62  ;;  %1069 = vmatpush.msrb.mxu3 %v1947_v62 }
  0xb8   :  { %972 = vmatpush.msrb.mxu1 %v971_v20  ;;  %1036 = vmatpush.msrb.mxu2 %v986_v17 }
  0xb9   :  { %939 = vmatpush.msrb.mxu0 %v1957_v15  ;;  %1071 = vmatpush.msrb.mxu3 %v1957_v15 }
  0xba   :  { %978 = vmatpush.msrb.mxu1 %v977_v49  ;;  %1039 = vmatpush.msrb.mxu2 %v992_v57 }
  0xbb   :  { %941 = vmatpush.msrb.mxu0 %v940_v26  ;;  %1073 = vmatpush.msrb.mxu3 %v940_v26 }
 0x101   :  { %v319_v55 = vpop.f32.mrf.mxu1 }
 0x109   :  { %v218_v35 = vpop.f32.mrf.mxu0  ;;  %v373_v13 = vpop.f32.mrf.mxu2 }
 0x10a   :  { %v219_v51 = vadd.f32 %v1177_v21, %v218_v35  ;;  %v982_v21 = vsub.f32 %v1945_v56, %v981_v42  ;;  %v987_v35 = vand.u32 4294901760, %v986_v17 }
 0x10b   :  { %v412_v44 = vpop.f32.mrf.mxu3 }
 0x10c   :  { %v320_v61 = vadd.f32 %v319_v55, %v219_v51  ;;  %v904_v51 = vld [vmem:[%s2013_s7] sm:$0xff] }
 0x10d   :  { %v518_v1 = vpop.f32.mrf.mxu1 }
 0x10e   :  { %v374_v8 = vadd.f32 %v373_v13, %v320_v61  ;;  %v993_v61 = vand.u32 4294901760, %v992_v57  ;;  %v998_v13 = vsub.f32 %v905_v31, %v940_v26 }
 0x110   :  { %v413_v60 = vadd.f32 %v412_v44, %v374_v8  ;;  %v942_v8 = vand.u32 4294901760, %v904_v51  ;;  %v983_v44 = vand.u32 4294901760, %v982_v21  ;;  %1042 = vmatpush.msrb.mxu2 %v998_v13 }
 0x111   :  { %v481_v41 = vpop.f32.mrf.mxu0  ;;  %v559_v45 = vpop.f32.mrf.mxu2 }
 0x112   :  { %v482_v39 = vadd.f32 %v481_v41, %v413_v60  ;;  %v988_v60 = vsub.f32 %v986_v17, %v987_v35  ;;  %984 = vmatpush.msrb.mxu1 %v983_v44  ;;  %943 = vmatpush.msrb.mxu0 %v942_v8 }
 0x113   :  { %1075 = vmatpush.msrb.mxu3 %v942_v8 }
 0x114   :  { %v519_v50 = vadd.f32 %v518_v1, %v482_v39  ;;  %v660_v3 = vpop.f32.mrf.mxu3  ;;  %v994_v39 = vsub.f32 %v992_v57, %v993_v61  ;;  %v999_v1 = vand.u32 4294901760, %v998_v13  ;;  %1094 = vmatpush.msra.mxu0 %v963_v5 }
 0x116   :  { %v560_v23 = vadd.f32 %v559_v45, %v519_v50  ;;  %v1004_v50 = vsub.f32 %v904_v51, %v942_v8  ;;  %v989_v45 = vand.u32 4294901760, %v988_v60  ;;  %1098 = vmatpush.msra.mxu0 %v969_v27 }
 0x118   :  { %v661_v28 = vadd.f32 %v660_v3, %v560_v23  ;;  %v995_v3 = vand.u32 4294901760, %v994_v39  ;;  %990 = vmatpush.msrb.mxu1 %v989_v45  ;;  %1045 = vmatpush.msrb.mxu2 %v1004_v50 }
 0x119   :  { %1102 = vmatpush.msra.mxu0 %v975_v40 }
 0x11a   :  { %996 = vmatpush.msrb.mxu1 %v995_v3 }
 0x11b   :  { %1106 = vmatpush.msra.mxu0 %v981_v42 }
 0x11d   :  { %1110 = vmatpush.msra.mxu0 %v987_v35 }
 0x11f   :  { %1114 = vmatpush.msra.mxu0 %v993_v61 }
 0x121   :  { %1118 = vmatpush.msra.mxu0 %v999_v1 }
 0x128   :  { %v753_v38 = vpop.f32.mrf.mxu1 }
 0x129   :  { %v714_v43 = vpop.f32.mrf.mxu0 }
 0x12a   :  { %v715_v25 = vadd.f32 %v714_v43, %v661_v28  ;;  %v1000_v28 = vsub.f32 %v998_v13, %v999_v1  ;;  %v1005_v43 = vand.u32 4294901760, %v1004_v50 }
 0x12b   :  { %v822_v32 = vpop.f32.mrf.mxu2 }
 0x12c   :  { %v754_v16 = vadd.f32 %v753_v38, %v715_v25  ;;  %v1001_v25 = vand.u32 4294901760, %v1000_v28  ;;  %1122 = vmatpush.msra.mxu0 %v1005_v43 }
 0x12d   :  { %v859_v58 = vpop.f32.mrf.mxu3 }
 0x12e   :  { %v823_v30 = vadd.f32 %v822_v32, %v754_v16  ;;  %v1006_v32 = vsub.f32 %v1004_v50, %v1005_v43  ;;  %1002 = vmatpush.msrb.mxu1 %v1001_v25 }
 0x130   :  { %v860_v19 = vadd.f32 %v859_v58, %v823_v30  ;;  %v1007_v58 = vand.u32 4294901760, %v1006_v32 }
 0x132   :  { %v863_v12 = vsel %vm862_vm8, %v860_v19, 0.0  ;;  %1008 = vmatpush.msrb.mxu1 %v1007_v58 }
 0x133   :  { %v864_v47 = vrot.slane %v863_v12, 4 }
 0x134   :  { %1137 = vmatpush.msra.mxu1 %v1897_v52 }
 0x135   :  { %v865_v29 = vadd.f32 %v864_v47, %v863_v12 }
 0x136   :  { %1139 = vmatpush.msra.mxu1 %v1905_v59 }
 0x137   :  { %v866_v46 = vrot.slane %v865_v29, 2 }
 0x138   :  { %1141 = vmatpush.msra.mxu1 %v1916_v53  ;;  %v1179_v53 = vld [vmem:[%s2012_s6] ss:$0 sm:$0xff]  ;;  %s1216_s6 = smov [#allocation2]  }
 0x139   :  { %v867_v7 = vadd.f32 %v866_v46, %v865_v29  ;;  %s1164_s3 = sshll.u32 %s1216_s6, 4  ;;  %s1165_s3 = int_to_ptr.vmem [resolvable:$true] %s1164_s3 }
 0x13a   :  { %1143 = vmatpush.msra.mxu1 %v1933_v33 }
 0x13b   :  { %v868_v10 = vrot.slane %v867_v7, 1 }
 0x13c   :  { %1145 = vmatpush.msra.mxu1 %v1947_v62 }
 0x13d   :  { %v869_v11 = vadd.f32 %v868_v10, %v867_v7 }
 0x13e   :  { %1147 = vmatpush.msra.mxu1 %v1957_v15 }
 0x13f   :  { %v870_v4 = vmul.f32 %v869_v11, %v1731_v48 }
 0x140   :  { %1149 = vmatpush.msra.mxu1 %v940_v26 }
 0x141   :  { %v1974_v55 = vsub.f32 %v860_v19, %v870_v4 }
 0x142   :  { %1151 = vmatpush.msra.mxu1 %v942_v8 }
 0x143   :  { %v872_v41 = vmul.f32 %v1974_v55, %v1974_v55 }
 0x145   :  { %v873_v23 = vsel %vm862_vm8, %v872_v41, 0.0 }
 0x146   :  { %v874_v38 = vrot.slane %v873_v23, 4 }
 0x148   :  { %v875_v16 = vadd.f32 %v874_v38, %v873_v23 }
 0x14a   :  { %v876_v30 = vrot.slane %v875_v16, 2 }
 0x14c   :  { %v877_v19 = vadd.f32 %v876_v30, %v875_v16 }
 0x14e   :  { %v878_v12 = vrot.slane %v877_v19, 1 }
 0x150   :  { %v879_v18 = vadd.f32 %v878_v12, %v877_v19 }
 0x152   :  { %v880_v47 = vmul.f32 %v879_v18, %v1731_v48  ;;  %v1178_v48 = vld [vmem:[%s2011_s5] ss:$0 sm:$0xff] }
 0x154   :  { %v881_v22 = vadd.f32 1e-05, %v880_v47 }
 0x156   :  { %1187 = vrsqrt.f32 %v881_v22  ;;  %vm888_vm10 = vweird.f32 %v881_v22 }
 0x15c   :  { %v1188_v52 = vpop.eup %1187 }
 0x15d   :  { %v883_v29 = vmul.f32 %v1188_v52, %v881_v22  ;;  %vm889_vm9 = vweird.f32 %v1188_v52 }
 0x15e   :  { %vm890_vm11 = vmor %vm888_vm10, %vm889_vm9 }
 0x15f   :  { %v884_v24 = vmul.f32 %v1188_v52, %v883_v29 }
 0x161   :  { %v885_v59 = vmul.f32 0.5, %v884_v24 }
 0x163   :  { %v886_v9 = vsub.f32 1.5, %v885_v59 }
 0x165   :  { %v887_v46 = vmul.f32 %v1188_v52, %v886_v9 }
 0x167   :  { %v891_v5 = vsel %vm890_vm11, %v1188_v52, %v887_v46 }
 0x168   :  { %v892_v34 = vmul.f32 %v891_v5, %v1974_v55 }
 0x16a   :  { %v897_v14 = vmul.f32 %v1178_v48, %v892_v34 }
 0x16c   :  { %v902_v7 = vadd.f32 %v1179_v53, %v897_v14 }
 0x16e   :  { %v903_v37 = vmax.f32 %v902_v7, 0.0 }
 0x170   :  { %v918_v27 = vsel %vm916_vm12, %v903_v37, 0 }
 0x171   :  { %v944_v6 = vand.u32 4294901760, %v918_v27 }
 0x173   :  { %1010 = vmatmul.f32.vlgmr.msrb.gmra.mxu1 %v944_v6  ;;  %v945_v33 = vsub.f32 %v918_v27, %v944_v6 }
 0x175   :  { %1048 = vmatmul.f32.vlgmr.msrb.gmra.mxu2 %v945_v33  ;;  %v946_v36 = vand.u32 4294901760, %v945_v33 }
 0x177   :  { %1079 = vmatmul.f32.vlgmr.msrb.gmra.mxu3 %v946_v36  ;;  %v947_v10 = vsub.f32 %v945_v33, %v946_v36 }
 0x179   :  { %v948_v0 = vand.u32 4294901760, %v947_v10 }
 0x17b   :  { %949 = vmatmul.f32.vlgmr.msrb.gmra.mxu0 %v948_v0  ;;  %1153 = vmatmul.f32.vlgmr.msra.gmra.mxu1 %v944_v6 }
 0x183   :  { %1124 = vmatmul.f32.vlgmr.msra.gmra.mxu0 %v944_v6 }
 0x1f0   :  { %v1011_v40 = vpop.f32.mrf.mxu1 }
 0x1f8   :  { %v950_v56 = vpop.f32.mrf.mxu0  ;;  %v1049_v11 = vpop.f32.mrf.mxu2 }
 0x1f9   :  { %v951_v62 = vadd.f32 %v1180_v63, %v950_v56  ;;  %v1154_v31 = vpop.f32.mrf.mxu1 }
 0x1fa   :  { %v1080_v2 = vpop.f32.mrf.mxu3 }
 0x1fb   :  { %v1012_v54 = vadd.f32 %v1011_v40, %v951_v62 }
 0x1fd   :  { %v1050_v20 = vadd.f32 %v1049_v11, %v1012_v54 }
 0x1ff   :  { %v1081_v15 = vadd.f32 %v1080_v2, %v1050_v20 }
 0x200   :  { %v1125_v42 = vpop.f32.mrf.mxu0 }
 0x201   :  { %v1126_v17 = vadd.f32 %v1125_v42, %v1081_v15 }
 0x203   :  { %v1155_v4 = vadd.f32 %v1154_v31, %v1126_v17 }
 0x205   :  { %1158 = vst.msk [vmem:[#allocation2] sm:$0x3] %vm1157_vm13, %v1155_v4 }
 0x206   :  { %1169 = dma.vmem_to_hbm [thread:$0]  %s1165_s3, 32, %s1167_s0, [#allocation3]  }
 0x207   :  { %1213 = dma.done.wait [#allocation3], 32  }
 0x208   :  { %1214 = vsyncadd [#allocation3], 4294967264 }
 0x209   :  { %1174 = vsyncpa [#allocation3], 1 }

// kernel: dnn_forward.2
= control target key start
LH: loop header
LB: loop body
LE: loop exit
PB: predicated region body
PF: predicated region fallthrough
CT: control target
= control target key end

     0   :  { %s17248_s0 = inlined_call_operand.vmem [shape: bf16[2,196608], index: 0, kind: input, shape index: {}]   ;;  %s17249_s1 = inlined_call_operand.hbm [shape: bf16[196608,256], index: 1, kind: input, shape index: {}]   ;;  %s17250_s2 = inlined_call_operand.hbm [shape: f32[1,256], index: 2, kind: input, shape index: {}]   ;;  %s17251_s3 = inlined_call_operand.vmem [shape: f32[2,256], index: 3, kind: output, shape index: {}]  }
   0x1   :  { %17253 = sst [smem:[#allocation10_spill]] %s17249_s1 }
   0x2   :  { %8 = vsyncpa [#allocation4], 0 }
   0x3   :  { %10 = vsyncpa [#allocation4 + $0x1], 0 }
   0x4   :  { %11 = vsyncpa [#allocation6], 0 }
   0x5   :  { %13 = vsyncpa [#allocation6 + $0x1], 0  ;;  %s15969_s12 = smov 0   ;;  %s15971_s13 = smov 0  }
   0x6   :  { %s15973_s14 = smov 0   ;;  %s15975_s15 = smov 0  }
   0x7   :  { %s15977_s16 = smov 0   ;;  %s15979_s17 = smov 0  }
   0x8   :  { %s15981_s18 = smov 0   ;;  %s15983_s19 = smov 0  }
   0x9   :  { %s15985_s20 = smov 0   ;;  %s15987_s21 = smov 0  }
   0xa   :  { %s15989_s22 = smov 0  }
   0xb LB: > { %s28_s23 = sadd.s32 1, %s15935_s20  ;;  %p73_p1 = scmp.ne.s32.totalorder %s15923_s17, %s15919_s16  ;;  %s15943_s22 = sphi %s15989_s22, %s19_s22   ;;  %s15939_s21 = sphi %s15987_s21, %s17271_s21   ;;  %s15935_s20 = sphi %s15985_s20, %s17270_s20   ;;  %s15931_s19 = sphi %s15983_s19, %s17269_s19   ;;  %s15927_s18 = sphi %s15981_s18, %s17268_s18   ;;  %s15923_s17 = sphi %s15979_s17, %s17267_s17   ;;  %s15919_s16 = sphi %s15977_s16, %s17266_s16   ;;  %s15915_s15 = sphi %s15975_s15, %s17265_s15   ;;  %s15911_s14 = sphi %s15973_s14, %s17264_s14   ;;  %s15907_s13 = sphi %s15971_s13, %s17263_s13   ;;  %s15903_s12 = sphi %s15969_s12, %s17262_s12  }
   0xc   : > { %p16025_p0 = scmp.ge.s32.totalorder %s28_s23, 12  ;;  %p74_p2 = scmp.eq.s32.totalorder %s15943_s22, 0 }
   0xd   : > { %s66_s25 = sadd.s32 1, %s15923_s17  ;;  %p15695_p4 = scmp.lt.s32.totalorder %s15943_s22, 24 }
   0xe   : > { %s17273_s23 = smov (%p16025_p0, %s28_s23), 0  ;;  %p75_p3 = por %p74_p2, %p73_p1 }
   0xf   : > { %s163_s26 = sand.u32 1, %s15923_s17   ;;  %s14659_s28 = sshll.u32 %s15935_s20, 12 }
  0x10   : > { %s10551_s27 = sshll.u32 %s163_s26, 13  ;;  %s172_s29 = sadd.s32 %s15939_s21, %s14659_s28 }
  0x11   : > { %s167_s30 = scalar_lea.vmem [#allocation3], %s10551_s27  ;;  %s10554_s5 = sshll.u32 %s172_s29, 2 }
  0x12   : > { %s177_s4 = sshll.u32 %s167_s30, 4  ;;  %s17255_s1 = sld [smem:[#allocation10_spill]]  ;;  %s178_s4 = int_to_ptr.vmem [resolvable:$true] %s177_s4 }
  0x13   : > { %p15689_p5 = pnand %p15695_p4, %p75_p3  ;;  %s164_s10 = scalar_lea.sflag [#allocation4], %s163_s26 }
  0x14   : > { %s15945_s11 = smov 128   ;;  %s15946_s27 = smov 64  }
  0x15   : > { %s15947_s28 = smov 4   ;;  %p10555_p6 = scmp.ge.s32.totalorder %s15943_s22, 1 }
  0x16   : > { %p202_p7 = scmp.lt.s32.totalorder %s15943_s22, 25  ;;  %s10547_s30 = sadd.s32 4294967295, %s15943_s22  }
  0x17   : > { %p79_p9 = scmp.ne.s32.totalorder %s15919_s16, %s15915_s15  ;;  %s61_s26 = ssub.s32 %s15935_s20, %s17273_s23 }
  0x18   : > { %s174_s8 = scalar_lea.hbm %s17255_s1, %s10554_s5  ;;  %p16050_p8 = pnand %p10555_p6, %p202_p7 }
  0x19   : > { %s175_s9 = sshll.u32 %s174_s8, 4  ;;  %s31_s5 = sadd.s32 1, %s15939_s21  ;;  %s176_s9 = int_to_ptr.hbm [resolvable:$true] %s175_s9 }
  0x1a   : > { %15691 = dma.hbm_to_vmem [thread:$0]  (!%p15689_p5), %s176_s9, 131072, %s178_s4, %s164_s10, %s15945_s11, %s15946_s27, %s15947_s28  }
  0x1b   : > { %s17275_s5 = smov (!%p16025_p0, %s31_s5), %s15939_s21  ;;  %p80_p10 = scmp.eq.s32.totalorder %s10547_s30, 0 }
  0x1c   : > { %p33_p11 = scmp.ge.s32.totalorder %s17275_s5, 2  ;;  %p99_p12 = scmp.ne.s32.totalorder %s15911_s14, %s15907_s13 }
  0x1d   : > { %p16065_p13 = por %p80_p10, %p79_p9  ;;  %p105_p1 = scmp.ne.s32.totalorder %s15907_s13, %s15903_s12 }
  0x1e   : > { %s17277_s5 = smov (%p33_p11, %s17275_s5), 0  ;;  %s92_s15 = sadd.s32 1, %s15911_s14 }
  0x1f   : > { %17258 = sst [smem:[#allocation9_spill]] %s17277_s5  ;;  %p16074_p3 = por %p105_p1, %p80_p10 }
  0x20   : > { %s62_s6 = ssub.s32 %s15939_s21, %s17277_s5  ;;  %p16082_p0 = por %p99_p12, %p74_p2 }
  0x21   : > { %s63_s8 = sor.u32 %s62_s6, %s61_s26  ;;  %p90_p5 = scmp.eq.s32.totalorder %s62_s6, 0 }
  0x22   : > { %p64_p6 = scmp.eq.s32.totalorder %s63_s8, 0  ;;  %s187_s12 = sand.u32 1, %s15911_s14  }
  0x23   : > { %s16088_s9 = scalar_select %p90_p5, %s15911_s14, %s92_s15  }
  0x24   : > { %s16093_s10 = scalar_select %p64_p6, %s15923_s17, %s66_s25  }
  0x25   : > { %s193_s28 = scalar_lea.hbm %s17250_s2, %s15939_s21  ;;  %s190_s1 = scalar_lea.vmem [#allocation5], %s187_s12 }
  0x26   : > { %s195_s30 = sshll.u32 %s193_s28, 4  ;;  %s197_s5 = sshll.u32 %s190_s1, 4  ;;  %s196_s30 = int_to_ptr.hbm [resolvable:$true] %s195_s30  ;;  %s198_s5 = int_to_ptr.vmem [resolvable:$true] %s197_s5 }
  0x27   : > { %p15692_p2 = pnand %p15695_p4, %p16082_p0  ;;  %s188_s26 = scalar_lea.sflag [#allocation6], %s187_s12 }
  0x28   : > { %206 = sbr.rel (%p16050_p8) target bundleno = 1236 (0x4d4), region = 32  ;;  %s208_s25 = sand.u32 (!%p16050_p8), 1, %s15919_s16  }
  0x29   : > { %15694 = dma.hbm_to_vmem [thread:$0]  (!%p15692_p2), %s196_s30, 16, %s198_s5, %s188_s26  }
  0x2a   : > { %s10556_s15 = sshll.u32 (!%p16050_p8), %s208_s25, 13  ;;  %s209_s6 = scalar_lea.sflag (!%p16050_p8), [#allocation4], %s208_s25 }
  0x2b   : > { %s16106_s8 = scalar_lea.vmem (!%p16050_p8), [#allocation3], %s10556_s15 }
  0x2d   : > { %15894 = dma.done.wait (%p16065_p13), %s209_s6, 131072  }
  0x2e   : > { %15896 = vsyncadd (%p16065_p13), %s209_s6, 4294836224  ;;  %s218_s1 = sand.u32 1, %s15907_s13  }
  0x2f   : > { %s219_s7 = scalar_lea.sflag [#allocation6], %s218_s1  ;;  %s16113_s5 = scalar_lea.vmem [#allocation5], %s218_s1 }
  0x30   : > { %15898 = dma.done.wait (%p16074_p3), %s219_s7, 16  }
  0x31   : > { %15900 = vsyncadd (%p16074_p3), %s219_s7, 4294967280  ;;  %s10557_s29 = sshll.u32 %s15927_s18, 7  ;;  %p258_p4 = scmp.lt.s32.totalorder %s15931_s19, 1 }
  0x32   : > { %p253_p7 = scmp.lt.s32.totalorder %s10557_s29, 1535  ;;  %p10559_p8 = scmp.ne.s32.totalorder %s15927_s18, 0 }
  0x33   : > { %s17279_s19 = smov (!%p258_p4, %s15931_s19), 1 }
  0x34   : > { %s17281_s29 = smov (!%p253_p7, %s10557_s29), 1535  ;;  %s10558_s4 = sshll.u32 %s17279_s19, 1 }
  0x35   : > { %s16125_s27 = scalar_lea.vmem %s17248_s0, %s17281_s29  ;;  %s16130_s26 = scalar_lea.vmem %s17251_s3, %s10558_s4 }
  0x36   : > { %265 = sbr.rel (%p10559_p8) target bundleno = 61 (0x3d), region = 44 }
  0x3b   : > { %v15948_v0 = vmov 0.0  }
  0x3c   : > { %266 = vst [vmem:[#allocation2] sm:$0x3] %v15948_v0 }
  0x3d PF: > { %v14667_v1 = vld [vmem:[%s16106_s8 + $0x38] sm:$0xff]  ;;  %v14666_v5 = vld [vmem:[%s16106_s8 + $0x30] sm:$0xff]  ;;  %v14665_v9 = vld [vmem:[%s16106_s8 + $0x28] sm:$0xff]  ;;  %p14656_p9 = scmp.ne.s32.totalorder %s15927_s18, 11 }
  0x3e   : > { %v14675_v2 = vld [vmem:[%s16106_s8 + $0x78] sm:$0xff]  ;;  %8764 = vmatpush.bf16.msra.mxu0 %v14667_v1  ;;  %v14674_v6 = vld [vmem:[%s16106_s8 + $0x70] sm:$0xff]  ;;  %v14673_v10 = vld [vmem:[%s16106_s8 + $0x68] sm:$0xff] }
  0x3f   : > { %v14683_v3 = vld [vmem:[%s16106_s8 + $0xb8] sm:$0xff]  ;;  %8777 = vmatpush.bf16.msra.mxu1 %v14675_v2  ;;  %v14682_v7 = vld [vmem:[%s16106_s8 + $0xb0] sm:$0xff]  ;;  %v14681_v11 = vld [vmem:[%s16106_s8 + $0xa8] sm:$0xff] }
  0x40   : > { %v14691_v4 = vld [vmem:[%s16106_s8 + $0xf8] sm:$0xff]  ;;  %8790 = vmatpush.bf16.msra.mxu2 %v14683_v3  ;;  %v14690_v8 = vld [vmem:[%s16106_s8 + $0xf0] sm:$0xff]  ;;  %v14689_v12 = vld [vmem:[%s16106_s8 + $0xe8] sm:$0xff] }
  0x41   : > { %8803 = vmatpush.bf16.msra.mxu3 %v14691_v4  ;;  %v14664_v13 = vld [vmem:[%s16106_s8 + $0x20] sm:$0xff]  ;;  %v14663_v17 = vld [vmem:[%s16106_s8 + $0x18] sm:$0xff]  ;;  %v14662_v22 = vld [vmem:[%s16106_s8 + $0x10] sm:$0xff] }
  0x42   : > { %8765 = vmatpush.bf16.msra.mxu0 %v14666_v5  ;;  %v14672_v14 = vld [vmem:[%s16106_s8 + $0x60] sm:$0xff]  ;;  %v14671_v18 = vld [vmem:[%s16106_s8 + $0x58] sm:$0xff]  ;;  %v14670_v23 = vld [vmem:[%s16106_s8 + $0x50] sm:$0xff] }
  0x43   : > { %8778 = vmatpush.bf16.msra.mxu1 %v14674_v6  ;;  %v14680_v15 = vld [vmem:[%s16106_s8 + $0xa0] sm:$0xff]  ;;  %v14679_v19 = vld [vmem:[%s16106_s8 + $0x98] sm:$0xff]  ;;  %v14678_v24 = vld [vmem:[%s16106_s8 + $0x90] sm:$0xff] }
  0x44   : > { %8791 = vmatpush.bf16.msra.mxu2 %v14682_v7  ;;  %v14688_v16 = vld [vmem:[%s16106_s8 + $0xe0] sm:$0xff]  ;;  %v14687_v20 = vld [vmem:[%s16106_s8 + $0xd8] sm:$0xff]  ;;  %v14686_v25 = vld [vmem:[%s16106_s8 + $0xd0] sm:$0xff] }
  0x45   : > { %8804 = vmatpush.bf16.msra.mxu3 %v14690_v8  ;;  %v268_v21 = vld [vmem:[%s16125_s27] sm:$0xff]  ;;  %v14661_v26 = vld [vmem:[%s16106_s8 + $0x8] sm:$0xff]  ;;  %v14660_v30 = vld [vmem:[%s16106_s8] sm:$0xff] }
  0x46   : > { %8766 = vmatpush.bf16.msra.mxu0 %v14665_v9  ;;  %2333 = vst [vmem:[#allocation1] ss:$9 sm:$0xff] %v268_v21  ;;  %v14669_v27 = vld [vmem:[%s16106_s8 + $0x48] sm:$0xff]  ;;  %v14668_v31 = vld [vmem:[%s16106_s8 + $0x40] sm:$0xff]  ;;  %v14699_v34 = vld [vmem:[%s16106_s8 + $0x138] sm:$0xff] }
  0x47   : > { %8779 = vmatpush.bf16.msra.mxu1 %v14673_v10  ;;  %v14677_v28 = vld [vmem:[%s16106_s8 + $0x88] sm:$0xff]  ;;  %v14676_v32 = vld [vmem:[%s16106_s8 + $0x80] sm:$0xff]  ;;  %v14707_v35 = vld [vmem:[%s16106_s8 + $0x178] sm:$0xff] }
  0x48   : > { %8792 = vmatpush.bf16.msra.mxu2 %v14681_v11  ;;  %v14685_v29 = vld [vmem:[%s16106_s8 + $0xc8] sm:$0xff]  ;;  %v14684_v33 = vld [vmem:[%s16106_s8 + $0xc0] sm:$0xff]  ;;  %v14715_v36 = vld [vmem:[%s16106_s8 + $0x1b8] sm:$0xff] }
  0x49   : > { %8805 = vmatpush.bf16.msra.mxu3 %v14689_v12  ;;  %v14723_v37 = vld [vmem:[%s16106_s8 + $0x1f8] sm:$0xff]  ;;  %v14698_v38 = vld [vmem:[%s16106_s8 + $0x130] sm:$0xff]  ;;  %v14697_v46 = vld [vmem:[%s16106_s8 + $0x128] sm:$0xff] }
  0x4a   : > { %8767 = vmatpush.bf16.msra.mxu0 %v14664_v13  ;;  %v14706_v41 = vld [vmem:[%s16106_s8 + $0x170] sm:$0xff]  ;;  %v14705_v47 = vld [vmem:[%s16106_s8 + $0x168] sm:$0xff]  ;;  %v14696_v50 = vld [vmem:[%s16106_s8 + $0x120] sm:$0xff] }
  0x4b   : > { %8780 = vmatpush.bf16.msra.mxu1 %v14672_v14  ;;  %v14714_v44 = vld [vmem:[%s16106_s8 + $0x1b0] sm:$0xff]  ;;  %v14713_v48 = vld [vmem:[%s16106_s8 + $0x1a8] sm:$0xff]  ;;  %v14704_v51 = vld [vmem:[%s16106_s8 + $0x160] sm:$0xff] }
  0x4c   : > { %8793 = vmatpush.bf16.msra.mxu2 %v14680_v15  ;;  %v14722_v45 = vld [vmem:[%s16106_s8 + $0x1f0] sm:$0xff]  ;;  %v14721_v49 = vld [vmem:[%s16106_s8 + $0x1e8] sm:$0xff]  ;;  %v14712_v52 = vld [vmem:[%s16106_s8 + $0x1a0] sm:$0xff] }
  0x4d   : > { %8806 = vmatpush.bf16.msra.mxu3 %v14688_v16  ;;  %v2336_v39 = vld [vmem:[#allocation1 + $0x12] sm:$0xff]  ;;  %v2334_v40 = vld [vmem:[#allocation1] sm:$0xff]  ;;  %v2335_v43 = vld [vmem:[#allocation1 + $0x9] sm:$0xff] }
  0x4e   : > { %8768 = vmatpush.bf16.msra.mxu0 %v14663_v17  ;;  %v2337_v42 = vld [vmem:[#allocation1 + $0x1b] sm:$0xff]  ;;  %v14720_v53 = vld [vmem:[%s16106_s8 + $0x1e0] sm:$0xff]  ;;  %v14693_v62 = vld [vmem:[%s16106_s8 + $0x108] sm:$0xff] }
  0x4f   : > { %8781 = vmatpush.bf16.msra.mxu1 %v14671_v18  ;;  %v14695_v54 = vld [vmem:[%s16106_s8 + $0x118] sm:$0xff]  ;;  %v14694_v58 = vld [vmem:[%s16106_s8 + $0x110] sm:$0xff]  ;;  %v14701_v63 = vld [vmem:[%s16106_s8 + $0x148] sm:$0xff] }
  0x50   : > { %8794 = vmatpush.bf16.msra.mxu2 %v14679_v19  ;;  %v14703_v55 = vld [vmem:[%s16106_s8 + $0x158] sm:$0xff]  ;;  %v14702_v59 = vld [vmem:[%s16106_s8 + $0x150] sm:$0xff]  ;;  %v14709_v0 = vld [vmem:[%s16106_s8 + $0x188] sm:$0xff] }
  0x51   : > { %8807 = vmatpush.bf16.msra.mxu3 %v14687_v20  ;;  %v14711_v56 = vld [vmem:[%s16106_s8 + $0x198] sm:$0xff]  ;;  %v14710_v60 = vld [vmem:[%s16106_s8 + $0x190] sm:$0xff]  ;;  %v14717_v1 = vld [vmem:[%s16106_s8 + $0x1c8] sm:$0xff] }
  0x52   : > { %8769 = vmatpush.bf16.msra.mxu0 %v14662_v22  ;;  %v14719_v57 = vld [vmem:[%s16106_s8 + $0x1d8] sm:$0xff]  ;;  %v14718_v61 = vld [vmem:[%s16106_s8 + $0x1d0] sm:$0xff]  ;;  %v2339_v5 = vld [vmem:[#allocation1 + $0x2d] sm:$0xff] }
  0x53   : > { %8782 = vmatpush.bf16.msra.mxu1 %v14670_v23  ;;  %v2340_v2 = vld [vmem:[#allocation1 + $0x36] sm:$0xff]  ;;  %v2338_v3 = vld [vmem:[#allocation1 + $0x24] sm:$0xff] }
  0x54   : > { %8795 = vmatpush.bf16.msra.mxu2 %v14678_v24  ;;  %v2341_v4 = vld [vmem:[#allocation1 + $0x3f] sm:$0xff]  ;;  %v269_v6 = vld [vmem:[%s16125_s27 + $0x8] sm:$0xff]  ;;  %v14729_v19 = vld [vmem:[%s16106_s8 + $0x228] sm:$0xff] }
  0x55   : > { %8808 = vmatpush.bf16.msra.mxu3 %v14686_v25  ;;  %2343 = vst [vmem:[#allocation1] ss:$9 sm:$0xff] %v269_v6  ;;  %v14692_v7 = vld [vmem:[%s16106_s8 + $0x100] sm:$0xff]  ;;  %v14731_v11 = vld [vmem:[%s16106_s8 + $0x238] sm:$0xff]  ;;  %v14730_v15 = vld [vmem:[%s16106_s8 + $0x230] sm:$0xff] }
  0x56   : > { %8770 = vmatpush.bf16.msra.mxu0 %v14661_v26  ;;  %v14700_v8 = vld [vmem:[%s16106_s8 + $0x140] sm:$0xff]  ;;  %v14739_v12 = vld [vmem:[%s16106_s8 + $0x278] sm:$0xff]  ;;  %v14738_v16 = vld [vmem:[%s16106_s8 + $0x270] sm:$0xff] }
  0x57   : > { %8783 = vmatpush.bf16.msra.mxu1 %v14669_v27  ;;  %v14708_v9 = vld [vmem:[%s16106_s8 + $0x180] sm:$0xff]  ;;  %v14747_v13 = vld [vmem:[%s16106_s8 + $0x2b8] sm:$0xff]  ;;  %v14746_v17 = vld [vmem:[%s16106_s8 + $0x2b0] sm:$0xff] }
  0x58   : > { %8796 = vmatpush.bf16.msra.mxu2 %v14677_v28  ;;  %v14716_v10 = vld [vmem:[%s16106_s8 + $0x1c0] sm:$0xff]  ;;  %v14755_v14 = vld [vmem:[%s16106_s8 + $0x2f8] sm:$0xff]  ;;  %v14754_v18 = vld [vmem:[%s16106_s8 + $0x2f0] sm:$0xff] }
  0x59   : > { %8809 = vmatpush.bf16.msra.mxu3 %v14685_v29  ;;  %v14737_v20 = vld [vmem:[%s16106_s8 + $0x268] sm:$0xff]  ;;  %v14728_v23 = vld [vmem:[%s16106_s8 + $0x220] sm:$0xff]  ;;  %v14727_v27 = vld [vmem:[%s16106_s8 + $0x218] sm:$0xff] }
  0x5a   : > { %8771 = vmatpush.bf16.msra.mxu0 %v14660_v30  ;;  %v14745_v21 = vld [vmem:[%s16106_s8 + $0x2a8] sm:$0xff]  ;;  %v14736_v24 = vld [vmem:[%s16106_s8 + $0x260] sm:$0xff]  ;;  %v14735_v28 = vld [vmem:[%s16106_s8 + $0x258] sm:$0xff] }
  0x5b   : > { %8784 = vmatpush.bf16.msra.mxu1 %v14668_v31  ;;  %v14753_v22 = vld [vmem:[%s16106_s8 + $0x2e8] sm:$0xff]  ;;  %v14744_v25 = vld [vmem:[%s16106_s8 + $0x2a0] sm:$0xff]  ;;  %v14743_v29 = vld [vmem:[%s16106_s8 + $0x298] sm:$0xff] }
  0x5c   : > { %8797 = vmatpush.bf16.msra.mxu2 %v14676_v32  ;;  %v14752_v26 = vld [vmem:[%s16106_s8 + $0x2e0] sm:$0xff]  ;;  %v14751_v30 = vld [vmem:[%s16106_s8 + $0x2d8] sm:$0xff]  ;;  %v14726_v31 = vld [vmem:[%s16106_s8 + $0x210] sm:$0xff] }
  0x5d   : > { %8810 = vmatpush.bf16.msra.mxu3 %v14684_v33  ;;  %8772 = vmatmul.bf16.vlgmr.msra.gmra.mxu0 %v2334_v40  ;;  %v14734_v32 = vld [vmem:[%s16106_s8 + $0x250] sm:$0xff]  ;;  %v14732_v40 = vld [vmem:[%s16106_s8 + $0x240] sm:$0xff] }
  0x5e   : > { %8816 = vmatpush.bf16.msrb.mxu0 %v14699_v34  ;;  %8785 = vmatmul.bf16.vlgmr.msra.gmra.mxu1 %v2335_v43  ;;  %v14742_v33 = vld [vmem:[%s16106_s8 + $0x290] sm:$0xff]  ;;  %v14763_v43 = vld [vmem:[%s16106_s8 + $0x338] sm:$0xff] }
  0x5f   : > { %8829 = vmatpush.bf16.msrb.mxu1 %v14707_v35  ;;  %8798 = vmatmul.bf16.vlgmr.msra.gmra.mxu2 %v2336_v39  ;;  %v14750_v34 = vld [vmem:[%s16106_s8 + $0x2d0] sm:$0xff]  ;;  %v14725_v35 = vld [vmem:[%s16106_s8 + $0x208] sm:$0xff]  ;;  %v14724_v39 = vld [vmem:[%s16106_s8 + $0x200] sm:$0xff] }
  0x60   : > { %8842 = vmatpush.bf16.msrb.mxu2 %v14715_v36  ;;  %8811 = vmatmul.bf16.vlgmr.msra.gmra.mxu3 %v2337_v42  ;;  %v14733_v36 = vld [vmem:[%s16106_s8 + $0x248] sm:$0xff]  ;;  %v14748_v42 = vld [vmem:[%s16106_s8 + $0x2c0] sm:$0xff]  ;;  %v14782_v6 = vld [vmem:[%s16106_s8 + $0x3d0] sm:$0xff] }
  0x61   : > { %8855 = vmatpush.bf16.msrb.mxu3 %v14723_v37  ;;  %v14741_v37 = vld [vmem:[%s16106_s8 + $0x288] sm:$0xff] }
  0x62   : > { %8817 = vmatpush.bf16.msrb.mxu0 %v14698_v38  ;;  %v14749_v38 = vld [vmem:[%s16106_s8 + $0x2c8] sm:$0xff] }
  0x63   : > { %8830 = vmatpush.bf16.msrb.mxu1 %v14706_v41  ;;  %v14740_v41 = vld [vmem:[%s16106_s8 + $0x280] sm:$0xff] }
  0x64   : > { %8843 = vmatpush.bf16.msrb.mxu2 %v14714_v44  ;;  %v14771_v44 = vld [vmem:[%s16106_s8 + $0x378] sm:$0xff] }
  0x65   : > { %8856 = vmatpush.bf16.msrb.mxu3 %v14722_v45  ;;  %v14779_v45 = vld [vmem:[%s16106_s8 + $0x3b8] sm:$0xff] }
  0x66   : > { %8818 = vmatpush.bf16.msrb.mxu0 %v14697_v46  ;;  %v14787_v46 = vld [vmem:[%s16106_s8 + $0x3f8] sm:$0xff] }
  0x67   : > { %8831 = vmatpush.bf16.msrb.mxu1 %v14705_v47  ;;  %v2344_v47 = vld [vmem:[#allocation1] sm:$0xff] }
  0x68   : > { %8844 = vmatpush.bf16.msrb.mxu2 %v14713_v48  ;;  %v2346_v48 = vld [vmem:[#allocation1 + $0x12] sm:$0xff] }
  0x69   : > { %8857 = vmatpush.bf16.msrb.mxu3 %v14721_v49  ;;  %v2345_v49 = vld [vmem:[#allocation1 + $0x9] sm:$0xff] }
  0x6a   : > { %8819 = vmatpush.bf16.msrb.mxu0 %v14696_v50  ;;  %v2347_v50 = vld [vmem:[#allocation1 + $0x1b] sm:$0xff] }
  0x6b   : > { %8832 = vmatpush.bf16.msrb.mxu1 %v14704_v51  ;;  %v14762_v51 = vld [vmem:[%s16106_s8 + $0x330] sm:$0xff] }
  0x6c   : > { %8845 = vmatpush.bf16.msrb.mxu2 %v14712_v52  ;;  %v14770_v52 = vld [vmem:[%s16106_s8 + $0x370] sm:$0xff] }
  0x6d   : > { %8858 = vmatpush.bf16.msrb.mxu3 %v14720_v53  ;;  %v14778_v53 = vld [vmem:[%s16106_s8 + $0x3b0] sm:$0xff] }
  0x6e   : > { %8820 = vmatpush.bf16.msrb.mxu0 %v14695_v54  ;;  %v14786_v54 = vld [vmem:[%s16106_s8 + $0x3f0] sm:$0xff] }
  0x6f   : > { %8833 = vmatpush.bf16.msrb.mxu1 %v14703_v55  ;;  %v14761_v55 = vld [vmem:[%s16106_s8 + $0x328] sm:$0xff] }
  0x70   : > { %8846 = vmatpush.bf16.msrb.mxu2 %v14711_v56  ;;  %v14769_v56 = vld [vmem:[%s16106_s8 + $0x368] sm:$0xff] }
  0x71   : > { %8859 = vmatpush.bf16.msrb.mxu3 %v14719_v57  ;;  %v14777_v57 = vld [vmem:[%s16106_s8 + $0x3a8] sm:$0xff] }
  0x72   : > { %8821 = vmatpush.bf16.msrb.mxu0 %v14694_v58  ;;  %v14785_v58 = vld [vmem:[%s16106_s8 + $0x3e8] sm:$0xff] }
  0x73   : > { %8834 = vmatpush.bf16.msrb.mxu1 %v14702_v59  ;;  %v14760_v59 = vld [vmem:[%s16106_s8 + $0x320] sm:$0xff] }
  0x74   : > { %8847 = vmatpush.bf16.msrb.mxu2 %v14710_v60  ;;  %v14768_v60 = vld [vmem:[%s16106_s8 + $0x360] sm:$0xff] }
  0x75   : > { %8860 = vmatpush.bf16.msrb.mxu3 %v14718_v61  ;;  %v14776_v61 = vld [vmem:[%s16106_s8 + $0x3a0] sm:$0xff] }
  0x76   : > { %8822 = vmatpush.bf16.msrb.mxu0 %v14693_v62  ;;  %v14784_v62 = vld [vmem:[%s16106_s8 + $0x3e0] sm:$0xff] }
  0x77   : > { %8835 = vmatpush.bf16.msrb.mxu1 %v14701_v63  ;;  %v14759_v63 = vld [vmem:[%s16106_s8 + $0x318] sm:$0xff] }
  0x78   : > { %8848 = vmatpush.bf16.msrb.mxu2 %v14709_v0  ;;  %v14767_v0 = vld [vmem:[%s16106_s8 + $0x358] sm:$0xff] }
  0x79   : > { %8861 = vmatpush.bf16.msrb.mxu3 %v14717_v1  ;;  %v14775_v1 = vld [vmem:[%s16106_s8 + $0x398] sm:$0xff] }
  0x7a   : > { %8823 = vmatpush.bf16.msrb.mxu0 %v14692_v7  ;;  %v14757_v7 = vld [vmem:[%s16106_s8 + $0x308] sm:$0xff] }
  0x7b   : > { %8836 = vmatpush.bf16.msrb.mxu1 %v14700_v8  ;;  %v14765_v8 = vld [vmem:[%s16106_s8 + $0x348] sm:$0xff] }
  0x7c   : > { %8849 = vmatpush.bf16.msrb.mxu2 %v14708_v9  ;;  %v14773_v9 = vld [vmem:[%s16106_s8 + $0x388] sm:$0xff] }
  0x7d   : > { %8862 = vmatpush.bf16.msrb.mxu3 %v14716_v10  ;;  %8824 = vmatmul.bf16.vlgmr.msrb.gmra.mxu0 %v2338_v3  ;;  %v14758_v3 = vld [vmem:[%s16106_s8 + $0x310] sm:$0xff]  ;;  %v14781_v10 = vld [vmem:[%s16106_s8 + $0x3c8] sm:$0xff] }
  0x7e   : > { %8868 = vmatpush.bf16.msra.mxu0 %v14731_v11  ;;  %8837 = vmatmul.bf16.vlgmr.msrb.gmra.mxu1 %v2339_v5  ;;  %v14774_v5 = vld [vmem:[%s16106_s8 + $0x390] sm:$0xff]  ;;  %v2348_v11 = vld [vmem:[#allocation1 + $0x24] sm:$0xff] }
  0x7f   : > { %8881 = vmatpush.bf16.msra.mxu1 %v14739_v12  ;;  %8850 = vmatmul.bf16.vlgmr.msrb.gmra.mxu2 %v2340_v2  ;;  %v14783_v2 = vld [vmem:[%s16106_s8 + $0x3d8] sm:$0xff]  ;;  %v2350_v12 = vld [vmem:[#allocation1 + $0x36] sm:$0xff] }
  0x80   : > { %8894 = vmatpush.bf16.msra.mxu2 %v14747_v13  ;;  %8863 = vmatmul.bf16.vlgmr.msrb.gmra.mxu3 %v2341_v4  ;;  %v14766_v4 = vld [vmem:[%s16106_s8 + $0x350] sm:$0xff]  ;;  %v2349_v13 = vld [vmem:[#allocation1 + $0x2d] sm:$0xff] }
  0x81   : > { %8907 = vmatpush.bf16.msra.mxu3 %v14755_v14  ;;  %v2351_v14 = vld [vmem:[#allocation1 + $0x3f] sm:$0xff] }
  0x82   : > { %8869 = vmatpush.bf16.msra.mxu0 %v14730_v15  ;;  %v270_v15 = vld [vmem:[%s16125_s27 + $0x10] sm:$0xff] }
  0x83   : > { %8882 = vmatpush.bf16.msra.mxu1 %v14738_v16  ;;  %2353 = vst [vmem:[#allocation1] ss:$9 sm:$0xff] %v270_v15  ;;  %v14756_v16 = vld [vmem:[%s16106_s8 + $0x300] sm:$0xff] }
  0x84   : > { %8895 = vmatpush.bf16.msra.mxu2 %v14746_v17  ;;  %v14764_v17 = vld [vmem:[%s16106_s8 + $0x340] sm:$0xff] }
  0x85   : > { %8908 = vmatpush.bf16.msra.mxu3 %v14754_v18  ;;  %v14772_v18 = vld [vmem:[%s16106_s8 + $0x380] sm:$0xff] }
  0x86   : > { %8870 = vmatpush.bf16.msra.mxu0 %v14729_v19  ;;  %v14780_v19 = vld [vmem:[%s16106_s8 + $0x3c0] sm:$0xff] }
  0x87   : > { %8883 = vmatpush.bf16.msra.mxu1 %v14737_v20  ;;  %v14795_v20 = vld [vmem:[%s16106_s8 + $0x438] sm:$0xff] }
  0x88   : > { %8896 = vmatpush.bf16.msra.mxu2 %v14745_v21  ;;  %v14803_v21 = vld [vmem:[%s16106_s8 + $0x478] sm:$0xff] }
  0x89   : > { %8909 = vmatpush.bf16.msra.mxu3 %v14753_v22  ;;  %v14811_v22 = vld [vmem:[%s16106_s8 + $0x4b8] sm:$0xff] }
  0x8a   : > { %8871 = vmatpush.bf16.msra.mxu0 %v14728_v23  ;;  %v14819_v23 = vld [vmem:[%s16106_s8 + $0x4f8] sm:$0xff] }
  0x8b   : > { %8884 = vmatpush.bf16.msra.mxu1 %v14736_v24  ;;  %v14794_v24 = vld [vmem:[%s16106_s8 + $0x430] sm:$0xff] }
  0x8c   : > { %8897 = vmatpush.bf16.msra.mxu2 %v14744_v25  ;;  %v14802_v25 = vld [vmem:[%s16106_s8 + $0x470] sm:$0xff] }
  0x8d   : > { %8910 = vmatpush.bf16.msra.mxu3 %v14752_v26  ;;  %v14810_v26 = vld [vmem:[%s16106_s8 + $0x4b0] sm:$0xff] }
  0x8e   : > { %8872 = vmatpush.bf16.msra.mxu0 %v14727_v27  ;;  %v14818_v27 = vld [vmem:[%s16106_s8 + $0x4f0] sm:$0xff] }
  0x8f   : > { %8885 = vmatpush.bf16.msra.mxu1 %v14735_v28  ;;  %v14793_v28 = vld [vmem:[%s16106_s8 + $0x428] sm:$0xff] }
  0x90   : > { %8898 = vmatpush.bf16.msra.mxu2 %v14743_v29  ;;  %v14801_v29 = vld [vmem:[%s16106_s8 + $0x468] sm:$0xff] }
  0x91   : > { %8911 = vmatpush.bf16.msra.mxu3 %v14751_v30  ;;  %v14809_v30 = vld [vmem:[%s16106_s8 + $0x4a8] sm:$0xff] }
  0x92   : > { %8873 = vmatpush.bf16.msra.mxu0 %v14726_v31  ;;  %v14817_v31 = vld [vmem:[%s16106_s8 + $0x4e8] sm:$0xff] }
  0x93   : > { %8886 = vmatpush.bf16.msra.mxu1 %v14734_v32  ;;  %v14792_v32 = vld [vmem:[%s16106_s8 + $0x420] sm:$0xff] }
  0x94   : > { %8899 = vmatpush.bf16.msra.mxu2 %v14742_v33  ;;  %v14800_v33 = vld [vmem:[%s16106_s8 + $0x460] sm:$0xff] }
  0x95   : > { %8912 = vmatpush.bf16.msra.mxu3 %v14750_v34  ;;  %v14808_v34 = vld [vmem:[%s16106_s8 + $0x4a0] sm:$0xff] }
  0x96   : > { %8874 = vmatpush.bf16.msra.mxu0 %v14725_v35  ;;  %v14816_v35 = vld [vmem:[%s16106_s8 + $0x4e0] sm:$0xff] }
  0x97   : > { %8887 = vmatpush.bf16.msra.mxu1 %v14733_v36  ;;  %v14791_v36 = vld [vmem:[%s16106_s8 + $0x418] sm:$0xff] }
  0x98   : > { %8900 = vmatpush.bf16.msra.mxu2 %v14741_v37  ;;  %v14799_v37 = vld [vmem:[%s16106_s8 + $0x458] sm:$0xff] }
  0x99   : > { %8913 = vmatpush.bf16.msra.mxu3 %v14749_v38  ;;  %v14807_v38 = vld [vmem:[%s16106_s8 + $0x498] sm:$0xff] }
  0x9a   : > { %8875 = vmatpush.bf16.msra.mxu0 %v14724_v39  ;;  %v14815_v39 = vld [vmem:[%s16106_s8 + $0x4d8] sm:$0xff] }
  0x9b   : > { %8888 = vmatpush.bf16.msra.mxu1 %v14732_v40  ;;  %v14790_v40 = vld [vmem:[%s16106_s8 + $0x410] sm:$0xff] }
  0x9c   : > { %8901 = vmatpush.bf16.msra.mxu2 %v14740_v41  ;;  %v14798_v41 = vld [vmem:[%s16106_s8 + $0x450] sm:$0xff] }
  0x9d   : > { %8914 = vmatpush.bf16.msra.mxu3 %v14748_v42  ;;  %8876 = vmatmul.bf16.vlgmr.msra.gmra.mxu0 %v2344_v47  ;;  %v14806_v42 = vld [vmem:[%s16106_s8 + $0x490] sm:$0xff]  ;;  %v14813_v47 = vld [vmem:[%s16106_s8 + $0x4c8] sm:$0xff] }
  0x9e   : > { %8920 = vmatpush.bf16.msrb.mxu0 %v14763_v43  ;;  %8889 = vmatmul.bf16.vlgmr.msra.gmra.mxu1 %v2345_v49  ;;  %v14814_v43 = vld [vmem:[%s16106_s8 + $0x4d0] sm:$0xff]  ;;  %v14796_v49 = vld [vmem:[%s16106_s8 + $0x440] sm:$0xff] }
  0x9f   : > { %8933 = vmatpush.bf16.msrb.mxu1 %v14771_v44  ;;  %8902 = vmatmul.bf16.vlgmr.msra.gmra.mxu2 %v2346_v48  ;;  %v14789_v44 = vld [vmem:[%s16106_s8 + $0x408] sm:$0xff]  ;;  %v14788_v48 = vld [vmem:[%s16106_s8 + $0x400] sm:$0xff] }
  0xa0   : > { %8946 = vmatpush.bf16.msrb.mxu2 %v14779_v45  ;;  %8915 = vmatmul.bf16.vlgmr.msra.gmra.mxu3 %v2347_v50  ;;  %v14797_v45 = vld [vmem:[%s16106_s8 + $0x448] sm:$0xff]  ;;  %v14804_v50 = vld [vmem:[%s16106_s8 + $0x480] sm:$0xff] }
  0xa1   : > { %8959 = vmatpush.bf16.msrb.mxu3 %v14787_v46  ;;  %v14805_v46 = vld [vmem:[%s16106_s8 + $0x488] sm:$0xff] }
  0xa2   : > { %8921 = vmatpush.bf16.msrb.mxu0 %v14762_v51  ;;  %v14812_v51 = vld [vmem:[%s16106_s8 + $0x4c0] sm:$0xff] }
  0xa3   : > { %8934 = vmatpush.bf16.msrb.mxu1 %v14770_v52  ;;  %v14827_v52 = vld [vmem:[%s16106_s8 + $0x538] sm:$0xff] }
  0xa4   : > { %8947 = vmatpush.bf16.msrb.mxu2 %v14778_v53  ;;  %v14835_v53 = vld [vmem:[%s16106_s8 + $0x578] sm:$0xff] }
  0xa5   : > { %8960 = vmatpush.bf16.msrb.mxu3 %v14786_v54  ;;  %v14843_v54 = vld [vmem:[%s16106_s8 + $0x5b8] sm:$0xff] }
  0xa6   : > { %8922 = vmatpush.bf16.msrb.mxu0 %v14761_v55  ;;  %v14851_v55 = vld [vmem:[%s16106_s8 + $0x5f8] sm:$0xff] }
  0xa7   : > { %8935 = vmatpush.bf16.msrb.mxu1 %v14769_v56  ;;  %v2354_v56 = vld [vmem:[#allocation1] sm:$0xff] }
  0xa8   : > { %8948 = vmatpush.bf16.msrb.mxu2 %v14777_v57  ;;  %v2356_v57 = vld [vmem:[#allocation1 + $0x12] sm:$0xff] }
  0xa9   : > { %8961 = vmatpush.bf16.msrb.mxu3 %v14785_v58  ;;  %v2355_v58 = vld [vmem:[#allocation1 + $0x9] sm:$0xff] }
  0xaa   : > { %8923 = vmatpush.bf16.msrb.mxu0 %v14760_v59  ;;  %v2357_v59 = vld [vmem:[#allocation1 + $0x1b] sm:$0xff] }
  0xab   : > { %8936 = vmatpush.bf16.msrb.mxu1 %v14768_v60  ;;  %v14826_v60 = vld [vmem:[%s16106_s8 + $0x530] sm:$0xff] }
  0xac   : > { %8949 = vmatpush.bf16.msrb.mxu2 %v14776_v61  ;;  %v14834_v61 = vld [vmem:[%s16106_s8 + $0x570] sm:$0xff] }
  0xad   : > { %8962 = vmatpush.bf16.msrb.mxu3 %v14784_v62  ;;  %v14842_v62 = vld [vmem:[%s16106_s8 + $0x5b0] sm:$0xff] }
  0xae   : > { %8924 = vmatpush.bf16.msrb.mxu0 %v14759_v63  ;;  %v14850_v63 = vld [vmem:[%s16106_s8 + $0x5f0] sm:$0xff] }
  0xaf   : > { %8937 = vmatpush.bf16.msrb.mxu1 %v14767_v0  ;;  %v14825_v0 = vld [vmem:[%s16106_s8 + $0x528] sm:$0xff] }
  0xb0   : > { %8950 = vmatpush.bf16.msrb.mxu2 %v14775_v1  ;;  %v14833_v1 = vld [vmem:[%s16106_s8 + $0x568] sm:$0xff] }
  0xb1   : > { %8963 = vmatpush.bf16.msrb.mxu3 %v14783_v2  ;;  %v14841_v2 = vld [vmem:[%s16106_s8 + $0x5a8] sm:$0xff] }
  0xb2   : > { %8925 = vmatpush.bf16.msrb.mxu0 %v14758_v3  ;;  %v14849_v3 = vld [vmem:[%s16106_s8 + $0x5e8] sm:$0xff] }
  0xb3   : > { %8938 = vmatpush.bf16.msrb.mxu1 %v14766_v4 }
  0xb4   : > { %8951 = vmatpush.bf16.msrb.mxu2 %v14774_v5  ;;  %v14824_v5 = vld [vmem:[%s16106_s8 + $0x520] sm:$0xff] }
  0xb5   : > { %8964 = vmatpush.bf16.msrb.mxu3 %v14782_v6  ;;  %v14832_v6 = vld [vmem:[%s16106_s8 + $0x560] sm:$0xff] }
  0xb6   : > { %8926 = vmatpush.bf16.msrb.mxu0 %v14757_v7 }
  0xb7   : > { %8939 = vmatpush.bf16.msrb.mxu1 %v14765_v8  ;;  %v14840_v8 = vld [vmem:[%s16106_s8 + $0x5a0] sm:$0xff] }
  0xb8   : > { %8952 = vmatpush.bf16.msrb.mxu2 %v14773_v9  ;;  %v14848_v9 = vld [vmem:[%s16106_s8 + $0x5e0] sm:$0xff] }
  0xb9   : > { %8965 = vmatpush.bf16.msrb.mxu3 %v14781_v10 }
  0xba   : > { %8927 = vmatpush.bf16.msrb.mxu0 %v14756_v16 }
  0xbb   : > { %8940 = vmatpush.bf16.msrb.mxu1 %v14764_v17 }
  0xbc   : > { %8953 = vmatpush.bf16.msrb.mxu2 %v14772_v18 }
  0xbd   : > { %8966 = vmatpush.bf16.msrb.mxu3 %v14780_v19  ;;  %8928 = vmatmul.bf16.vlgmr.msrb.gmra.mxu0 %v2348_v11  ;;  %v14823_v11 = vld [vmem:[%s16106_s8 + $0x518] sm:$0xff]  ;;  %v14822_v19 = vld [vmem:[%s16106_s8 + $0x510] sm:$0xff] }
  0xbe   : > { %8972 = vmatpush.bf16.msra.mxu0 %v14795_v20  ;;  %8941 = vmatmul.bf16.vlgmr.msrb.gmra.mxu1 %v2349_v13  ;;  %v14839_v13 = vld [vmem:[%s16106_s8 + $0x598] sm:$0xff]  ;;  %v14830_v20 = vld [vmem:[%s16106_s8 + $0x550] sm:$0xff] }
  0xbf   : > { %8985 = vmatpush.bf16.msra.mxu1 %v14803_v21  ;;  %8954 = vmatmul.bf16.vlgmr.msrb.gmra.mxu2 %v2350_v12  ;;  %v14831_v12 = vld [vmem:[%s16106_s8 + $0x558] sm:$0xff] }
  0xc0   : > { %8998 = vmatpush.bf16.msra.mxu2 %v14811_v22  ;;  %8967 = vmatmul.bf16.vlgmr.msrb.gmra.mxu3 %v2351_v14  ;;  %v14847_v14 = vld [vmem:[%s16106_s8 + $0x5d8] sm:$0xff] }
  0xc1   : > { %9011 = vmatpush.bf16.msra.mxu3 %v14819_v23  ;;  %v14838_v23 = vld [vmem:[%s16106_s8 + $0x590] sm:$0xff] }
  0xc2   : > { %8973 = vmatpush.bf16.msra.mxu0 %v14794_v24  ;;  %v14846_v24 = vld [vmem:[%s16106_s8 + $0x5d0] sm:$0xff] }
  0xc3   : > { %8986 = vmatpush.bf16.msra.mxu1 %v14802_v25  ;;  %v14821_v25 = vld [vmem:[%s16106_s8 + $0x508] sm:$0xff] }
  0xc4   : > { %8999 = vmatpush.bf16.msra.mxu2 %v14810_v26  ;;  %v14829_v26 = vld [vmem:[%s16106_s8 + $0x548] sm:$0xff] }
  0xc5   : > { %9012 = vmatpush.bf16.msra.mxu3 %v14818_v27  ;;  %v14837_v27 = vld [vmem:[%s16106_s8 + $0x588] sm:$0xff] }
  0xc6   : > { %8974 = vmatpush.bf16.msra.mxu0 %v14793_v28  ;;  %v14845_v28 = vld [vmem:[%s16106_s8 + $0x5c8] sm:$0xff] }
  0xc7   : > { %8987 = vmatpush.bf16.msra.mxu1 %v14801_v29  ;;  %v2358_v29 = vld [vmem:[#allocation1 + $0x24] sm:$0xff] }
  0xc8   : > { %9000 = vmatpush.bf16.msra.mxu2 %v14809_v30  ;;  %v2360_v30 = vld [vmem:[#allocation1 + $0x36] sm:$0xff] }
  0xc9   : > { %9013 = vmatpush.bf16.msra.mxu3 %v14817_v31 }
  0xca   : > { %8975 = vmatpush.bf16.msra.mxu0 %v14792_v32  ;;  %v2359_v32 = vld [vmem:[#allocation1 + $0x2d] sm:$0xff] }
  0xcb   : > { %8988 = vmatpush.bf16.msra.mxu1 %v14800_v33  ;;  %v2361_v33 = vld [vmem:[#allocation1 + $0x3f] sm:$0xff] }
  0xcc   : > { %9001 = vmatpush.bf16.msra.mxu2 %v14808_v34 }
  0xcd   : > { %9014 = vmatpush.bf16.msra.mxu3 %v14816_v35  ;;  %v271_v35 = vld [vmem:[%s16125_s27 + $0x18] sm:$0xff] }
  0xce   : > { %8976 = vmatpush.bf16.msra.mxu0 %v14791_v36  ;;  %2363 = vst [vmem:[#allocation1] ss:$9 sm:$0xff] %v271_v35  ;;  %v14820_v36 = vld [vmem:[%s16106_s8 + $0x500] sm:$0xff]  ;;  %v14913_v35 = vld [vmem:[%s16106_s8 + $0x7e8] sm:$0xff] }
  0xcf   : > { %8989 = vmatpush.bf16.msra.mxu1 %v14799_v37  ;;  %v14828_v37 = vld [vmem:[%s16106_s8 + $0x540] sm:$0xff] }
  0xd0   : > { %9002 = vmatpush.bf16.msra.mxu2 %v14807_v38  ;;  %v14836_v38 = vld [vmem:[%s16106_s8 + $0x580] sm:$0xff] }
  0xd1   : > { %9015 = vmatpush.bf16.msra.mxu3 %v14815_v39  ;;  %v14844_v39 = vld [vmem:[%s16106_s8 + $0x5c0] sm:$0xff] }
  0xd2   : > { %8977 = vmatpush.bf16.msra.mxu0 %v14790_v40  ;;  %v14859_v40 = vld [vmem:[%s16106_s8 + $0x638] sm:$0xff] }
  0xd3   : > { %8990 = vmatpush.bf16.msra.mxu1 %v14798_v41  ;;  %v14867_v41 = vld [vmem:[%s16106_s8 + $0x678] sm:$0xff] }
  0xd4   : > { %9003 = vmatpush.bf16.msra.mxu2 %v14806_v42  ;;  %v14875_v42 = vld [vmem:[%s16106_s8 + $0x6b8] sm:$0xff] }
  0xd5   : > { %9016 = vmatpush.bf16.msra.mxu3 %v14814_v43  ;;  %v14883_v43 = vld [vmem:[%s16106_s8 + $0x6f8] sm:$0xff] }
  0xd6   : > { %8978 = vmatpush.bf16.msra.mxu0 %v14789_v44  ;;  %v14858_v44 = vld [vmem:[%s16106_s8 + $0x630] sm:$0xff] }
  0xd7   : > { %8991 = vmatpush.bf16.msra.mxu1 %v14797_v45  ;;  %v14866_v45 = vld [vmem:[%s16106_s8 + $0x670] sm:$0xff] }
  0xd8   : > { %9004 = vmatpush.bf16.msra.mxu2 %v14805_v46  ;;  %v14874_v46 = vld [vmem:[%s16106_s8 + $0x6b0] sm:$0xff] }
  0xd9   : > { %9017 = vmatpush.bf16.msra.mxu3 %v14813_v47  ;;  %v14882_v47 = vld [vmem:[%s16106_s8 + $0x6f0] sm:$0xff] }
  0xda   : > { %8979 = vmatpush.bf16.msra.mxu0 %v14788_v48  ;;  %v8773_v4 = vpop.f32.mrf.mxu0  ;;  %v14857_v48 = vld [vmem:[%s16106_s8 + $0x628] sm:$0xff] }
  0xdb   : > { %8992 = vmatpush.bf16.msra.mxu1 %v14796_v49  ;;  %v8786_v7 = vpop.f32.mrf.mxu1  ;;  %v14865_v49 = vld [vmem:[%s16106_s8 + $0x668] sm:$0xff] }
  0xdc   : > { %9005 = vmatpush.bf16.msra.mxu2 %v14804_v50  ;;  %v8787_v10 = vadd.f32 %v8786_v7, %v8773_v4  ;;  %v14873_v50 = vld [vmem:[%s16106_s8 + $0x6a8] sm:$0xff]  ;;  %v14854_v4 = vld [vmem:[%s16106_s8 + $0x610] sm:$0xff] }
  0xdd   : > { %9018 = vmatpush.bf16.msra.mxu3 %v14812_v51  ;;  %8980 = vmatmul.bf16.vlgmr.msra.gmra.mxu0 %v2354_v56  ;;  %v14881_v51 = vld [vmem:[%s16106_s8 + $0x6e8] sm:$0xff] }
  0xde   : > { %9024 = vmatpush.bf16.msrb.mxu0 %v14827_v52  ;;  %8993 = vmatmul.bf16.vlgmr.msra.gmra.mxu1 %v2355_v58  ;;  %v14880_v58 = vld [vmem:[%s16106_s8 + $0x6e0] sm:$0xff] }
  0xdf   : > { %9037 = vmatpush.bf16.msrb.mxu1 %v14835_v53  ;;  %9006 = vmatmul.bf16.vlgmr.msra.gmra.mxu2 %v2356_v57  ;;  %v14856_v53 = vld [vmem:[%s16106_s8 + $0x620] sm:$0xff] }
  0xe0   : > { %9050 = vmatpush.bf16.msrb.mxu2 %v14843_v54  ;;  %9019 = vmatmul.bf16.vlgmr.msra.gmra.mxu3 %v2357_v59  ;;  %v14864_v54 = vld [vmem:[%s16106_s8 + $0x660] sm:$0xff] }
  0xe1   : > { %9063 = vmatpush.bf16.msrb.mxu3 %v14851_v55  ;;  %v14872_v57 = vld [vmem:[%s16106_s8 + $0x6a0] sm:$0xff] }
  0xe2   : > { %9025 = vmatpush.bf16.msrb.mxu0 %v14826_v60  ;;  %v8799_v15 = vpop.f32.mrf.mxu2  ;;  %v8775_v18 = vpop.f32.mrf.mxu0  ;;  %v14855_v60 = vld [vmem:[%s16106_s8 + $0x618] sm:$0xff] }
  0xe3   : > { %9038 = vmatpush.bf16.msrb.mxu1 %v14834_v61  ;;  %v8800_v16 = vadd.f32 %v8799_v15, %v8787_v10  ;;  %v8812_v17 = vpop.f32.mrf.mxu3  ;;  %v8788_v22 = vpop.f32.mrf.mxu1  ;;  %v14863_v61 = vld [vmem:[%s16106_s8 + $0x658] sm:$0xff]  ;;  %v14853_v10 = vld [vmem:[%s16106_s8 + $0x608] sm:$0xff]  ;;  %v14868_v18 = vld [vmem:[%s16106_s8 + $0x680] sm:$0xff] }
  0xe4   : > { %9051 = vmatpush.bf16.msrb.mxu2 %v14842_v62  ;;  %v14871_v62 = vld [vmem:[%s16106_s8 + $0x698] sm:$0xff] }
  0xe5   : > { %9064 = vmatpush.bf16.msrb.mxu3 %v14850_v63  ;;  %v16318_v21 = vadd.f32 %v8812_v17, %v8800_v16  ;;  %v14879_v63 = vld [vmem:[%s16106_s8 + $0x6d8] sm:$0xff]  ;;  %v14852_v16 = vld [vmem:[%s16106_s8 + $0x600] sm:$0xff] }
  0xe6   : > { %9026 = vmatpush.bf16.msrb.mxu0 %v14825_v0  ;;  %v14860_v17 = vld [vmem:[%s16106_s8 + $0x640] sm:$0xff]  ;;  %v14907_v22 = vld [vmem:[%s16106_s8 + $0x7b8] sm:$0xff] }
  0xe7   : > { %9039 = vmatpush.bf16.msrb.mxu1 %v14833_v1 }
  0xe8   : > { %9052 = vmatpush.bf16.msrb.mxu2 %v14841_v2 }
  0xe9   : > { %9065 = vmatpush.bf16.msrb.mxu3 %v14849_v3 }
  0xea   : > { %9027 = vmatpush.bf16.msrb.mxu0 %v14824_v5  ;;  %v8801_v31 = vpop.f32.mrf.mxu2  ;;  %v14862_v5 = vld [vmem:[%s16106_s8 + $0x650] sm:$0xff] }
  0xeb   : > { %9040 = vmatpush.bf16.msrb.mxu1 %v14832_v6  ;;  %v8814_v34 = vpop.f32.mrf.mxu3  ;;  %v14914_v31 = vld [vmem:[%s16106_s8 + $0x7f0] sm:$0xff] }
  0xec   : > { %9053 = vmatpush.bf16.msrb.mxu2 %v14840_v8  ;;  %v14870_v8 = vld [vmem:[%s16106_s8 + $0x690] sm:$0xff]  ;;  %v14905_v34 = vld [vmem:[%s16106_s8 + $0x7a8] sm:$0xff] }
  0xed   : > { %9066 = vmatpush.bf16.msrb.mxu3 %v14848_v9  ;;  %v14878_v9 = vld [vmem:[%s16106_s8 + $0x6d0] sm:$0xff] }
  0xee   : > { %9028 = vmatpush.bf16.msrb.mxu0 %v14823_v11  ;;  %v14861_v11 = vld [vmem:[%s16106_s8 + $0x648] sm:$0xff] }
  0xef   : > { %9041 = vmatpush.bf16.msrb.mxu1 %v14831_v12  ;;  %v14869_v12 = vld [vmem:[%s16106_s8 + $0x688] sm:$0xff] }
  0xf0   : > { %9054 = vmatpush.bf16.msrb.mxu2 %v14839_v13  ;;  %v14877_v13 = vld [vmem:[%s16106_s8 + $0x6c8] sm:$0xff] }
  0xf1   : > { %9067 = vmatpush.bf16.msrb.mxu3 %v14847_v14 }
  0xf2   : > { %9029 = vmatpush.bf16.msrb.mxu0 %v14822_v19  ;;  %v14876_v19 = vld [vmem:[%s16106_s8 + $0x6c0] sm:$0xff] }
  0xf3   : > { %9042 = vmatpush.bf16.msrb.mxu1 %v14830_v20  ;;  %v14891_v20 = vld [vmem:[%s16106_s8 + $0x738] sm:$0xff] }
  0xf4   : > { %9055 = vmatpush.bf16.msrb.mxu2 %v14838_v23  ;;  %v14915_v23 = vld [vmem:[%s16106_s8 + $0x7f8] sm:$0xff] }
  0xf5   : > { %9068 = vmatpush.bf16.msrb.mxu3 %v14846_v24  ;;  %v2364_v24 = vld [vmem:[#allocation1] sm:$0xff] }
  0xf6   : > { %9030 = vmatpush.bf16.msrb.mxu0 %v14821_v25  ;;  %v2366_v25 = vld [vmem:[#allocation1 + $0x12] sm:$0xff] }
  0xf7   : > { %9043 = vmatpush.bf16.msrb.mxu1 %v14829_v26  ;;  %v2365_v26 = vld [vmem:[#allocation1 + $0x9] sm:$0xff] }
  0xf8   : > { %9056 = vmatpush.bf16.msrb.mxu2 %v14837_v27  ;;  %v2367_v27 = vld [vmem:[#allocation1 + $0x1b] sm:$0xff] }
  0xf9   : > { %9069 = vmatpush.bf16.msrb.mxu3 %v14845_v28  ;;  %v14890_v28 = vld [vmem:[%s16106_s8 + $0x730] sm:$0xff] }
  0xfa   : > { %9031 = vmatpush.bf16.msrb.mxu0 %v14820_v36  ;;  %v8825_v52 = vpop.f32.mrf.mxu0 }
  0xfb   : > { %9044 = vmatpush.bf16.msrb.mxu1 %v14828_v37  ;;  %v8826_v55 = vadd.f32 %v8825_v52, %v16318_v21  ;;  %v8838_v56 = vpop.f32.mrf.mxu1  ;;  %v14899_v21 = vld [vmem:[%s16106_s8 + $0x778] sm:$0xff] }
  0xfc   : > { %9057 = vmatpush.bf16.msrb.mxu2 %v14836_v38  ;;  %v14888_v38 = vld [vmem:[%s16106_s8 + $0x720] sm:$0xff] }
  0xfd   : > { %9070 = vmatpush.bf16.msrb.mxu3 %v14844_v39  ;;  %9032 = vmatmul.bf16.vlgmr.msrb.gmra.mxu0 %v2358_v29  ;;  %v8839_v59 = vadd.f32 %v8838_v56, %v8826_v55  ;;  %v14898_v29 = vld [vmem:[%s16106_s8 + $0x770] sm:$0xff]  ;;  %v14896_v39 = vld [vmem:[%s16106_s8 + $0x760] sm:$0xff] }
  0xfe   : > { %9076 = vmatpush.bf16.msra.mxu0 %v14859_v40  ;;  %9045 = vmatmul.bf16.vlgmr.msrb.gmra.mxu1 %v2359_v32  ;;  %v14889_v32 = vld [vmem:[%s16106_s8 + $0x728] sm:$0xff]  ;;  %v14902_v56 = vld [vmem:[%s16106_s8 + $0x790] sm:$0xff] }
  0xff   : > { %9089 = vmatpush.bf16.msra.mxu1 %v14867_v41  ;;  %9058 = vmatmul.bf16.vlgmr.msrb.gmra.mxu2 %v2360_v30  ;;  %v14906_v30 = vld [vmem:[%s16106_s8 + $0x7b0] sm:$0xff]  ;;  %v14904_v41 = vld [vmem:[%s16106_s8 + $0x7a0] sm:$0xff] }
 0x100   : > { %9102 = vmatpush.bf16.msra.mxu2 %v14875_v42  ;;  %9071 = vmatmul.bf16.vlgmr.msrb.gmra.mxu3 %v2361_v33  ;;  %v14897_v33 = vld [vmem:[%s16106_s8 + $0x768] sm:$0xff]  ;;  %v14912_v42 = vld [vmem:[%s16106_s8 + $0x7e0] sm:$0xff] }
 0x101   : > { %9115 = vmatpush.bf16.msra.mxu3 %v14883_v43 }
 0x102   : > { %9077 = vmatpush.bf16.msra.mxu0 %v14858_v44  ;;  %v8851_v0 = vpop.f32.mrf.mxu2  ;;  %v8827_v3 = vpop.f32.mrf.mxu0  ;;  %v14887_v44 = vld [vmem:[%s16106_s8 + $0x718] sm:$0xff] }
 0x103   : > { %9090 = vmatpush.bf16.msra.mxu1 %v14866_v45  ;;  %v8852_v1 = vadd.f32 %v8851_v0, %v8839_v59  ;;  %v8864_v2 = vpop.f32.mrf.mxu3  ;;  %v8840_v7 = vpop.f32.mrf.mxu1  ;;  %v14895_v45 = vld [vmem:[%s16106_s8 + $0x758] sm:$0xff]  ;;  %v14893_v59 = vld [vmem:[%s16106_s8 + $0x748] sm:$0xff] }
 0x104   : > { %9103 = vmatpush.bf16.msra.mxu2 %v14874_v46  ;;  %v14903_v46 = vld [vmem:[%s16106_s8 + $0x798] sm:$0xff]  ;;  %v14900_v7 = vld [vmem:[%s16106_s8 + $0x780] sm:$0xff] }
 0x105   : > { %9116 = vmatpush.bf16.msra.mxu3 %v14882_v47  ;;  %v8865_v6 = vadd.f32 %v8864_v2, %v8852_v1  ;;  %v14911_v47 = vld [vmem:[%s16106_s8 + $0x7d8] sm:$0xff]  ;;  %v2369_v1 = vld [vmem:[#allocation1 + $0x2d] sm:$0xff] }
 0x106   : > { %9078 = vmatpush.bf16.msra.mxu0 %v14857_v48  ;;  %v2371_v2 = vld [vmem:[#allocation1 + $0x3f] sm:$0xff] }
 0x107   : > { %9091 = vmatpush.bf16.msra.mxu1 %v14865_v49 }
 0x108   : > { %9104 = vmatpush.bf16.msra.mxu2 %v14873_v50 }
 0x109   : > { %9117 = vmatpush.bf16.msra.mxu3 %v14881_v51 }
 0x10a   : > { %9079 = vmatpush.bf16.msra.mxu0 %v14856_v53  ;;  %v8853_v14 = vpop.f32.mrf.mxu2  ;;  %v14886_v53 = vld [vmem:[%s16106_s8 + $0x710] sm:$0xff] }
 0x10b   : > { %9092 = vmatpush.bf16.msra.mxu1 %v14864_v54  ;;  %v8866_v15 = vpop.f32.mrf.mxu3  ;;  %v14894_v54 = vld [vmem:[%s16106_s8 + $0x750] sm:$0xff] }
 0x10c   : > { %9105 = vmatpush.bf16.msra.mxu2 %v14872_v57  ;;  %v14910_v57 = vld [vmem:[%s16106_s8 + $0x7d0] sm:$0xff] }
 0x10d   : > { %9118 = vmatpush.bf16.msra.mxu3 %v14880_v58  ;;  %v14885_v58 = vld [vmem:[%s16106_s8 + $0x708] sm:$0xff]  ;;  %v14930_v14 = vld [vmem:[%s16106_s8 + $0x870] sm:$0xff] }
 0x10e   : > { %9080 = vmatpush.bf16.msra.mxu0 %v14855_v60  ;;  %v14901_v60 = vld [vmem:[%s16106_s8 + $0x788] sm:$0xff]  ;;  %v14938_v15 = vld [vmem:[%s16106_s8 + $0x8b0] sm:$0xff] }
 0x10f   : > { %9093 = vmatpush.bf16.msra.mxu1 %v14863_v61  ;;  %v14909_v61 = vld [vmem:[%s16106_s8 + $0x7c8] sm:$0xff] }
 0x110   : > { %9106 = vmatpush.bf16.msra.mxu2 %v14871_v62  ;;  %v2368_v62 = vld [vmem:[#allocation1 + $0x24] sm:$0xff] }
 0x111   : > { %9119 = vmatpush.bf16.msra.mxu3 %v14879_v63  ;;  %v2370_v63 = vld [vmem:[#allocation1 + $0x36] sm:$0xff] }
 0x112   : > { %9081 = vmatpush.bf16.msra.mxu0 %v14854_v4  ;;  %v272_v4 = vld [vmem:[%s16125_s27 + $0x20] sm:$0xff] }
 0x113   : > { %9094 = vmatpush.bf16.msra.mxu1 %v14862_v5  ;;  %2373 = vst [vmem:[#allocation1] ss:$9 sm:$0xff] %v272_v4  ;;  %v14884_v5 = vld [vmem:[%s16106_s8 + $0x700] sm:$0xff]  ;;  %v14977_v4 = vld [vmem:[%s16106_s8 + $0x9e8] sm:$0xff] }
 0x114   : > { %9107 = vmatpush.bf16.msra.mxu2 %v14870_v8  ;;  %v14908_v8 = vld [vmem:[%s16106_s8 + $0x7c0] sm:$0xff] }
 0x115   : > { %9120 = vmatpush.bf16.msra.mxu3 %v14878_v9  ;;  %v14923_v9 = vld [vmem:[%s16106_s8 + $0x838] sm:$0xff] }
 0x116   : > { %9082 = vmatpush.bf16.msra.mxu0 %v14853_v10  ;;  %v14931_v10 = vld [vmem:[%s16106_s8 + $0x878] sm:$0xff] }
 0x117   : > { %9095 = vmatpush.bf16.msra.mxu1 %v14861_v11  ;;  %v14939_v11 = vld [vmem:[%s16106_s8 + $0x8b8] sm:$0xff] }
 0x118   : > { %9108 = vmatpush.bf16.msra.mxu2 %v14869_v12  ;;  %v14947_v12 = vld [vmem:[%s16106_s8 + $0x8f8] sm:$0xff] }
 0x119   : > { %9121 = vmatpush.bf16.msra.mxu3 %v14877_v13  ;;  %v14922_v13 = vld [vmem:[%s16106_s8 + $0x830] sm:$0xff] }
 0x11a   : > { %9083 = vmatpush.bf16.msra.mxu0 %v14852_v16  ;;  %v8877_v36 = vpop.f32.mrf.mxu0  ;;  %v14946_v16 = vld [vmem:[%s16106_s8 + $0x8f0] sm:$0xff] }
 0x11b   : > { %9096 = vmatpush.bf16.msra.mxu1 %v14860_v17  ;;  %v8878_v37 = vadd.f32 %v8877_v36, %v8865_v6  ;;  %v8890_v40 = vpop.f32.mrf.mxu1  ;;  %v14892_v6 = vld [vmem:[%s16106_s8 + $0x740] sm:$0xff]  ;;  %v14921_v17 = vld [vmem:[%s16106_s8 + $0x828] sm:$0xff] }
 0x11c   : > { %9109 = vmatpush.bf16.msra.mxu2 %v14868_v18  ;;  %v14929_v18 = vld [vmem:[%s16106_s8 + $0x868] sm:$0xff] }
 0x11d   : > { %9122 = vmatpush.bf16.msra.mxu3 %v14876_v19  ;;  %9084 = vmatmul.bf16.vlgmr.msra.gmra.mxu0 %v2364_v24  ;;  %v8891_v43 = vadd.f32 %v8890_v40, %v8878_v37  ;;  %v14937_v19 = vld [vmem:[%s16106_s8 + $0x8a8] sm:$0xff]  ;;  %v14928_v24 = vld [vmem:[%s16106_s8 + $0x860] sm:$0xff] }
 0x11e   : > { %9128 = vmatpush.bf16.msrb.mxu0 %v14891_v20  ;;  %9097 = vmatmul.bf16.vlgmr.msra.gmra.mxu1 %v2365_v26  ;;  %v14945_v20 = vld [vmem:[%s16106_s8 + $0x8e8] sm:$0xff]  ;;  %v14936_v26 = vld [vmem:[%s16106_s8 + $0x8a0] sm:$0xff] }
 0x11f   : > { %9141 = vmatpush.bf16.msrb.mxu1 %v14899_v21  ;;  %9110 = vmatmul.bf16.vlgmr.msra.gmra.mxu2 %v2366_v25 }
 0x120   : > { %9154 = vmatpush.bf16.msrb.mxu2 %v14907_v22  ;;  %9123 = vmatmul.bf16.vlgmr.msra.gmra.mxu3 %v2367_v27  ;;  %v14944_v27 = vld [vmem:[%s16106_s8 + $0x8e0] sm:$0xff] }
 0x121   : > { %9167 = vmatpush.bf16.msrb.mxu3 %v14915_v23  ;;  %v14920_v23 = vld [vmem:[%s16106_s8 + $0x820] sm:$0xff] }
 0x122   : > { %9129 = vmatpush.bf16.msrb.mxu0 %v14890_v28  ;;  %v8903_v48 = vpop.f32.mrf.mxu2  ;;  %v8879_v51 = vpop.f32.mrf.mxu0 }
 0x123   : > { %9142 = vmatpush.bf16.msrb.mxu1 %v14898_v29  ;;  %v8904_v49 = vadd.f32 %v8903_v48, %v8891_v43  ;;  %v8916_v50 = vpop.f32.mrf.mxu3  ;;  %v8892_v55 = vpop.f32.mrf.mxu1  ;;  %v14919_v29 = vld [vmem:[%s16106_s8 + $0x818] sm:$0xff]  ;;  %v14917_v43 = vld [vmem:[%s16106_s8 + $0x808] sm:$0xff]  ;;  %v14932_v51 = vld [vmem:[%s16106_s8 + $0x880] sm:$0xff] }
 0x124   : > { %9155 = vmatpush.bf16.msrb.mxu2 %v14906_v30  ;;  %v14927_v30 = vld [vmem:[%s16106_s8 + $0x858] sm:$0xff] }
 0x125   : > { %9168 = vmatpush.bf16.msrb.mxu3 %v14914_v31  ;;  %v16384_v52 = vadd.f32 %v8916_v50, %v8904_v49  ;;  %v14935_v31 = vld [vmem:[%s16106_s8 + $0x898] sm:$0xff]  ;;  %v14916_v49 = vld [vmem:[%s16106_s8 + $0x800] sm:$0xff] }
 0x126   : > { %9130 = vmatpush.bf16.msrb.mxu0 %v14889_v32  ;;  %v14943_v32 = vld [vmem:[%s16106_s8 + $0x8d8] sm:$0xff]  ;;  %v14924_v50 = vld [vmem:[%s16106_s8 + $0x840] sm:$0xff] }
 0x127   : > { %9143 = vmatpush.bf16.msrb.mxu1 %v14897_v33  ;;  %v14971_v55 = vld [vmem:[%s16106_s8 + $0x9b8] sm:$0xff] }
 0x128   : > { %9156 = vmatpush.bf16.msrb.mxu2 %v14905_v34 }
 0x129   : > { %9169 = vmatpush.bf16.msrb.mxu3 %v14913_v35 }
 0x12a   : > { %9131 = vmatpush.bf16.msrb.mxu0 %v14888_v38  ;;  %v8905_v0 = vpop.f32.mrf.mxu2  ;;  %v14918_v38 = vld [vmem:[%s16106_s8 + $0x810] sm:$0xff] }
 0x12b   : > { %9144 = vmatpush.bf16.msrb.mxu1 %v14896_v39  ;;  %v8918_v3 = vpop.f32.mrf.mxu3  ;;  %v14926_v39 = vld [vmem:[%s16106_s8 + $0x850] sm:$0xff] }
 0x12c   : > { %9157 = vmatpush.bf16.msrb.mxu2 %v14904_v41  ;;  %v14934_v41 = vld [vmem:[%s16106_s8 + $0x890] sm:$0xff]  ;;  %v14969_v3 = vld [vmem:[%s16106_s8 + $0x9a8] sm:$0xff] }
 0x12d   : > { %9170 = vmatpush.bf16.msrb.mxu3 %v14912_v42  ;;  %v14942_v42 = vld [vmem:[%s16106_s8 + $0x8d0] sm:$0xff] }
 0x12e   : > { %9132 = vmatpush.bf16.msrb.mxu0 %v14887_v44  ;;  %v14925_v44 = vld [vmem:[%s16106_s8 + $0x848] sm:$0xff]  ;;  %v14978_v0 = vld [vmem:[%s16106_s8 + $0x9f0] sm:$0xff] }
 0x12f   : > { %9145 = vmatpush.bf16.msrb.mxu1 %v14895_v45  ;;  %v14933_v45 = vld [vmem:[%s16106_s8 + $0x888] sm:$0xff] }
 0x130   : > { %9158 = vmatpush.bf16.msrb.mxu2 %v14903_v46  ;;  %v14941_v46 = vld [vmem:[%s16106_s8 + $0x8c8] sm:$0xff] }
 0x131   : > { %9171 = vmatpush.bf16.msrb.mxu3 %v14911_v47 }
 0x132   : > { %9133 = vmatpush.bf16.msrb.mxu0 %v14886_v53  ;;  %v14955_v53 = vld [vmem:[%s16106_s8 + $0x938] sm:$0xff] }
 0x133   : > { %9146 = vmatpush.bf16.msrb.mxu1 %v14894_v54  ;;  %v14963_v54 = vld [vmem:[%s16106_s8 + $0x978] sm:$0xff] }
 0x134   : > { %9159 = vmatpush.bf16.msrb.mxu2 %v14902_v56  ;;  %v14979_v56 = vld [vmem:[%s16106_s8 + $0x9f8] sm:$0xff] }
 0x135   : > { %9172 = vmatpush.bf16.msrb.mxu3 %v14910_v57  ;;  %v2374_v57 = vld [vmem:[#allocation1] sm:$0xff] }
 0x136   : > { %9134 = vmatpush.bf16.msrb.mxu0 %v14885_v58  ;;  %v2376_v58 = vld [vmem:[#allocation1 + $0x12] sm:$0xff] }
 0x137   : > { %9147 = vmatpush.bf16.msrb.mxu1 %v14893_v59  ;;  %v2375_v59 = vld [vmem:[#allocation1 + $0x9] sm:$0xff] }
 0x138   : > { %9160 = vmatpush.bf16.msrb.mxu2 %v14901_v60  ;;  %v2377_v60 = vld [vmem:[#allocation1 + $0x1b] sm:$0xff] }
 0x139   : > { %9173 = vmatpush.bf16.msrb.mxu3 %v14909_v61  ;;  %v14954_v61 = vld [vmem:[%s16106_s8 + $0x930] sm:$0xff] }
 0x13a   : > { %9135 = vmatpush.bf16.msrb.mxu0 %v14884_v5  ;;  %v8929_v21 = vpop.f32.mrf.mxu0 }
 0x13b   : > { %9148 = vmatpush.bf16.msrb.mxu1 %v14892_v6  ;;  %v8930_v22 = vadd.f32 %v8929_v21, %v16384_v52  ;;  %v8942_v25 = vpop.f32.mrf.mxu1  ;;  %v14940_v52 = vld [vmem:[%s16106_s8 + $0x8c0] sm:$0xff] }
 0x13c   : > { %9161 = vmatpush.bf16.msrb.mxu2 %v14900_v7  ;;  %v14952_v7 = vld [vmem:[%s16106_s8 + $0x920] sm:$0xff] }
 0x13d   : > { %9174 = vmatpush.bf16.msrb.mxu3 %v14908_v8  ;;  %9136 = vmatmul.bf16.vlgmr.msrb.gmra.mxu0 %v2368_v62  ;;  %v8943_v28 = vadd.f32 %v8942_v25, %v8930_v22  ;;  %v14962_v62 = vld [vmem:[%s16106_s8 + $0x970] sm:$0xff]  ;;  %v14960_v8 = vld [vmem:[%s16106_s8 + $0x960] sm:$0xff] }
 0x13e   : > { %9180 = vmatpush.bf16.msra.mxu0 %v14923_v9  ;;  %9149 = vmatmul.bf16.vlgmr.msrb.gmra.mxu1 %v2369_v1  ;;  %v14953_v1 = vld [vmem:[%s16106_s8 + $0x928] sm:$0xff]  ;;  %v14950_v22 = vld [vmem:[%s16106_s8 + $0x910] sm:$0xff] }
 0x13f   : > { %9193 = vmatpush.bf16.msra.mxu1 %v14931_v10  ;;  %9162 = vmatmul.bf16.vlgmr.msrb.gmra.mxu2 %v2370_v63  ;;  %v14970_v63 = vld [vmem:[%s16106_s8 + $0x9b0] sm:$0xff]  ;;  %v14968_v10 = vld [vmem:[%s16106_s8 + $0x9a0] sm:$0xff] }
 0x140   : > { %9206 = vmatpush.bf16.msra.mxu2 %v14939_v11  ;;  %9175 = vmatmul.bf16.vlgmr.msrb.gmra.mxu3 %v2371_v2  ;;  %v14961_v2 = vld [vmem:[%s16106_s8 + $0x968] sm:$0xff]  ;;  %v14976_v11 = vld [vmem:[%s16106_s8 + $0x9e0] sm:$0xff]  ;;  %v14966_v25 = vld [vmem:[%s16106_s8 + $0x990] sm:$0xff] }
 0x141   : > { %9219 = vmatpush.bf16.msra.mxu3 %v14947_v12 }
 0x142   : > { %9181 = vmatpush.bf16.msra.mxu0 %v14922_v13  ;;  %v8955_v33 = vpop.f32.mrf.mxu2  ;;  %v8931_v36 = vpop.f32.mrf.mxu0  ;;  %v14951_v13 = vld [vmem:[%s16106_s8 + $0x918] sm:$0xff] }
 0x143   : > { %9194 = vmatpush.bf16.msra.mxu1 %v14930_v14  ;;  %v8956_v34 = vadd.f32 %v8955_v33, %v8943_v28  ;;  %v8968_v35 = vpop.f32.mrf.mxu3  ;;  %v8944_v40 = vpop.f32.mrf.mxu1  ;;  %v14959_v14 = vld [vmem:[%s16106_s8 + $0x958] sm:$0xff]  ;;  %v14957_v28 = vld [vmem:[%s16106_s8 + $0x948] sm:$0xff] }
 0x144   : > { %9207 = vmatpush.bf16.msra.mxu2 %v14938_v15  ;;  %v14967_v15 = vld [vmem:[%s16106_s8 + $0x998] sm:$0xff]  ;;  %v14964_v40 = vld [vmem:[%s16106_s8 + $0x980] sm:$0xff] }
 0x145   : > { %9220 = vmatpush.bf16.msra.mxu3 %v14946_v16  ;;  %v8969_v37 = vadd.f32 %v8968_v35, %v8956_v34  ;;  %v14975_v16 = vld [vmem:[%s16106_s8 + $0x9d8] sm:$0xff]  ;;  %v2379_v34 = vld [vmem:[#allocation1 + $0x2d] sm:$0xff] }
 0x146   : > { %9182 = vmatpush.bf16.msra.mxu0 %v14921_v17  ;;  %v2381_v35 = vld [vmem:[#allocation1 + $0x3f] sm:$0xff] }
 0x147   : > { %9195 = vmatpush.bf16.msra.mxu1 %v14929_v18 }
 0x148   : > { %9208 = vmatpush.bf16.msra.mxu2 %v14937_v19 }
 0x149   : > { %9221 = vmatpush.bf16.msra.mxu3 %v14945_v20 }
 0x14a   : > { %9183 = vmatpush.bf16.msra.mxu0 %v14920_v23  ;;  %v8957_v47 = vpop.f32.mrf.mxu2  ;;  %v14958_v23 = vld [vmem:[%s16106_s8 + $0x950] sm:$0xff] }
 0x14b   : > { %9196 = vmatpush.bf16.msra.mxu1 %v14928_v24  ;;  %v8970_v48 = vpop.f32.mrf.mxu3  ;;  %v14994_v47 = vld [vmem:[%s16106_s8 + $0xa70] sm:$0xff] }
 0x14c   : > { %9209 = vmatpush.bf16.msra.mxu2 %v14936_v26  ;;  %v14974_v26 = vld [vmem:[%s16106_s8 + $0x9d0] sm:$0xff] }
 0x14d   : > { %9222 = vmatpush.bf16.msra.mxu3 %v14944_v27  ;;  %v14949_v27 = vld [vmem:[%s16106_s8 + $0x908] sm:$0xff]  ;;  %v15002_v48 = vld [vmem:[%s16106_s8 + $0xab0] sm:$0xff] }
 0x14e   : > { %9184 = vmatpush.bf16.msra.mxu0 %v14919_v29  ;;  %v14965_v29 = vld [vmem:[%s16106_s8 + $0x988] sm:$0xff] }
 0x14f   : > { %9197 = vmatpush.bf16.msra.mxu1 %v14927_v30  ;;  %v14973_v30 = vld [vmem:[%s16106_s8 + $0x9c8] sm:$0xff] }
 0x150   : > { %9210 = vmatpush.bf16.msra.mxu2 %v14935_v31  ;;  %v2378_v31 = vld [vmem:[#allocation1 + $0x24] sm:$0xff] }
 0x151   : > { %9223 = vmatpush.bf16.msra.mxu3 %v14943_v32  ;;  %v2380_v32 = vld [vmem:[#allocation1 + $0x36] sm:$0xff] }
 0x152   : > { %9185 = vmatpush.bf16.msra.mxu0 %v14918_v38  ;;  %v14948_v38 = vld [vmem:[%s16106_s8 + $0x900] sm:$0xff] }
 0x153   : > { %9198 = vmatpush.bf16.msra.mxu1 %v14926_v39  ;;  %v14956_v39 = vld [vmem:[%s16106_s8 + $0x940] sm:$0xff] }
 0x154   : > { %9211 = vmatpush.bf16.msra.mxu2 %v14934_v41  ;;  %v14972_v41 = vld [vmem:[%s16106_s8 + $0x9c0] sm:$0xff] }
 0x155   : > { %9224 = vmatpush.bf16.msra.mxu3 %v14942_v42  ;;  %v14987_v42 = vld [vmem:[%s16106_s8 + $0xa38] sm:$0xff] }
 0x156   : > { %9186 = vmatpush.bf16.msra.mxu0 %v14917_v43  ;;  %v14995_v43 = vld [vmem:[%s16106_s8 + $0xa78] sm:$0xff] }
 0x157   : > { %9199 = vmatpush.bf16.msra.mxu1 %v14925_v44  ;;  %v15003_v44 = vld [vmem:[%s16106_s8 + $0xab8] sm:$0xff] }
 0x158   : > { %9212 = vmatpush.bf16.msra.mxu2 %v14933_v45  ;;  %v15011_v45 = vld [vmem:[%s16106_s8 + $0xaf8] sm:$0xff] }
 0x159   : > { %9225 = vmatpush.bf16.msra.mxu3 %v14941_v46  ;;  %v14986_v46 = vld [vmem:[%s16106_s8 + $0xa30] sm:$0xff] }
 0x15a   : > { %9187 = vmatpush.bf16.msra.mxu0 %v14916_v49  ;;  %v8981_v5 = vpop.f32.mrf.mxu0  ;;  %v15010_v49 = vld [vmem:[%s16106_s8 + $0xaf0] sm:$0xff] }
 0x15b   : > { %9200 = vmatpush.bf16.msra.mxu1 %v14924_v50  ;;  %v8982_v6 = vadd.f32 %v8981_v5, %v8969_v37  ;;  %v8994_v9 = vpop.f32.mrf.mxu1  ;;  %v273_v37 = vld [vmem:[%s16125_s27 + $0x28] sm:$0xff]  ;;  %v14985_v50 = vld [vmem:[%s16106_s8 + $0xa28] sm:$0xff] }
 0x15c   : > { %9213 = vmatpush.bf16.msra.mxu2 %v14932_v51  ;;  %2383 = vst [vmem:[#allocation1] ss:$9 sm:$0xff] %v273_v37  ;;  %v14993_v51 = vld [vmem:[%s16106_s8 + $0xa68] sm:$0xff] }
 0x15d   : > { %9226 = vmatpush.bf16.msra.mxu3 %v14940_v52  ;;  %9188 = vmatmul.bf16.vlgmr.msra.gmra.mxu0 %v2374_v57  ;;  %v8995_v12 = vadd.f32 %v8994_v9, %v8982_v6  ;;  %v15001_v52 = vld [vmem:[%s16106_s8 + $0xaa8] sm:$0xff]  ;;  %v14992_v57 = vld [vmem:[%s16106_s8 + $0xa60] sm:$0xff] }
 0x15e   : > { %9232 = vmatpush.bf16.msrb.mxu0 %v14955_v53  ;;  %9201 = vmatmul.bf16.vlgmr.msra.gmra.mxu1 %v2375_v59  ;;  %v15009_v53 = vld [vmem:[%s16106_s8 + $0xae8] sm:$0xff]  ;;  %v15000_v59 = vld [vmem:[%s16106_s8 + $0xaa0] sm:$0xff] }
 0x15f   : > { %9245 = vmatpush.bf16.msrb.mxu1 %v14963_v54  ;;  %9214 = vmatmul.bf16.vlgmr.msra.gmra.mxu2 %v2376_v58  ;;  %v15041_v37 = vld [vmem:[%s16106_s8 + $0xbe8] sm:$0xff] }
 0x160   : > { %9258 = vmatpush.bf16.msrb.mxu2 %v14971_v55  ;;  %9227 = vmatmul.bf16.vlgmr.msra.gmra.mxu3 %v2377_v60  ;;  %v15008_v60 = vld [vmem:[%s16106_s8 + $0xae0] sm:$0xff] }
 0x161   : > { %9271 = vmatpush.bf16.msrb.mxu3 %v14979_v56  ;;  %v14984_v56 = vld [vmem:[%s16106_s8 + $0xa20] sm:$0xff] }
 0x162   : > { %9233 = vmatpush.bf16.msrb.mxu0 %v14954_v61  ;;  %v9007_v17 = vpop.f32.mrf.mxu2  ;;  %v8983_v20 = vpop.f32.mrf.mxu0 }
 0x163   : > { %9246 = vmatpush.bf16.msrb.mxu1 %v14962_v62  ;;  %v9008_v18 = vadd.f32 %v9007_v17, %v8995_v12  ;;  %v9020_v19 = vpop.f32.mrf.mxu3  ;;  %v8996_v24 = vpop.f32.mrf.mxu1  ;;  %v14983_v62 = vld [vmem:[%s16106_s8 + $0xa18] sm:$0xff]  ;;  %v14981_v12 = vld [vmem:[%s16106_s8 + $0xa08] sm:$0xff]  ;;  %v14996_v20 = vld [vmem:[%s16106_s8 + $0xa80] sm:$0xff] }
 0x164   : > { %9259 = vmatpush.bf16.msrb.mxu2 %v14970_v63  ;;  %v14991_v63 = vld [vmem:[%s16106_s8 + $0xa58] sm:$0xff] }
 0x165   : > { %9272 = vmatpush.bf16.msrb.mxu3 %v14978_v0  ;;  %v16452_v21 = vadd.f32 %v9020_v19, %v9008_v18  ;;  %v14999_v0 = vld [vmem:[%s16106_s8 + $0xa98] sm:$0xff]  ;;  %v14980_v18 = vld [vmem:[%s16106_s8 + $0xa00] sm:$0xff] }
 0x166   : > { %9234 = vmatpush.bf16.msrb.mxu0 %v14953_v1  ;;  %v15007_v1 = vld [vmem:[%s16106_s8 + $0xad8] sm:$0xff]  ;;  %v14988_v19 = vld [vmem:[%s16106_s8 + $0xa40] sm:$0xff] }
 0x167   : > { %9247 = vmatpush.bf16.msrb.mxu1 %v14961_v2  ;;  %v15035_v24 = vld [vmem:[%s16106_s8 + $0xbb8] sm:$0xff] }
 0x168   : > { %9260 = vmatpush.bf16.msrb.mxu2 %v14969_v3 }
 0x169   : > { %9273 = vmatpush.bf16.msrb.mxu3 %v14977_v4 }
 0x16a   : > { %9235 = vmatpush.bf16.msrb.mxu0 %v14952_v7  ;;  %v9009_v33 = vpop.f32.mrf.mxu2  ;;  %v14982_v7 = vld [vmem:[%s16106_s8 + $0xa10] sm:$0xff] }
 0x16b   : > { %9248 = vmatpush.bf16.msrb.mxu1 %v14960_v8  ;;  %v9022_v36 = vpop.f32.mrf.mxu3  ;;  %v14990_v8 = vld [vmem:[%s16106_s8 + $0xa50] sm:$0xff] }
 0x16c   : > { %9261 = vmatpush.bf16.msrb.mxu2 %v14968_v10  ;;  %v14998_v10 = vld [vmem:[%s16106_s8 + $0xa90] sm:$0xff]  ;;  %v15033_v36 = vld [vmem:[%s16106_s8 + $0xba8] sm:$0xff] }
 0x16d   : > { %9274 = vmatpush.bf16.msrb.mxu3 %v14976_v11  ;;  %v15006_v11 = vld [vmem:[%s16106_s8 + $0xad0] sm:$0xff] }
 0x16e   : > { %9236 = vmatpush.bf16.msrb.mxu0 %v14951_v13  ;;  %v14989_v13 = vld [vmem:[%s16106_s8 + $0xa48] sm:$0xff]  ;;  %v15042_v33 = vld [vmem:[%s16106_s8 + $0xbf0] sm:$0xff] }
 0x16f   : > { %9249 = vmatpush.bf16.msrb.mxu1 %v14959_v14  ;;  %v14997_v14 = vld [vmem:[%s16106_s8 + $0xa88] sm:$0xff] }
 0x170   : > { %9262 = vmatpush.bf16.msrb.mxu2 %v14967_v15  ;;  %v15005_v15 = vld [vmem:[%s16106_s8 + $0xac8] sm:$0xff] }
 0x171   : > { %9275 = vmatpush.bf16.msrb.mxu3 %v14975_v16 }
 0x172   : > { %9237 = vmatpush.bf16.msrb.mxu0 %v14950_v22  ;;  %v15019_v22 = vld [vmem:[%s16106_s8 + $0xb38] sm:$0xff] }
 0x173   : > { %9250 = vmatpush.bf16.msrb.mxu1 %v14958_v23  ;;  %v15027_v23 = vld [vmem:[%s16106_s8 + $0xb78] sm:$0xff] }
 0x174   : > { %9263 = vmatpush.bf16.msrb.mxu2 %v14966_v25  ;;  %v15043_v25 = vld [vmem:[%s16106_s8 + $0xbf8] sm:$0xff] }
 0x175   : > { %9276 = vmatpush.bf16.msrb.mxu3 %v14974_v26  ;;  %v2384_v26 = vld [vmem:[#allocation1] sm:$0xff] }
 0x176   : > { %9238 = vmatpush.bf16.msrb.mxu0 %v14949_v27  ;;  %v2386_v27 = vld [vmem:[#allocation1 + $0x12] sm:$0xff] }
 0x177   : > { %9251 = vmatpush.bf16.msrb.mxu1 %v14957_v28  ;;  %v2385_v28 = vld [vmem:[#allocation1 + $0x9] sm:$0xff] }
 0x178   : > { %9264 = vmatpush.bf16.msrb.mxu2 %v14965_v29  ;;  %v2387_v29 = vld [vmem:[#allocation1 + $0x1b] sm:$0xff] }
 0x179   : > { %9277 = vmatpush.bf16.msrb.mxu3 %v14973_v30  ;;  %v15018_v30 = vld [vmem:[%s16106_s8 + $0xb30] sm:$0xff] }
 0x17a   : > { %9239 = vmatpush.bf16.msrb.mxu0 %v14948_v38  ;;  %v9033_v54 = vpop.f32.mrf.mxu0 }
 0x17b   : > { %9252 = vmatpush.bf16.msrb.mxu1 %v14956_v39  ;;  %v9034_v55 = vadd.f32 %v9033_v54, %v16452_v21  ;;  %v9046_v58 = vpop.f32.mrf.mxu1  ;;  %v15004_v21 = vld [vmem:[%s16106_s8 + $0xac0] sm:$0xff] }
 0x17c   : > { %9265 = vmatpush.bf16.msrb.mxu2 %v14964_v40  ;;  %v15016_v40 = vld [vmem:[%s16106_s8 + $0xb20] sm:$0xff] }
 0x17d   : > { %9278 = vmatpush.bf16.msrb.mxu3 %v14972_v41  ;;  %9240 = vmatmul.bf16.vlgmr.msrb.gmra.mxu0 %v2378_v31  ;;  %v9047_v61 = vadd.f32 %v9046_v58, %v9034_v55  ;;  %v15026_v31 = vld [vmem:[%s16106_s8 + $0xb70] sm:$0xff]  ;;  %v15024_v41 = vld [vmem:[%s16106_s8 + $0xb60] sm:$0xff] }
 0x17e   : > { %9284 = vmatpush.bf16.msra.mxu0 %v14987_v42  ;;  %9253 = vmatmul.bf16.vlgmr.msrb.gmra.mxu1 %v2379_v34  ;;  %v15017_v34 = vld [vmem:[%s16106_s8 + $0xb28] sm:$0xff]  ;;  %v15014_v55 = vld [vmem:[%s16106_s8 + $0xb10] sm:$0xff] }
 0x17f   : > { %9297 = vmatpush.bf16.msra.mxu1 %v14995_v43  ;;  %9266 = vmatmul.bf16.vlgmr.msrb.gmra.mxu2 %v2380_v32  ;;  %v15034_v32 = vld [vmem:[%s16106_s8 + $0xbb0] sm:$0xff]  ;;  %v15032_v43 = vld [vmem:[%s16106_s8 + $0xba0] sm:$0xff] }
 0x180   : > { %9310 = vmatpush.bf16.msra.mxu2 %v15003_v44  ;;  %9279 = vmatmul.bf16.vlgmr.msrb.gmra.mxu3 %v2381_v35  ;;  %v15025_v35 = vld [vmem:[%s16106_s8 + $0xb68] sm:$0xff]  ;;  %v15040_v44 = vld [vmem:[%s16106_s8 + $0xbe0] sm:$0xff]  ;;  %v15030_v58 = vld [vmem:[%s16106_s8 + $0xb90] sm:$0xff] }
 0x181   : > { %9323 = vmatpush.bf16.msra.mxu3 %v15011_v45 }
 0x182   : > { %9285 = vmatpush.bf16.msra.mxu0 %v14986_v46  ;;  %v9059_v2 = vpop.f32.mrf.mxu2  ;;  %v9035_v5 = vpop.f32.mrf.mxu0  ;;  %v15015_v46 = vld [vmem:[%s16106_s8 + $0xb18] sm:$0xff] }
 0x183   : > { %9298 = vmatpush.bf16.msra.mxu1 %v14994_v47  ;;  %v9060_v3 = vadd.f32 %v9059_v2, %v9047_v61  ;;  %v9072_v4 = vpop.f32.mrf.mxu3  ;;  %v9048_v9 = vpop.f32.mrf.mxu1  ;;  %v15023_v47 = vld [vmem:[%s16106_s8 + $0xb58] sm:$0xff]  ;;  %v15021_v61 = vld [vmem:[%s16106_s8 + $0xb48] sm:$0xff] }
 0x184   : > { %9311 = vmatpush.bf16.msra.mxu2 %v15002_v48  ;;  %v15031_v48 = vld [vmem:[%s16106_s8 + $0xb98] sm:$0xff]  ;;  %v15028_v9 = vld [vmem:[%s16106_s8 + $0xb80] sm:$0xff] }
 0x185   : > { %9324 = vmatpush.bf16.msra.mxu3 %v15010_v49  ;;  %v9073_v6 = vadd.f32 %v9072_v4, %v9060_v3  ;;  %v15039_v49 = vld [vmem:[%s16106_s8 + $0xbd8] sm:$0xff]  ;;  %v2389_v3 = vld [vmem:[#allocation1 + $0x2d] sm:$0xff] }
 0x186   : > { %9286 = vmatpush.bf16.msra.mxu0 %v14985_v50  ;;  %v2391_v4 = vld [vmem:[#allocation1 + $0x3f] sm:$0xff] }
 0x187   : > { %9299 = vmatpush.bf16.msra.mxu1 %v14993_v51 }
 0x188   : > { %9312 = vmatpush.bf16.msra.mxu2 %v15001_v52 }
 0x189   : > { %9325 = vmatpush.bf16.msra.mxu3 %v15009_v53 }
 0x18a   : > { %9287 = vmatpush.bf16.msra.mxu0 %v14984_v56  ;;  %v9061_v16 = vpop.f32.mrf.mxu2  ;;  %v15022_v56 = vld [vmem:[%s16106_s8 + $0xb50] sm:$0xff] }
 0x18b   : > { %9300 = vmatpush.bf16.msra.mxu1 %v14992_v57  ;;  %v9074_v17 = vpop.f32.mrf.mxu3  ;;  %v15058_v16 = vld [vmem:[%s16106_s8 + $0xc70] sm:$0xff] }
 0x18c   : > { %9313 = vmatpush.bf16.msra.mxu2 %v15000_v59  ;;  %v15038_v59 = vld [vmem:[%s16106_s8 + $0xbd0] sm:$0xff] }
 0x18d   : > { %9326 = vmatpush.bf16.msra.mxu3 %v15008_v60  ;;  %v15013_v60 = vld [vmem:[%s16106_s8 + $0xb08] sm:$0xff]  ;;  %v15066_v17 = vld [vmem:[%s16106_s8 + $0xcb0] sm:$0xff] }
 0x18e   : > { %9288 = vmatpush.bf16.msra.mxu0 %v14983_v62  ;;  %v15029_v62 = vld [vmem:[%s16106_s8 + $0xb88] sm:$0xff] }
 0x18f   : > { %9301 = vmatpush.bf16.msra.mxu1 %v14991_v63  ;;  %v15037_v63 = vld [vmem:[%s16106_s8 + $0xbc8] sm:$0xff] }
 0x190   : > { %9314 = vmatpush.bf16.msra.mxu2 %v14999_v0  ;;  %v2388_v0 = vld [vmem:[#allocation1 + $0x24] sm:$0xff] }
 0x191   : > { %9327 = vmatpush.bf16.msra.mxu3 %v15007_v1  ;;  %v2390_v1 = vld [vmem:[#allocation1 + $0x36] sm:$0xff] }
 0x192   : > { %9289 = vmatpush.bf16.msra.mxu0 %v14982_v7  ;;  %v15012_v7 = vld [vmem:[%s16106_s8 + $0xb00] sm:$0xff] }
 0x193   : > { %9302 = vmatpush.bf16.msra.mxu1 %v14990_v8  ;;  %v15020_v8 = vld [vmem:[%s16106_s8 + $0xb40] sm:$0xff] }
 0x194   : > { %9315 = vmatpush.bf16.msra.mxu2 %v14998_v10  ;;  %v15036_v10 = vld [vmem:[%s16106_s8 + $0xbc0] sm:$0xff] }
 0x195   : > { %9328 = vmatpush.bf16.msra.mxu3 %v15006_v11  ;;  %v15051_v11 = vld [vmem:[%s16106_s8 + $0xc38] sm:$0xff] }
 0x196   : > { %9290 = vmatpush.bf16.msra.mxu0 %v14981_v12  ;;  %v15059_v12 = vld [vmem:[%s16106_s8 + $0xc78] sm:$0xff] }
 0x197   : > { %9303 = vmatpush.bf16.msra.mxu1 %v14989_v13  ;;  %v15067_v13 = vld [vmem:[%s16106_s8 + $0xcb8] sm:$0xff] }
 0x198   : > { %9316 = vmatpush.bf16.msra.mxu2 %v14997_v14  ;;  %v15075_v14 = vld [vmem:[%s16106_s8 + $0xcf8] sm:$0xff] }
 0x199   : > { %9329 = vmatpush.bf16.msra.mxu3 %v15005_v15  ;;  %v15050_v15 = vld [vmem:[%s16106_s8 + $0xc30] sm:$0xff] }
 0x19a   : > { %9291 = vmatpush.bf16.msra.mxu0 %v14980_v18  ;;  %v9085_v38 = vpop.f32.mrf.mxu0  ;;  %v15074_v18 = vld [vmem:[%s16106_s8 + $0xcf0] sm:$0xff] }
 0x19b   : > { %9304 = vmatpush.bf16.msra.mxu1 %v14988_v19  ;;  %v9086_v39 = vadd.f32 %v9085_v38, %v9073_v6  ;;  %v9098_v42 = vpop.f32.mrf.mxu1  ;;  %v274_v6 = vld [vmem:[%s16125_s27 + $0x30] sm:$0xff] }
 0x19c   : > { %9317 = vmatpush.bf16.msra.mxu2 %v14996_v20  ;;  %2393 = vst [vmem:[#allocation1] ss:$9 sm:$0xff] %v274_v6  ;;  %v15049_v19 = vld [vmem:[%s16106_s8 + $0xc28] sm:$0xff] }
 0x19d   : > { %9330 = vmatpush.bf16.msra.mxu3 %v15004_v21  ;;  %9292 = vmatmul.bf16.vlgmr.msra.gmra.mxu0 %v2384_v26  ;;  %v9099_v45 = vadd.f32 %v9098_v42, %v9086_v39  ;;  %v15057_v20 = vld [vmem:[%s16106_s8 + $0xc68] sm:$0xff]  ;;  %v15056_v26 = vld [vmem:[%s16106_s8 + $0xc60] sm:$0xff] }
 0x19e   : > { %9336 = vmatpush.bf16.msrb.mxu0 %v15019_v22  ;;  %9305 = vmatmul.bf16.vlgmr.msra.gmra.mxu1 %v2385_v28  ;;  %v15065_v21 = vld [vmem:[%s16106_s8 + $0xca8] sm:$0xff]  ;;  %v15064_v28 = vld [vmem:[%s16106_s8 + $0xca0] sm:$0xff] }
 0x19f   : > { %9349 = vmatpush.bf16.msrb.mxu1 %v15027_v23  ;;  %9318 = vmatmul.bf16.vlgmr.msra.gmra.mxu2 %v2386_v27  ;;  %v15073_v22 = vld [vmem:[%s16106_s8 + $0xce8] sm:$0xff] }
 0x1a0   : > { %9362 = vmatpush.bf16.msrb.mxu2 %v15035_v24  ;;  %9331 = vmatmul.bf16.vlgmr.msra.gmra.mxu3 %v2387_v29  ;;  %v15072_v29 = vld [vmem:[%s16106_s8 + $0xce0] sm:$0xff]  ;;  %v15105_v6 = vld [vmem:[%s16106_s8 + $0xde8] sm:$0xff] }
 0x1a1   : > { %9375 = vmatpush.bf16.msrb.mxu3 %v15043_v25  ;;  %v15048_v25 = vld [vmem:[%s16106_s8 + $0xc20] sm:$0xff] }
 0x1a2   : > { %9337 = vmatpush.bf16.msrb.mxu0 %v15018_v30  ;;  %v9111_v50 = vpop.f32.mrf.mxu2  ;;  %v9087_v53 = vpop.f32.mrf.mxu0 }
 0x1a3   : > { %9350 = vmatpush.bf16.msrb.mxu1 %v15026_v31  ;;  %v9112_v51 = vadd.f32 %v9111_v50, %v9099_v45  ;;  %v9124_v52 = vpop.f32.mrf.mxu3  ;;  %v9100_v57 = vpop.f32.mrf.mxu1  ;;  %v15047_v31 = vld [vmem:[%s16106_s8 + $0xc18] sm:$0xff]  ;;  %v15045_v45 = vld [vmem:[%s16106_s8 + $0xc08] sm:$0xff]  ;;  %v15060_v53 = vld [vmem:[%s16106_s8 + $0xc80] sm:$0xff] }
 0x1a4   : > { %9363 = vmatpush.bf16.msrb.mxu2 %v15034_v32  ;;  %v15055_v32 = vld [vmem:[%s16106_s8 + $0xc58] sm:$0xff] }
 0x1a5   : > { %9376 = vmatpush.bf16.msrb.mxu3 %v15042_v33  ;;  %v16520_v54 = vadd.f32 %v9124_v52, %v9112_v51  ;;  %v15063_v33 = vld [vmem:[%s16106_s8 + $0xc98] sm:$0xff]  ;;  %v15044_v51 = vld [vmem:[%s16106_s8 + $0xc00] sm:$0xff] }
 0x1a6   : > { %9338 = vmatpush.bf16.msrb.mxu0 %v15017_v34  ;;  %v15071_v34 = vld [vmem:[%s16106_s8 + $0xcd8] sm:$0xff]  ;;  %v15052_v52 = vld [vmem:[%s16106_s8 + $0xc40] sm:$0xff] }
 0x1a7   : > { %9351 = vmatpush.bf16.msrb.mxu1 %v15025_v35  ;;  %v15099_v57 = vld [vmem:[%s16106_s8 + $0xdb8] sm:$0xff] }
 0x1a8   : > { %9364 = vmatpush.bf16.msrb.mxu2 %v15033_v36 }
 0x1a9   : > { %9377 = vmatpush.bf16.msrb.mxu3 %v15041_v37 }
 0x1aa   : > { %9339 = vmatpush.bf16.msrb.mxu0 %v15016_v40  ;;  %v9113_v2 = vpop.f32.mrf.mxu2  ;;  %v15046_v40 = vld [vmem:[%s16106_s8 + $0xc10] sm:$0xff] }
 0x1ab   : > { %9352 = vmatpush.bf16.msrb.mxu1 %v15024_v41  ;;  %v9126_v5 = vpop.f32.mrf.mxu3  ;;  %v15054_v41 = vld [vmem:[%s16106_s8 + $0xc50] sm:$0xff] }
 0x1ac   : > { %9365 = vmatpush.bf16.msrb.mxu2 %v15032_v43  ;;  %v15062_v43 = vld [vmem:[%s16106_s8 + $0xc90] sm:$0xff]  ;;  %v15097_v5 = vld [vmem:[%s16106_s8 + $0xda8] sm:$0xff] }
 0x1ad   : > { %9378 = vmatpush.bf16.msrb.mxu3 %v15040_v44  ;;  %v15070_v44 = vld [vmem:[%s16106_s8 + $0xcd0] sm:$0xff] }
 0x1ae   : > { %9340 = vmatpush.bf16.msrb.mxu0 %v15015_v46  ;;  %v15053_v46 = vld [vmem:[%s16106_s8 + $0xc48] sm:$0xff]  ;;  %v15106_v2 = vld [vmem:[%s16106_s8 + $0xdf0] sm:$0xff] }
 0x1af   : > { %9353 = vmatpush.bf16.msrb.mxu1 %v15023_v47  ;;  %v15061_v47 = vld [vmem:[%s16106_s8 + $0xc88] sm:$0xff] }
 0x1b0   : > { %9366 = vmatpush.bf16.msrb.mxu2 %v15031_v48  ;;  %v15069_v48 = vld [vmem:[%s16106_s8 + $0xcc8] sm:$0xff] }
 0x1b1   : > { %9379 = vmatpush.bf16.msrb.mxu3 %v15039_v49 }
 0x1b2   : > { %9341 = vmatpush.bf16.msrb.mxu0 %v15014_v55  ;;  %v15083_v55 = vld [vmem:[%s16106_s8 + $0xd38] sm:$0xff] }
 0x1b3   : > { %9354 = vmatpush.bf16.msrb.mxu1 %v15022_v56  ;;  %v15091_v56 = vld [vmem:[%s16106_s8 + $0xd78] sm:$0xff] }
 0x1b4   : > { %9367 = vmatpush.bf16.msrb.mxu2 %v15030_v58  ;;  %v15107_v58 = vld [vmem:[%s16106_s8 + $0xdf8] sm:$0xff] }
 0x1b5   : > { %9380 = vmatpush.bf16.msrb.mxu3 %v15038_v59  ;;  %v2394_v59 = vld [vmem:[#allocation1] sm:$0xff] }
 0x1b6   : > { %9342 = vmatpush.bf16.msrb.mxu0 %v15013_v60  ;;  %v2396_v60 = vld [vmem:[#allocation1 + $0x12] sm:$0xff] }
 0x1b7   : > { %9355 = vmatpush.bf16.msrb.mxu1 %v15021_v61  ;;  %v2395_v61 = vld [vmem:[#allocation1 + $0x9] sm:$0xff] }
 0x1b8   : > { %9368 = vmatpush.bf16.msrb.mxu2 %v15029_v62  ;;  %v2397_v62 = vld [vmem:[#allocation1 + $0x1b] sm:$0xff] }
 0x1b9   : > { %9381 = vmatpush.bf16.msrb.mxu3 %v15037_v63  ;;  %v15082_v63 = vld [vmem:[%s16106_s8 + $0xd30] sm:$0xff] }
 0x1ba   : > { %9343 = vmatpush.bf16.msrb.mxu0 %v15012_v7  ;;  %v9137_v23 = vpop.f32.mrf.mxu0 }
 0x1bb   : > { %9356 = vmatpush.bf16.msrb.mxu1 %v15020_v8  ;;  %v9138_v24 = vadd.f32 %v9137_v23, %v16520_v54  ;;  %v9150_v27 = vpop.f32.mrf.mxu1  ;;  %v15068_v54 = vld [vmem:[%s16106_s8 + $0xcc0] sm:$0xff] }
 0x1bc   : > { %9369 = vmatpush.bf16.msrb.mxu2 %v15028_v9  ;;  %v15080_v9 = vld [vmem:[%s16106_s8 + $0xd20] sm:$0xff] }
 0x1bd   : > { %9382 = vmatpush.bf16.msrb.mxu3 %v15036_v10  ;;  %9344 = vmatmul.bf16.vlgmr.msrb.gmra.mxu0 %v2388_v0  ;;  %v9151_v30 = vadd.f32 %v9150_v27, %v9138_v24  ;;  %v15090_v0 = vld [vmem:[%s16106_s8 + $0xd70] sm:$0xff]  ;;  %v15088_v10 = vld [vmem:[%s16106_s8 + $0xd60] sm:$0xff] }
 0x1be   : > { %9388 = vmatpush.bf16.msra.mxu0 %v15051_v11  ;;  %9357 = vmatmul.bf16.vlgmr.msrb.gmra.mxu1 %v2389_v3  ;;  %v15081_v3 = vld [vmem:[%s16106_s8 + $0xd28] sm:$0xff]  ;;  %v15078_v24 = vld [vmem:[%s16106_s8 + $0xd10] sm:$0xff] }
 0x1bf   : > { %9401 = vmatpush.bf16.msra.mxu1 %v15059_v12  ;;  %9370 = vmatmul.bf16.vlgmr.msrb.gmra.mxu2 %v2390_v1  ;;  %v15098_v1 = vld [vmem:[%s16106_s8 + $0xdb0] sm:$0xff]  ;;  %v15096_v12 = vld [vmem:[%s16106_s8 + $0xda0] sm:$0xff] }
 0x1c0   : > { %9414 = vmatpush.bf16.msra.mxu2 %v15067_v13  ;;  %9383 = vmatmul.bf16.vlgmr.msrb.gmra.mxu3 %v2391_v4  ;;  %v15089_v4 = vld [vmem:[%s16106_s8 + $0xd68] sm:$0xff]  ;;  %v15104_v13 = vld [vmem:[%s16106_s8 + $0xde0] sm:$0xff]  ;;  %v15094_v27 = vld [vmem:[%s16106_s8 + $0xd90] sm:$0xff] }
 0x1c1   : > { %9427 = vmatpush.bf16.msra.mxu3 %v15075_v14 }
 0x1c2   : > { %9389 = vmatpush.bf16.msra.mxu0 %v15050_v15  ;;  %v9163_v35 = vpop.f32.mrf.mxu2  ;;  %v9139_v38 = vpop.f32.mrf.mxu0  ;;  %v15079_v15 = vld [vmem:[%s16106_s8 + $0xd18] sm:$0xff] }
 0x1c3   : > { %9402 = vmatpush.bf16.msra.mxu1 %v15058_v16  ;;  %v9164_v36 = vadd.f32 %v9163_v35, %v9151_v30  ;;  %v9176_v37 = vpop.f32.mrf.mxu3  ;;  %v9152_v42 = vpop.f32.mrf.mxu1  ;;  %v15087_v16 = vld [vmem:[%s16106_s8 + $0xd58] sm:$0xff]  ;;  %v15085_v30 = vld [vmem:[%s16106_s8 + $0xd48] sm:$0xff] }
 0x1c4   : > { %9415 = vmatpush.bf16.msra.mxu2 %v15066_v17  ;;  %v15095_v17 = vld [vmem:[%s16106_s8 + $0xd98] sm:$0xff]  ;;  %v15092_v42 = vld [vmem:[%s16106_s8 + $0xd80] sm:$0xff] }
 0x1c5   : > { %9428 = vmatpush.bf16.msra.mxu3 %v15074_v18  ;;  %v9177_v39 = vadd.f32 %v9176_v37, %v9164_v36  ;;  %v15103_v18 = vld [vmem:[%s16106_s8 + $0xdd8] sm:$0xff]  ;;  %v2399_v36 = vld [vmem:[#allocation1 + $0x2d] sm:$0xff] }
 0x1c6   : > { %9390 = vmatpush.bf16.msra.mxu0 %v15049_v19  ;;  %v2401_v37 = vld [vmem:[#allocation1 + $0x3f] sm:$0xff] }
 0x1c7   : > { %9403 = vmatpush.bf16.msra.mxu1 %v15057_v20 }
 0x1c8   : > { %9416 = vmatpush.bf16.msra.mxu2 %v15065_v21 }
 0x1c9   : > { %9429 = vmatpush.bf16.msra.mxu3 %v15073_v22 }
 0x1ca   : > { %9391 = vmatpush.bf16.msra.mxu0 %v15048_v25  ;;  %v9165_v49 = vpop.f32.mrf.mxu2  ;;  %v15086_v25 = vld [vmem:[%s16106_s8 + $0xd50] sm:$0xff] }
 0x1cb   : > { %9404 = vmatpush.bf16.msra.mxu1 %v15056_v26  ;;  %v9178_v50 = vpop.f32.mrf.mxu3  ;;  %v15122_v49 = vld [vmem:[%s16106_s8 + $0xe70] sm:$0xff] }
 0x1cc   : > { %9417 = vmatpush.bf16.msra.mxu2 %v15064_v28  ;;  %v15102_v28 = vld [vmem:[%s16106_s8 + $0xdd0] sm:$0xff] }
 0x1cd   : > { %9430 = vmatpush.bf16.msra.mxu3 %v15072_v29  ;;  %v15077_v29 = vld [vmem:[%s16106_s8 + $0xd08] sm:$0xff]  ;;  %v15130_v50 = vld [vmem:[%s16106_s8 + $0xeb0] sm:$0xff] }
 0x1ce   : > { %9392 = vmatpush.bf16.msra.mxu0 %v15047_v31  ;;  %v15093_v31 = vld [vmem:[%s16106_s8 + $0xd88] sm:$0xff] }
 0x1cf   : > { %9405 = vmatpush.bf16.msra.mxu1 %v15055_v32  ;;  %v15101_v32 = vld [vmem:[%s16106_s8 + $0xdc8] sm:$0xff] }
 0x1d0   : > { %9418 = vmatpush.bf16.msra.mxu2 %v15063_v33  ;;  %v2398_v33 = vld [vmem:[#allocation1 + $0x24] sm:$0xff] }
 0x1d1   : > { %9431 = vmatpush.bf16.msra.mxu3 %v15071_v34  ;;  %v2400_v34 = vld [vmem:[#allocation1 + $0x36] sm:$0xff] }
 0x1d2   : > { %9393 = vmatpush.bf16.msra.mxu0 %v15046_v40  ;;  %v15076_v40 = vld [vmem:[%s16106_s8 + $0xd00] sm:$0xff] }
 0x1d3   : > { %9406 = vmatpush.bf16.msra.mxu1 %v15054_v41  ;;  %v15084_v41 = vld [vmem:[%s16106_s8 + $0xd40] sm:$0xff] }
 0x1d4   : > { %9419 = vmatpush.bf16.msra.mxu2 %v15062_v43  ;;  %v15100_v43 = vld [vmem:[%s16106_s8 + $0xdc0] sm:$0xff] }
 0x1d5   : > { %9432 = vmatpush.bf16.msra.mxu3 %v15070_v44  ;;  %v15115_v44 = vld [vmem:[%s16106_s8 + $0xe38] sm:$0xff] }
 0x1d6   : > { %9394 = vmatpush.bf16.msra.mxu0 %v15045_v45  ;;  %v15123_v45 = vld [vmem:[%s16106_s8 + $0xe78] sm:$0xff] }
 0x1d7   : > { %9407 = vmatpush.bf16.msra.mxu1 %v15053_v46  ;;  %v15131_v46 = vld [vmem:[%s16106_s8 + $0xeb8] sm:$0xff] }
 0x1d8   : > { %9420 = vmatpush.bf16.msra.mxu2 %v15061_v47  ;;  %v15139_v47 = vld [vmem:[%s16106_s8 + $0xef8] sm:$0xff] }
 0x1d9   : > { %9433 = vmatpush.bf16.msra.mxu3 %v15069_v48  ;;  %v15114_v48 = vld [vmem:[%s16106_s8 + $0xe30] sm:$0xff] }
 0x1da   : > { %9395 = vmatpush.bf16.msra.mxu0 %v15044_v51  ;;  %v9189_v7 = vpop.f32.mrf.mxu0  ;;  %v15138_v51 = vld [vmem:[%s16106_s8 + $0xef0] sm:$0xff] }
 0x1db   : > { %9408 = vmatpush.bf16.msra.mxu1 %v15052_v52  ;;  %v9190_v8 = vadd.f32 %v9189_v7, %v9177_v39  ;;  %v9202_v11 = vpop.f32.mrf.mxu1  ;;  %v275_v39 = vld [vmem:[%s16125_s27 + $0x38] sm:$0xff] }
 0x1dc   : > { %9421 = vmatpush.bf16.msra.mxu2 %v15060_v53  ;;  %2403 = vst [vmem:[#allocation1] ss:$9 sm:$0xff] %v275_v39  ;;  %v15113_v52 = vld [vmem:[%s16106_s8 + $0xe28] sm:$0xff] }
 0x1dd   : > { %9434 = vmatpush.bf16.msra.mxu3 %v15068_v54  ;;  %9396 = vmatmul.bf16.vlgmr.msra.gmra.mxu0 %v2394_v59  ;;  %v9203_v14 = vadd.f32 %v9202_v11, %v9190_v8  ;;  %v15121_v53 = vld [vmem:[%s16106_s8 + $0xe68] sm:$0xff]  ;;  %v15120_v59 = vld [vmem:[%s16106_s8 + $0xe60] sm:$0xff] }
 0x1de   : > { %9440 = vmatpush.bf16.msrb.mxu0 %v15083_v55  ;;  %9409 = vmatmul.bf16.vlgmr.msra.gmra.mxu1 %v2395_v61  ;;  %v15129_v54 = vld [vmem:[%s16106_s8 + $0xea8] sm:$0xff]  ;;  %v15128_v61 = vld [vmem:[%s16106_s8 + $0xea0] sm:$0xff] }
 0x1df   : > { %9453 = vmatpush.bf16.msrb.mxu1 %v15091_v56  ;;  %9422 = vmatmul.bf16.vlgmr.msra.gmra.mxu2 %v2396_v60  ;;  %v15137_v55 = vld [vmem:[%s16106_s8 + $0xee8] sm:$0xff] }
 0x1e0   : > { %9466 = vmatpush.bf16.msrb.mxu2 %v15099_v57  ;;  %9435 = vmatmul.bf16.vlgmr.msra.gmra.mxu3 %v2397_v62  ;;  %v15136_v62 = vld [vmem:[%s16106_s8 + $0xee0] sm:$0xff]  ;;  %v15169_v39 = vld [vmem:[%s16106_s8 + $0xfe8] sm:$0xff] }
 0x1e1   : > { %9479 = vmatpush.bf16.msrb.mxu3 %v15107_v58  ;;  %v15112_v58 = vld [vmem:[%s16106_s8 + $0xe20] sm:$0xff] }
 0x1e2   : > { %9441 = vmatpush.bf16.msrb.mxu0 %v15082_v63  ;;  %v9215_v19 = vpop.f32.mrf.mxu2  ;;  %v9191_v22 = vpop.f32.mrf.mxu0 }
 0x1e3   : > { %9454 = vmatpush.bf16.msrb.mxu1 %v15090_v0  ;;  %v9216_v20 = vadd.f32 %v9215_v19, %v9203_v14  ;;  %v9228_v21 = vpop.f32.mrf.mxu3  ;;  %v9204_v26 = vpop.f32.mrf.mxu1  ;;  %v15111_v0 = vld [vmem:[%s16106_s8 + $0xe18] sm:$0xff]  ;;  %v15109_v14 = vld [vmem:[%s16106_s8 + $0xe08] sm:$0xff]  ;;  %v15124_v22 = vld [vmem:[%s16106_s8 + $0xe80] sm:$0xff] }
 0x1e4   : > { %9467 = vmatpush.bf16.msrb.mxu2 %v15098_v1  ;;  %v15119_v1 = vld [vmem:[%s16106_s8 + $0xe58] sm:$0xff] }
 0x1e5   : > { %9480 = vmatpush.bf16.msrb.mxu3 %v15106_v2  ;;  %v16588_v23 = vadd.f32 %v9228_v21, %v9216_v20  ;;  %v15127_v2 = vld [vmem:[%s16106_s8 + $0xe98] sm:$0xff]  ;;  %v15108_v20 = vld [vmem:[%s16106_s8 + $0xe00] sm:$0xff] }
 0x1e6   : > { %9442 = vmatpush.bf16.msrb.mxu0 %v15081_v3  ;;  %v15135_v3 = vld [vmem:[%s16106_s8 + $0xed8] sm:$0xff]  ;;  %v15116_v21 = vld [vmem:[%s16106_s8 + $0xe40] sm:$0xff] }
 0x1e7   : > { %9455 = vmatpush.bf16.msrb.mxu1 %v15089_v4  ;;  %v15163_v26 = vld [vmem:[%s16106_s8 + $0xfb8] sm:$0xff] }
 0x1e8   : > { %9468 = vmatpush.bf16.msrb.mxu2 %v15097_v5 }
 0x1e9   : > { %9481 = vmatpush.bf16.msrb.mxu3 %v15105_v6 }
 0x1ea   : > { %9443 = vmatpush.bf16.msrb.mxu0 %v15080_v9  ;;  %v9217_v35 = vpop.f32.mrf.mxu2  ;;  %v15110_v9 = vld [vmem:[%s16106_s8 + $0xe10] sm:$0xff] }
 0x1eb   : > { %9456 = vmatpush.bf16.msrb.mxu1 %v15088_v10  ;;  %v9230_v38 = vpop.f32.mrf.mxu3  ;;  %v15118_v10 = vld [vmem:[%s16106_s8 + $0xe50] sm:$0xff] }
 0x1ec   : > { %9469 = vmatpush.bf16.msrb.mxu2 %v15096_v12  ;;  %v15126_v12 = vld [vmem:[%s16106_s8 + $0xe90] sm:$0xff]  ;;  %v15161_v38 = vld [vmem:[%s16106_s8 + $0xfa8] sm:$0xff] }
 0x1ed   : > { %9482 = vmatpush.bf16.msrb.mxu3 %v15104_v13  ;;  %v15134_v13 = vld [vmem:[%s16106_s8 + $0xed0] sm:$0xff] }
 0x1ee   : > { %9444 = vmatpush.bf16.msrb.mxu0 %v15079_v15  ;;  %v15117_v15 = vld [vmem:[%s16106_s8 + $0xe48] sm:$0xff]  ;;  %v15170_v35 = vld [vmem:[%s16106_s8 + $0xff0] sm:$0xff] }
 0x1ef   : > { %9457 = vmatpush.bf16.msrb.mxu1 %v15087_v16  ;;  %v15125_v16 = vld [vmem:[%s16106_s8 + $0xe88] sm:$0xff] }
 0x1f0   : > { %9470 = vmatpush.bf16.msrb.mxu2 %v15095_v17  ;;  %v15133_v17 = vld [vmem:[%s16106_s8 + $0xec8] sm:$0xff] }
 0x1f1   : > { %9483 = vmatpush.bf16.msrb.mxu3 %v15103_v18 }
 0x1f2   : > { %9445 = vmatpush.bf16.msrb.mxu0 %v15078_v24  ;;  %v15147_v24 = vld [vmem:[%s16106_s8 + $0xf38] sm:$0xff] }
 0x1f3   : > { %9458 = vmatpush.bf16.msrb.mxu1 %v15086_v25  ;;  %v15155_v25 = vld [vmem:[%s16106_s8 + $0xf78] sm:$0xff] }
 0x1f4   : > { %9471 = vmatpush.bf16.msrb.mxu2 %v15094_v27  ;;  %v15171_v27 = vld [vmem:[%s16106_s8 + $0xff8] sm:$0xff] }
 0x1f5   : > { %9484 = vmatpush.bf16.msrb.mxu3 %v15102_v28  ;;  %v2404_v28 = vld [vmem:[#allocation1] sm:$0xff] }
 0x1f6   : > { %9446 = vmatpush.bf16.msrb.mxu0 %v15077_v29  ;;  %v2406_v29 = vld [vmem:[#allocation1 + $0x12] sm:$0xff] }
 0x1f7   : > { %9459 = vmatpush.bf16.msrb.mxu1 %v15085_v30  ;;  %v2405_v30 = vld [vmem:[#allocation1 + $0x9] sm:$0xff] }
 0x1f8   : > { %9472 = vmatpush.bf16.msrb.mxu2 %v15093_v31  ;;  %v2407_v31 = vld [vmem:[#allocation1 + $0x1b] sm:$0xff] }
 0x1f9   : > { %9485 = vmatpush.bf16.msrb.mxu3 %v15101_v32  ;;  %v15146_v32 = vld [vmem:[%s16106_s8 + $0xf30] sm:$0xff] }
 0x1fa   : > { %9447 = vmatpush.bf16.msrb.mxu0 %v15076_v40  ;;  %v9241_v56 = vpop.f32.mrf.mxu0 }
 0x1fb   : > { %9460 = vmatpush.bf16.msrb.mxu1 %v15084_v41  ;;  %v9242_v57 = vadd.f32 %v9241_v56, %v16588_v23  ;;  %v9254_v60 = vpop.f32.mrf.mxu1  ;;  %v15132_v23 = vld [vmem:[%s16106_s8 + $0xec0] sm:$0xff] }
 0x1fc   : > { %9473 = vmatpush.bf16.msrb.mxu2 %v15092_v42  ;;  %v15144_v42 = vld [vmem:[%s16106_s8 + $0xf20] sm:$0xff] }
 0x1fd   : > { %9486 = vmatpush.bf16.msrb.mxu3 %v15100_v43  ;;  %9448 = vmatmul.bf16.vlgmr.msrb.gmra.mxu0 %v2398_v33  ;;  %v9255_v63 = vadd.f32 %v9254_v60, %v9242_v57  ;;  %v15154_v33 = vld [vmem:[%s16106_s8 + $0xf70] sm:$0xff]  ;;  %v15152_v43 = vld [vmem:[%s16106_s8 + $0xf60] sm:$0xff] }
 0x1fe   : > { %9492 = vmatpush.bf16.msra.mxu0 %v15115_v44  ;;  %9461 = vmatmul.bf16.vlgmr.msrb.gmra.mxu1 %v2399_v36  ;;  %v15145_v36 = vld [vmem:[%s16106_s8 + $0xf28] sm:$0xff]  ;;  %v15142_v57 = vld [vmem:[%s16106_s8 + $0xf10] sm:$0xff] }
 0x1ff   : > { %9505 = vmatpush.bf16.msra.mxu1 %v15123_v45  ;;  %9474 = vmatmul.bf16.vlgmr.msrb.gmra.mxu2 %v2400_v34  ;;  %v15162_v34 = vld [vmem:[%s16106_s8 + $0xfb0] sm:$0xff]  ;;  %v15160_v45 = vld [vmem:[%s16106_s8 + $0xfa0] sm:$0xff] }
 0x200   : > { %9518 = vmatpush.bf16.msra.mxu2 %v15131_v46  ;;  %9487 = vmatmul.bf16.vlgmr.msrb.gmra.mxu3 %v2401_v37  ;;  %v15153_v37 = vld [vmem:[%s16106_s8 + $0xf68] sm:$0xff]  ;;  %v15168_v46 = vld [vmem:[%s16106_s8 + $0xfe0] sm:$0xff]  ;;  %v15158_v60 = vld [vmem:[%s16106_s8 + $0xf90] sm:$0xff] }
 0x201   : > { %9531 = vmatpush.bf16.msra.mxu3 %v15139_v47 }
 0x202   : > { %9493 = vmatpush.bf16.msra.mxu0 %v15114_v48  ;;  %v9267_v4 = vpop.f32.mrf.mxu2  ;;  %v9243_v7 = vpop.f32.mrf.mxu0  ;;  %v15143_v48 = vld [vmem:[%s16106_s8 + $0xf18] sm:$0xff] }
 0x203   : > { %9506 = vmatpush.bf16.msra.mxu1 %v15122_v49  ;;  %v9268_v5 = vadd.f32 %v9267_v4, %v9255_v63  ;;  %v9280_v6 = vpop.f32.mrf.mxu3  ;;  %v9256_v11 = vpop.f32.mrf.mxu1  ;;  %v15151_v49 = vld [vmem:[%s16106_s8 + $0xf58] sm:$0xff]  ;;  %v15149_v63 = vld [vmem:[%s16106_s8 + $0xf48] sm:$0xff] }
 0x204   : > { %9519 = vmatpush.bf16.msra.mxu2 %v15130_v50  ;;  %v15159_v50 = vld [vmem:[%s16106_s8 + $0xf98] sm:$0xff]  ;;  %v15156_v11 = vld [vmem:[%s16106_s8 + $0xf80] sm:$0xff] }
 0x205   : > { %9532 = vmatpush.bf16.msra.mxu3 %v15138_v51  ;;  %v9281_v8 = vadd.f32 %v9280_v6, %v9268_v5  ;;  %v15167_v51 = vld [vmem:[%s16106_s8 + $0xfd8] sm:$0xff]  ;;  %v2409_v5 = vld [vmem:[#allocation1 + $0x2d] sm:$0xff] }
 0x206   : > { %9494 = vmatpush.bf16.msra.mxu0 %v15113_v52  ;;  %v2411_v6 = vld [vmem:[#allocation1 + $0x3f] sm:$0xff] }
 0x207   : > { %9507 = vmatpush.bf16.msra.mxu1 %v15121_v53 }
 0x208   : > { %9520 = vmatpush.bf16.msra.mxu2 %v15129_v54 }
 0x209   : > { %9533 = vmatpush.bf16.msra.mxu3 %v15137_v55 }
 0x20a   : > { %9495 = vmatpush.bf16.msra.mxu0 %v15112_v58  ;;  %v9269_v18 = vpop.f32.mrf.mxu2  ;;  %v15150_v58 = vld [vmem:[%s16106_s8 + $0xf50] sm:$0xff] }
 0x20b   : > { %9508 = vmatpush.bf16.msra.mxu1 %v15120_v59  ;;  %v9282_v19 = vpop.f32.mrf.mxu3  ;;  %v15186_v18 = vld [vmem:[%s16106_s8 + $0x1070] sm:$0xff] }
 0x20c   : > { %9521 = vmatpush.bf16.msra.mxu2 %v15128_v61  ;;  %v15166_v61 = vld [vmem:[%s16106_s8 + $0xfd0] sm:$0xff] }
 0x20d   : > { %9534 = vmatpush.bf16.msra.mxu3 %v15136_v62  ;;  %v15141_v62 = vld [vmem:[%s16106_s8 + $0xf08] sm:$0xff]  ;;  %v15194_v19 = vld [vmem:[%s16106_s8 + $0x10b0] sm:$0xff] }
 0x20e   : > { %9496 = vmatpush.bf16.msra.mxu0 %v15111_v0  ;;  %v15157_v0 = vld [vmem:[%s16106_s8 + $0xf88] sm:$0xff] }
 0x20f   : > { %9509 = vmatpush.bf16.msra.mxu1 %v15119_v1  ;;  %v15165_v1 = vld [vmem:[%s16106_s8 + $0xfc8] sm:$0xff] }
 0x210   : > { %9522 = vmatpush.bf16.msra.mxu2 %v15127_v2  ;;  %v2408_v2 = vld [vmem:[#allocation1 + $0x24] sm:$0xff] }
 0x211   : > { %9535 = vmatpush.bf16.msra.mxu3 %v15135_v3  ;;  %v2410_v3 = vld [vmem:[#allocation1 + $0x36] sm:$0xff] }
 0x212   : > { %9497 = vmatpush.bf16.msra.mxu0 %v15110_v9  ;;  %v15140_v9 = vld [vmem:[%s16106_s8 + $0xf00] sm:$0xff] }
 0x213   : > { %9510 = vmatpush.bf16.msra.mxu1 %v15118_v10  ;;  %v15148_v10 = vld [vmem:[%s16106_s8 + $0xf40] sm:$0xff] }
 0x214   : > { %9523 = vmatpush.bf16.msra.mxu2 %v15126_v12  ;;  %v15164_v12 = vld [vmem:[%s16106_s8 + $0xfc0] sm:$0xff] }
 0x215   : > { %9536 = vmatpush.bf16.msra.mxu3 %v15134_v13  ;;  %v15179_v13 = vld [vmem:[%s16106_s8 + $0x1038] sm:$0xff] }
 0x216   : > { %9498 = vmatpush.bf16.msra.mxu0 %v15109_v14  ;;  %v15187_v14 = vld [vmem:[%s16106_s8 + $0x1078] sm:$0xff] }
 0x217   : > { %9511 = vmatpush.bf16.msra.mxu1 %v15117_v15  ;;  %v15195_v15 = vld [vmem:[%s16106_s8 + $0x10b8] sm:$0xff] }
 0x218   : > { %9524 = vmatpush.bf16.msra.mxu2 %v15125_v16  ;;  %v15203_v16 = vld [vmem:[%s16106_s8 + $0x10f8] sm:$0xff] }
 0x219   : > { %9537 = vmatpush.bf16.msra.mxu3 %v15133_v17  ;;  %v15178_v17 = vld [vmem:[%s16106_s8 + $0x1030] sm:$0xff] }
 0x21a   : > { %9499 = vmatpush.bf16.msra.mxu0 %v15108_v20  ;;  %v9293_v40 = vpop.f32.mrf.mxu0  ;;  %v15202_v20 = vld [vmem:[%s16106_s8 + $0x10f0] sm:$0xff] }
 0x21b   : > { %9512 = vmatpush.bf16.msra.mxu1 %v15116_v21  ;;  %v9294_v41 = vadd.f32 %v9293_v40, %v9281_v8  ;;  %v9306_v44 = vpop.f32.mrf.mxu1  ;;  %v276_v8 = vld [vmem:[%s16125_s27 + $0x40] sm:$0xff]  ;;  %v15177_v21 = vld [vmem:[%s16106_s8 + $0x1028] sm:$0xff] }
 0x21c   : > { %9525 = vmatpush.bf16.msra.mxu2 %v15124_v22  ;;  %2413 = vst [vmem:[#allocation1] ss:$9 sm:$0xff] %v276_v8  ;;  %v15185_v22 = vld [vmem:[%s16106_s8 + $0x1068] sm:$0xff] }
 0x21d   : > { %9538 = vmatpush.bf16.msra.mxu3 %v15132_v23  ;;  %9500 = vmatmul.bf16.vlgmr.msra.gmra.mxu0 %v2404_v28  ;;  %v9307_v47 = vadd.f32 %v9306_v44, %v9294_v41  ;;  %v15193_v23 = vld [vmem:[%s16106_s8 + $0x10a8] sm:$0xff]  ;;  %v15184_v28 = vld [vmem:[%s16106_s8 + $0x1060] sm:$0xff] }
 0x21e   : > { %9544 = vmatpush.bf16.msrb.mxu0 %v15147_v24  ;;  %9513 = vmatmul.bf16.vlgmr.msra.gmra.mxu1 %v2405_v30  ;;  %v15201_v24 = vld [vmem:[%s16106_s8 + $0x10e8] sm:$0xff]  ;;  %v15192_v30 = vld [vmem:[%s16106_s8 + $0x10a0] sm:$0xff] }
 0x21f   : > { %9557 = vmatpush.bf16.msrb.mxu1 %v15155_v25  ;;  %9526 = vmatmul.bf16.vlgmr.msra.gmra.mxu2 %v2406_v29  ;;  %v15233_v8 = vld [vmem:[%s16106_s8 + $0x11e8] sm:$0xff] }
 0x220   : > { %9570 = vmatpush.bf16.msrb.mxu2 %v15163_v26  ;;  %9539 = vmatmul.bf16.vlgmr.msra.gmra.mxu3 %v2407_v31  ;;  %v15200_v31 = vld [vmem:[%s16106_s8 + $0x10e0] sm:$0xff] }
 0x221   : > { %9583 = vmatpush.bf16.msrb.mxu3 %v15171_v27  ;;  %v15176_v27 = vld [vmem:[%s16106_s8 + $0x1020] sm:$0xff] }
 0x222   : > { %9545 = vmatpush.bf16.msrb.mxu0 %v15146_v32  ;;  %v9319_v52 = vpop.f32.mrf.mxu2  ;;  %v9295_v55 = vpop.f32.mrf.mxu0 }
 0x223   : > { %9558 = vmatpush.bf16.msrb.mxu1 %v15154_v33  ;;  %v9320_v53 = vadd.f32 %v9319_v52, %v9307_v47  ;;  %v9332_v54 = vpop.f32.mrf.mxu3  ;;  %v9308_v59 = vpop.f32.mrf.mxu1  ;;  %v15175_v33 = vld [vmem:[%s16106_s8 + $0x1018] sm:$0xff]  ;;  %v15173_v47 = vld [vmem:[%s16106_s8 + $0x1008] sm:$0xff]  ;;  %v15188_v55 = vld [vmem:[%s16106_s8 + $0x1080] sm:$0xff] }
 0x224   : > { %9571 = vmatpush.bf16.msrb.mxu2 %v15162_v34  ;;  %v15183_v34 = vld [vmem:[%s16106_s8 + $0x1058] sm:$0xff] }
 0x225   : > { %9584 = vmatpush.bf16.msrb.mxu3 %v15170_v35  ;;  %v16656_v56 = vadd.f32 %v9332_v54, %v9320_v53  ;;  %v15191_v35 = vld [vmem:[%s16106_s8 + $0x1098] sm:$0xff]  ;;  %v15172_v53 = vld [vmem:[%s16106_s8 + $0x1000] sm:$0xff] }
 0x226   : > { %9546 = vmatpush.bf16.msrb.mxu0 %v15145_v36  ;;  %v15199_v36 = vld [vmem:[%s16106_s8 + $0x10d8] sm:$0xff]  ;;  %v15180_v54 = vld [vmem:[%s16106_s8 + $0x1040] sm:$0xff] }
 0x227   : > { %9559 = vmatpush.bf16.msrb.mxu1 %v15153_v37  ;;  %v15227_v59 = vld [vmem:[%s16106_s8 + $0x11b8] sm:$0xff] }
 0x228   : > { %9572 = vmatpush.bf16.msrb.mxu2 %v15161_v38 }
 0x229   : > { %9585 = vmatpush.bf16.msrb.mxu3 %v15169_v39 }
 0x22a   : > { %9547 = vmatpush.bf16.msrb.mxu0 %v15144_v42  ;;  %v9321_v4 = vpop.f32.mrf.mxu2  ;;  %v15174_v42 = vld [vmem:[%s16106_s8 + $0x1010] sm:$0xff] }
 0x22b   : > { %9560 = vmatpush.bf16.msrb.mxu1 %v15152_v43  ;;  %v9334_v7 = vpop.f32.mrf.mxu3  ;;  %v15182_v43 = vld [vmem:[%s16106_s8 + $0x1050] sm:$0xff] }
 0x22c   : > { %9573 = vmatpush.bf16.msrb.mxu2 %v15160_v45  ;;  %v15190_v45 = vld [vmem:[%s16106_s8 + $0x1090] sm:$0xff]  ;;  %v15225_v7 = vld [vmem:[%s16106_s8 + $0x11a8] sm:$0xff] }
 0x22d   : > { %9586 = vmatpush.bf16.msrb.mxu3 %v15168_v46  ;;  %v15198_v46 = vld [vmem:[%s16106_s8 + $0x10d0] sm:$0xff] }
 0x22e   : > { %9548 = vmatpush.bf16.msrb.mxu0 %v15143_v48  ;;  %v15181_v48 = vld [vmem:[%s16106_s8 + $0x1048] sm:$0xff]  ;;  %v15234_v4 = vld [vmem:[%s16106_s8 + $0x11f0] sm:$0xff] }
 0x22f   : > { %9561 = vmatpush.bf16.msrb.mxu1 %v15151_v49  ;;  %v15189_v49 = vld [vmem:[%s16106_s8 + $0x1088] sm:$0xff] }
 0x230   : > { %9574 = vmatpush.bf16.msrb.mxu2 %v15159_v50  ;;  %v15197_v50 = vld [vmem:[%s16106_s8 + $0x10c8] sm:$0xff] }
 0x231   : > { %9587 = vmatpush.bf16.msrb.mxu3 %v15167_v51 }
 0x232   : > { %9549 = vmatpush.bf16.msrb.mxu0 %v15142_v57  ;;  %v15211_v57 = vld [vmem:[%s16106_s8 + $0x1138] sm:$0xff] }
 0x233   : > { %9562 = vmatpush.bf16.msrb.mxu1 %v15150_v58  ;;  %v15219_v58 = vld [vmem:[%s16106_s8 + $0x1178] sm:$0xff] }
 0x234   : > { %9575 = vmatpush.bf16.msrb.mxu2 %v15158_v60  ;;  %v15235_v60 = vld [vmem:[%s16106_s8 + $0x11f8] sm:$0xff] }
 0x235   : > { %9588 = vmatpush.bf16.msrb.mxu3 %v15166_v61  ;;  %v2414_v61 = vld [vmem:[#allocation1] sm:$0xff] }
 0x236   : > { %9550 = vmatpush.bf16.msrb.mxu0 %v15141_v62  ;;  %v2416_v62 = vld [vmem:[#allocation1 + $0x12] sm:$0xff] }
 0x237   : > { %9563 = vmatpush.bf16.msrb.mxu1 %v15149_v63  ;;  %v2415_v63 = vld [vmem:[#allocation1 + $0x9] sm:$0xff] }
 0x238   : > { %9576 = vmatpush.bf16.msrb.mxu2 %v15157_v0  ;;  %v2417_v0 = vld [vmem:[#allocation1 + $0x1b] sm:$0xff] }
 0x239   : > { %9589 = vmatpush.bf16.msrb.mxu3 %v15165_v1  ;;  %v15210_v1 = vld [vmem:[%s16106_s8 + $0x1130] sm:$0xff] }
 0x23a   : > { %9551 = vmatpush.bf16.msrb.mxu0 %v15140_v9  ;;  %v9345_v25 = vpop.f32.mrf.mxu0 }
 0x23b   : > { %9564 = vmatpush.bf16.msrb.mxu1 %v15148_v10  ;;  %v9346_v26 = vadd.f32 %v9345_v25, %v16656_v56  ;;  %v9358_v29 = vpop.f32.mrf.mxu1  ;;  %v15196_v56 = vld [vmem:[%s16106_s8 + $0x10c0] sm:$0xff] }
 0x23c   : > { %9577 = vmatpush.bf16.msrb.mxu2 %v15156_v11  ;;  %v15208_v11 = vld [vmem:[%s16106_s8 + $0x1120] sm:$0xff] }
 0x23d   : > { %9590 = vmatpush.bf16.msrb.mxu3 %v15164_v12  ;;  %9552 = vmatmul.bf16.vlgmr.msrb.gmra.mxu0 %v2408_v2  ;;  %v9359_v32 = vadd.f32 %v9358_v29, %v9346_v26  ;;  %v15218_v2 = vld [vmem:[%s16106_s8 + $0x1170] sm:$0xff]  ;;  %v15216_v12 = vld [vmem:[%s16106_s8 + $0x1160] sm:$0xff] }
 0x23e   : > { %9596 = vmatpush.bf16.msra.mxu0 %v15179_v13  ;;  %9565 = vmatmul.bf16.vlgmr.msrb.gmra.mxu1 %v2409_v5  ;;  %v15209_v5 = vld [vmem:[%s16106_s8 + $0x1128] sm:$0xff]  ;;  %v15206_v26 = vld [vmem:[%s16106_s8 + $0x1110] sm:$0xff] }
 0x23f   : > { %9609 = vmatpush.bf16.msra.mxu1 %v15187_v14  ;;  %9578 = vmatmul.bf16.vlgmr.msrb.gmra.mxu2 %v2410_v3  ;;  %v15226_v3 = vld [vmem:[%s16106_s8 + $0x11b0] sm:$0xff]  ;;  %v15224_v14 = vld [vmem:[%s16106_s8 + $0x11a0] sm:$0xff] }
 0x240   : > { %9622 = vmatpush.bf16.msra.mxu2 %v15195_v15  ;;  %9591 = vmatmul.bf16.vlgmr.msrb.gmra.mxu3 %v2411_v6  ;;  %v15217_v6 = vld [vmem:[%s16106_s8 + $0x1168] sm:$0xff]  ;;  %v15232_v15 = vld [vmem:[%s16106_s8 + $0x11e0] sm:$0xff]  ;;  %v15222_v29 = vld [vmem:[%s16106_s8 + $0x1190] sm:$0xff] }
 0x241   : > { %9635 = vmatpush.bf16.msra.mxu3 %v15203_v16 }
 0x242   : > { %9597 = vmatpush.bf16.msra.mxu0 %v15178_v17  ;;  %v9371_v37 = vpop.f32.mrf.mxu2  ;;  %v9347_v40 = vpop.f32.mrf.mxu0  ;;  %v15207_v17 = vld [vmem:[%s16106_s8 + $0x1118] sm:$0xff] }
 0x243   : > { %9610 = vmatpush.bf16.msra.mxu1 %v15186_v18  ;;  %v9372_v38 = vadd.f32 %v9371_v37, %v9359_v32  ;;  %v9384_v39 = vpop.f32.mrf.mxu3  ;;  %v9360_v44 = vpop.f32.mrf.mxu1  ;;  %v15215_v18 = vld [vmem:[%s16106_s8 + $0x1158] sm:$0xff]  ;;  %v15213_v32 = vld [vmem:[%s16106_s8 + $0x1148] sm:$0xff] }
 0x244   : > { %9623 = vmatpush.bf16.msra.mxu2 %v15194_v19  ;;  %v15223_v19 = vld [vmem:[%s16106_s8 + $0x1198] sm:$0xff]  ;;  %v15220_v44 = vld [vmem:[%s16106_s8 + $0x1180] sm:$0xff] }
 0x245   : > { %9636 = vmatpush.bf16.msra.mxu3 %v15202_v20  ;;  %v9385_v41 = vadd.f32 %v9384_v39, %v9372_v38  ;;  %v15231_v20 = vld [vmem:[%s16106_s8 + $0x11d8] sm:$0xff]  ;;  %v2419_v38 = vld [vmem:[#allocation1 + $0x2d] sm:$0xff] }
 0x246   : > { %9598 = vmatpush.bf16.msra.mxu0 %v15177_v21  ;;  %v2421_v39 = vld [vmem:[#allocation1 + $0x3f] sm:$0xff] }
 0x247   : > { %9611 = vmatpush.bf16.msra.mxu1 %v15185_v22 }
 0x248   : > { %9624 = vmatpush.bf16.msra.mxu2 %v15193_v23 }
 0x249   : > { %9637 = vmatpush.bf16.msra.mxu3 %v15201_v24 }
 0x24a   : > { %9599 = vmatpush.bf16.msra.mxu0 %v15176_v27  ;;  %v9373_v51 = vpop.f32.mrf.mxu2  ;;  %v15214_v27 = vld [vmem:[%s16106_s8 + $0x1150] sm:$0xff] }
 0x24b   : > { %9612 = vmatpush.bf16.msra.mxu1 %v15184_v28  ;;  %v9386_v52 = vpop.f32.mrf.mxu3  ;;  %v15250_v51 = vld [vmem:[%s16106_s8 + $0x1270] sm:$0xff] }
 0x24c   : > { %9625 = vmatpush.bf16.msra.mxu2 %v15192_v30  ;;  %v15230_v30 = vld [vmem:[%s16106_s8 + $0x11d0] sm:$0xff] }
 0x24d   : > { %9638 = vmatpush.bf16.msra.mxu3 %v15200_v31  ;;  %v15205_v31 = vld [vmem:[%s16106_s8 + $0x1108] sm:$0xff]  ;;  %v15258_v52 = vld [vmem:[%s16106_s8 + $0x12b0] sm:$0xff] }
 0x24e   : > { %9600 = vmatpush.bf16.msra.mxu0 %v15175_v33  ;;  %v15221_v33 = vld [vmem:[%s16106_s8 + $0x1188] sm:$0xff] }
 0x24f   : > { %9613 = vmatpush.bf16.msra.mxu1 %v15183_v34  ;;  %v15229_v34 = vld [vmem:[%s16106_s8 + $0x11c8] sm:$0xff] }
 0x250   : > { %9626 = vmatpush.bf16.msra.mxu2 %v15191_v35  ;;  %v2418_v35 = vld [vmem:[#allocation1 + $0x24] sm:$0xff] }
 0x251   : > { %9639 = vmatpush.bf16.msra.mxu3 %v15199_v36  ;;  %v2420_v36 = vld [vmem:[#allocation1 + $0x36] sm:$0xff] }
 0x252   : > { %9601 = vmatpush.bf16.msra.mxu0 %v15174_v42  ;;  %v15204_v42 = vld [vmem:[%s16106_s8 + $0x1100] sm:$0xff] }
 0x253   : > { %9614 = vmatpush.bf16.msra.mxu1 %v15182_v43  ;;  %v15212_v43 = vld [vmem:[%s16106_s8 + $0x1140] sm:$0xff] }
 0x254   : > { %9627 = vmatpush.bf16.msra.mxu2 %v15190_v45  ;;  %v15228_v45 = vld [vmem:[%s16106_s8 + $0x11c0] sm:$0xff] }
 0x255   : > { %9640 = vmatpush.bf16.msra.mxu3 %v15198_v46  ;;  %v15243_v46 = vld [vmem:[%s16106_s8 + $0x1238] sm:$0xff] }
 0x256   : > { %9602 = vmatpush.bf16.msra.mxu0 %v15173_v47  ;;  %v15251_v47 = vld [vmem:[%s16106_s8 + $0x1278] sm:$0xff] }
 0x257   : > { %9615 = vmatpush.bf16.msra.mxu1 %v15181_v48  ;;  %v15259_v48 = vld [vmem:[%s16106_s8 + $0x12b8] sm:$0xff] }
 0x258   : > { %9628 = vmatpush.bf16.msra.mxu2 %v15189_v49  ;;  %v15267_v49 = vld [vmem:[%s16106_s8 + $0x12f8] sm:$0xff] }
 0x259   : > { %9641 = vmatpush.bf16.msra.mxu3 %v15197_v50  ;;  %v15242_v50 = vld [vmem:[%s16106_s8 + $0x1230] sm:$0xff] }
 0x25a   : > { %9603 = vmatpush.bf16.msra.mxu0 %v15172_v53  ;;  %v9397_v9 = vpop.f32.mrf.mxu0  ;;  %v15266_v53 = vld [vmem:[%s16106_s8 + $0x12f0] sm:$0xff] }
 0x25b   : > { %9616 = vmatpush.bf16.msra.mxu1 %v15180_v54  ;;  %v9398_v10 = vadd.f32 %v9397_v9, %v9385_v41  ;;  %v9410_v13 = vpop.f32.mrf.mxu1  ;;  %v277_v41 = vld [vmem:[%s16125_s27 + $0x48] sm:$0xff]  ;;  %v15241_v54 = vld [vmem:[%s16106_s8 + $0x1228] sm:$0xff] }
 0x25c   : > { %9629 = vmatpush.bf16.msra.mxu2 %v15188_v55  ;;  %2423 = vst [vmem:[#allocation1] ss:$9 sm:$0xff] %v277_v41  ;;  %v15249_v55 = vld [vmem:[%s16106_s8 + $0x1268] sm:$0xff] }
 0x25d   : > { %9642 = vmatpush.bf16.msra.mxu3 %v15196_v56  ;;  %9604 = vmatmul.bf16.vlgmr.msra.gmra.mxu0 %v2414_v61  ;;  %v9411_v16 = vadd.f32 %v9410_v13, %v9398_v10  ;;  %v15257_v56 = vld [vmem:[%s16106_s8 + $0x12a8] sm:$0xff]  ;;  %v15248_v61 = vld [vmem:[%s16106_s8 + $0x1260] sm:$0xff] }
 0x25e   : > { %9648 = vmatpush.bf16.msrb.mxu0 %v15211_v57  ;;  %9617 = vmatmul.bf16.vlgmr.msra.gmra.mxu1 %v2415_v63  ;;  %v15265_v57 = vld [vmem:[%s16106_s8 + $0x12e8] sm:$0xff]  ;;  %v15256_v63 = vld [vmem:[%s16106_s8 + $0x12a0] sm:$0xff] }
 0x25f   : > { %9661 = vmatpush.bf16.msrb.mxu1 %v15219_v58  ;;  %9630 = vmatmul.bf16.vlgmr.msra.gmra.mxu2 %v2416_v62  ;;  %v15297_v41 = vld [vmem:[%s16106_s8 + $0x13e8] sm:$0xff] }
 0x260   : > { %9674 = vmatpush.bf16.msrb.mxu2 %v15227_v59  ;;  %9643 = vmatmul.bf16.vlgmr.msra.gmra.mxu3 %v2417_v0  ;;  %v15264_v0 = vld [vmem:[%s16106_s8 + $0x12e0] sm:$0xff] }
 0x261   : > { %9687 = vmatpush.bf16.msrb.mxu3 %v15235_v60  ;;  %v15240_v60 = vld [vmem:[%s16106_s8 + $0x1220] sm:$0xff] }
 0x262   : > { %9649 = vmatpush.bf16.msrb.mxu0 %v15210_v1  ;;  %v9423_v21 = vpop.f32.mrf.mxu2  ;;  %v9399_v24 = vpop.f32.mrf.mxu0 }
 0x263   : > { %9662 = vmatpush.bf16.msrb.mxu1 %v15218_v2  ;;  %v9424_v22 = vadd.f32 %v9423_v21, %v9411_v16  ;;  %v9436_v23 = vpop.f32.mrf.mxu3  ;;  %v9412_v28 = vpop.f32.mrf.mxu1  ;;  %v15239_v2 = vld [vmem:[%s16106_s8 + $0x1218] sm:$0xff]  ;;  %v15237_v16 = vld [vmem:[%s16106_s8 + $0x1208] sm:$0xff]  ;;  %v15252_v24 = vld [vmem:[%s16106_s8 + $0x1280] sm:$0xff] }
 0x264   : > { %9675 = vmatpush.bf16.msrb.mxu2 %v15226_v3  ;;  %v15247_v3 = vld [vmem:[%s16106_s8 + $0x1258] sm:$0xff] }
 0x265   : > { %9688 = vmatpush.bf16.msrb.mxu3 %v15234_v4  ;;  %v16724_v25 = vadd.f32 %v9436_v23, %v9424_v22  ;;  %v15255_v4 = vld [vmem:[%s16106_s8 + $0x1298] sm:$0xff]  ;;  %v15236_v22 = vld [vmem:[%s16106_s8 + $0x1200] sm:$0xff] }
 0x266   : > { %9650 = vmatpush.bf16.msrb.mxu0 %v15209_v5  ;;  %v15263_v5 = vld [vmem:[%s16106_s8 + $0x12d8] sm:$0xff]  ;;  %v15244_v23 = vld [vmem:[%s16106_s8 + $0x1240] sm:$0xff] }
 0x267   : > { %9663 = vmatpush.bf16.msrb.mxu1 %v15217_v6  ;;  %v15291_v28 = vld [vmem:[%s16106_s8 + $0x13b8] sm:$0xff] }
 0x268   : > { %9676 = vmatpush.bf16.msrb.mxu2 %v15225_v7 }
 0x269   : > { %9689 = vmatpush.bf16.msrb.mxu3 %v15233_v8 }
 0x26a   : > { %9651 = vmatpush.bf16.msrb.mxu0 %v15208_v11  ;;  %v9425_v37 = vpop.f32.mrf.mxu2  ;;  %v15238_v11 = vld [vmem:[%s16106_s8 + $0x1210] sm:$0xff] }
 0x26b   : > { %9664 = vmatpush.bf16.msrb.mxu1 %v15216_v12  ;;  %v9438_v40 = vpop.f32.mrf.mxu3  ;;  %v15246_v12 = vld [vmem:[%s16106_s8 + $0x1250] sm:$0xff] }
 0x26c   : > { %9677 = vmatpush.bf16.msrb.mxu2 %v15224_v14  ;;  %v15254_v14 = vld [vmem:[%s16106_s8 + $0x1290] sm:$0xff]  ;;  %v15289_v40 = vld [vmem:[%s16106_s8 + $0x13a8] sm:$0xff] }
 0x26d   : > { %9690 = vmatpush.bf16.msrb.mxu3 %v15232_v15  ;;  %v15262_v15 = vld [vmem:[%s16106_s8 + $0x12d0] sm:$0xff] }
 0x26e   : > { %9652 = vmatpush.bf16.msrb.mxu0 %v15207_v17  ;;  %v15245_v17 = vld [vmem:[%s16106_s8 + $0x1248] sm:$0xff]  ;;  %v15298_v37 = vld [vmem:[%s16106_s8 + $0x13f0] sm:$0xff] }
 0x26f   : > { %9665 = vmatpush.bf16.msrb.mxu1 %v15215_v18  ;;  %v15253_v18 = vld [vmem:[%s16106_s8 + $0x1288] sm:$0xff] }
 0x270   : > { %9678 = vmatpush.bf16.msrb.mxu2 %v15223_v19  ;;  %v15261_v19 = vld [vmem:[%s16106_s8 + $0x12c8] sm:$0xff] }
 0x271   : > { %9691 = vmatpush.bf16.msrb.mxu3 %v15231_v20 }
 0x272   : > { %9653 = vmatpush.bf16.msrb.mxu0 %v15206_v26  ;;  %v15275_v26 = vld [vmem:[%s16106_s8 + $0x1338] sm:$0xff] }
 0x273   : > { %9666 = vmatpush.bf16.msrb.mxu1 %v15214_v27  ;;  %v15283_v27 = vld [vmem:[%s16106_s8 + $0x1378] sm:$0xff] }
 0x274   : > { %9679 = vmatpush.bf16.msrb.mxu2 %v15222_v29  ;;  %v15299_v29 = vld [vmem:[%s16106_s8 + $0x13f8] sm:$0xff] }
 0x275   : > { %9692 = vmatpush.bf16.msrb.mxu3 %v15230_v30  ;;  %v2424_v30 = vld [vmem:[#allocation1] sm:$0xff] }
 0x276   : > { %9654 = vmatpush.bf16.msrb.mxu0 %v15205_v31  ;;  %v2426_v31 = vld [vmem:[#allocation1 + $0x12] sm:$0xff] }
 0x277   : > { %9667 = vmatpush.bf16.msrb.mxu1 %v15213_v32  ;;  %v2425_v32 = vld [vmem:[#allocation1 + $0x9] sm:$0xff] }
 0x278   : > { %9680 = vmatpush.bf16.msrb.mxu2 %v15221_v33  ;;  %v2427_v33 = vld [vmem:[#allocation1 + $0x1b] sm:$0xff] }
 0x279   : > { %9693 = vmatpush.bf16.msrb.mxu3 %v15229_v34  ;;  %v15274_v34 = vld [vmem:[%s16106_s8 + $0x1330] sm:$0xff] }
 0x27a   : > { %9655 = vmatpush.bf16.msrb.mxu0 %v15204_v42  ;;  %v9449_v58 = vpop.f32.mrf.mxu0 }
 0x27b   : > { %9668 = vmatpush.bf16.msrb.mxu1 %v15212_v43  ;;  %v9450_v59 = vadd.f32 %v9449_v58, %v16724_v25  ;;  %v9462_v62 = vpop.f32.mrf.mxu1  ;;  %v15260_v25 = vld [vmem:[%s16106_s8 + $0x12c0] sm:$0xff] }
 0x27c   : > { %9681 = vmatpush.bf16.msrb.mxu2 %v15220_v44  ;;  %v15272_v44 = vld [vmem:[%s16106_s8 + $0x1320] sm:$0xff] }
 0x27d   : > { %9694 = vmatpush.bf16.msrb.mxu3 %v15228_v45  ;;  %9656 = vmatmul.bf16.vlgmr.msrb.gmra.mxu0 %v2418_v35  ;;  %v9463_v1 = vadd.f32 %v9462_v62, %v9450_v59  ;;  %v15282_v35 = vld [vmem:[%s16106_s8 + $0x1370] sm:$0xff]  ;;  %v15280_v45 = vld [vmem:[%s16106_s8 + $0x1360] sm:$0xff] }
 0x27e   : > { %9700 = vmatpush.bf16.msra.mxu0 %v15243_v46  ;;  %9669 = vmatmul.bf16.vlgmr.msrb.gmra.mxu1 %v2419_v38  ;;  %v15273_v38 = vld [vmem:[%s16106_s8 + $0x1328] sm:$0xff]  ;;  %v15270_v59 = vld [vmem:[%s16106_s8 + $0x1310] sm:$0xff] }
 0x27f   : > { %9713 = vmatpush.bf16.msra.mxu1 %v15251_v47  ;;  %9682 = vmatmul.bf16.vlgmr.msrb.gmra.mxu2 %v2420_v36  ;;  %v15290_v36 = vld [vmem:[%s16106_s8 + $0x13b0] sm:$0xff]  ;;  %v15288_v47 = vld [vmem:[%s16106_s8 + $0x13a0] sm:$0xff] }
 0x280   : > { %9726 = vmatpush.bf16.msra.mxu2 %v15259_v48  ;;  %9695 = vmatmul.bf16.vlgmr.msrb.gmra.mxu3 %v2421_v39  ;;  %v15281_v39 = vld [vmem:[%s16106_s8 + $0x1368] sm:$0xff]  ;;  %v15296_v48 = vld [vmem:[%s16106_s8 + $0x13e0] sm:$0xff]  ;;  %v15286_v62 = vld [vmem:[%s16106_s8 + $0x1390] sm:$0xff] }
 0x281   : > { %9739 = vmatpush.bf16.msra.mxu3 %v15267_v49 }
 0x282   : > { %9701 = vmatpush.bf16.msra.mxu0 %v15242_v50  ;;  %v9475_v6 = vpop.f32.mrf.mxu2  ;;  %v9451_v9 = vpop.f32.mrf.mxu0  ;;  %v15271_v50 = vld [vmem:[%s16106_s8 + $0x1318] sm:$0xff] }
 0x283   : > { %9714 = vmatpush.bf16.msra.mxu1 %v15250_v51  ;;  %v9476_v7 = vadd.f32 %v9475_v6, %v9463_v1  ;;  %v9488_v8 = vpop.f32.mrf.mxu3  ;;  %v9464_v13 = vpop.f32.mrf.mxu1  ;;  %v15279_v51 = vld [vmem:[%s16106_s8 + $0x1358] sm:$0xff]  ;;  %v15277_v1 = vld [vmem:[%s16106_s8 + $0x1348] sm:$0xff] }
 0x284   : > { %9727 = vmatpush.bf16.msra.mxu2 %v15258_v52  ;;  %v15287_v52 = vld [vmem:[%s16106_s8 + $0x1398] sm:$0xff]  ;;  %v15284_v13 = vld [vmem:[%s16106_s8 + $0x1380] sm:$0xff] }
 0x285   : > { %9740 = vmatpush.bf16.msra.mxu3 %v15266_v53  ;;  %v9489_v10 = vadd.f32 %v9488_v8, %v9476_v7  ;;  %v15295_v53 = vld [vmem:[%s16106_s8 + $0x13d8] sm:$0xff]  ;;  %v2429_v7 = vld [vmem:[#allocation1 + $0x2d] sm:$0xff] }
 0x286   : > { %9702 = vmatpush.bf16.msra.mxu0 %v15241_v54  ;;  %v2431_v8 = vld [vmem:[#allocation1 + $0x3f] sm:$0xff] }
 0x287   : > { %9715 = vmatpush.bf16.msra.mxu1 %v15249_v55 }
 0x288   : > { %9728 = vmatpush.bf16.msra.mxu2 %v15257_v56 }
 0x289   : > { %9741 = vmatpush.bf16.msra.mxu3 %v15265_v57 }
 0x28a   : > { %9703 = vmatpush.bf16.msra.mxu0 %v15240_v60  ;;  %v9477_v20 = vpop.f32.mrf.mxu2  ;;  %v15278_v60 = vld [vmem:[%s16106_s8 + $0x1350] sm:$0xff] }
 0x28b   : > { %9716 = vmatpush.bf16.msra.mxu1 %v15248_v61  ;;  %v9490_v21 = vpop.f32.mrf.mxu3  ;;  %v15314_v20 = vld [vmem:[%s16106_s8 + $0x1470] sm:$0xff] }
 0x28c   : > { %9729 = vmatpush.bf16.msra.mxu2 %v15256_v63  ;;  %v15294_v63 = vld [vmem:[%s16106_s8 + $0x13d0] sm:$0xff] }
 0x28d   : > { %9742 = vmatpush.bf16.msra.mxu3 %v15264_v0  ;;  %v15269_v0 = vld [vmem:[%s16106_s8 + $0x1308] sm:$0xff]  ;;  %v15322_v21 = vld [vmem:[%s16106_s8 + $0x14b0] sm:$0xff] }
 0x28e   : > { %9704 = vmatpush.bf16.msra.mxu0 %v15239_v2  ;;  %v15285_v2 = vld [vmem:[%s16106_s8 + $0x1388] sm:$0xff] }
 0x28f   : > { %9717 = vmatpush.bf16.msra.mxu1 %v15247_v3  ;;  %v15293_v3 = vld [vmem:[%s16106_s8 + $0x13c8] sm:$0xff] }
 0x290   : > { %9730 = vmatpush.bf16.msra.mxu2 %v15255_v4  ;;  %v2428_v4 = vld [vmem:[#allocation1 + $0x24] sm:$0xff] }
 0x291   : > { %9743 = vmatpush.bf16.msra.mxu3 %v15263_v5  ;;  %v2430_v5 = vld [vmem:[#allocation1 + $0x36] sm:$0xff] }
 0x292   : > { %9705 = vmatpush.bf16.msra.mxu0 %v15238_v11  ;;  %v15268_v11 = vld [vmem:[%s16106_s8 + $0x1300] sm:$0xff] }
 0x293   : > { %9718 = vmatpush.bf16.msra.mxu1 %v15246_v12  ;;  %v15276_v12 = vld [vmem:[%s16106_s8 + $0x1340] sm:$0xff] }
 0x294   : > { %9731 = vmatpush.bf16.msra.mxu2 %v15254_v14  ;;  %v15292_v14 = vld [vmem:[%s16106_s8 + $0x13c0] sm:$0xff] }
 0x295   : > { %9744 = vmatpush.bf16.msra.mxu3 %v15262_v15  ;;  %v15307_v15 = vld [vmem:[%s16106_s8 + $0x1438] sm:$0xff] }
 0x296   : > { %9706 = vmatpush.bf16.msra.mxu0 %v15237_v16  ;;  %v15315_v16 = vld [vmem:[%s16106_s8 + $0x1478] sm:$0xff] }
 0x297   : > { %9719 = vmatpush.bf16.msra.mxu1 %v15245_v17  ;;  %v15323_v17 = vld [vmem:[%s16106_s8 + $0x14b8] sm:$0xff] }
 0x298   : > { %9732 = vmatpush.bf16.msra.mxu2 %v15253_v18  ;;  %v15331_v18 = vld [vmem:[%s16106_s8 + $0x14f8] sm:$0xff] }
 0x299   : > { %9745 = vmatpush.bf16.msra.mxu3 %v15261_v19  ;;  %v15306_v19 = vld [vmem:[%s16106_s8 + $0x1430] sm:$0xff] }
 0x29a   : > { %9707 = vmatpush.bf16.msra.mxu0 %v15236_v22  ;;  %v9501_v42 = vpop.f32.mrf.mxu0  ;;  %v15330_v22 = vld [vmem:[%s16106_s8 + $0x14f0] sm:$0xff] }
 0x29b   : > { %9720 = vmatpush.bf16.msra.mxu1 %v15244_v23  ;;  %v9502_v43 = vadd.f32 %v9501_v42, %v9489_v10  ;;  %v9514_v46 = vpop.f32.mrf.mxu1  ;;  %v278_v10 = vld [vmem:[%s16125_s27 + $0x50] sm:$0xff] }
 0x29c   : > { %9733 = vmatpush.bf16.msra.mxu2 %v15252_v24  ;;  %2433 = vst [vmem:[#allocation1] ss:$9 sm:$0xff] %v278_v10  ;;  %v15305_v23 = vld [vmem:[%s16106_s8 + $0x1428] sm:$0xff] }
 0x29d   : > { %9746 = vmatpush.bf16.msra.mxu3 %v15260_v25  ;;  %9708 = vmatmul.bf16.vlgmr.msra.gmra.mxu0 %v2424_v30  ;;  %v9515_v49 = vadd.f32 %v9514_v46, %v9502_v43  ;;  %v15313_v24 = vld [vmem:[%s16106_s8 + $0x1468] sm:$0xff]  ;;  %v15312_v30 = vld [vmem:[%s16106_s8 + $0x1460] sm:$0xff] }
 0x29e   : > { %9752 = vmatpush.bf16.msrb.mxu0 %v15275_v26  ;;  %9721 = vmatmul.bf16.vlgmr.msra.gmra.mxu1 %v2425_v32  ;;  %v15321_v25 = vld [vmem:[%s16106_s8 + $0x14a8] sm:$0xff]  ;;  %v15320_v32 = vld [vmem:[%s16106_s8 + $0x14a0] sm:$0xff] }
 0x29f   : > { %9765 = vmatpush.bf16.msrb.mxu1 %v15283_v27  ;;  %9734 = vmatmul.bf16.vlgmr.msra.gmra.mxu2 %v2426_v31  ;;  %v15329_v26 = vld [vmem:[%s16106_s8 + $0x14e8] sm:$0xff] }
 0x2a0   : > { %9778 = vmatpush.bf16.msrb.mxu2 %v15291_v28  ;;  %9747 = vmatmul.bf16.vlgmr.msra.gmra.mxu3 %v2427_v33  ;;  %v15328_v33 = vld [vmem:[%s16106_s8 + $0x14e0] sm:$0xff]  ;;  %v15361_v10 = vld [vmem:[%s16106_s8 + $0x15e8] sm:$0xff] }
 0x2a1   : > { %9791 = vmatpush.bf16.msrb.mxu3 %v15299_v29  ;;  %v15304_v29 = vld [vmem:[%s16106_s8 + $0x1420] sm:$0xff] }
 0x2a2   : > { %9753 = vmatpush.bf16.msrb.mxu0 %v15274_v34  ;;  %v9527_v54 = vpop.f32.mrf.mxu2  ;;  %v9503_v57 = vpop.f32.mrf.mxu0 }
 0x2a3   : > { %9766 = vmatpush.bf16.msrb.mxu1 %v15282_v35  ;;  %v9528_v55 = vadd.f32 %v9527_v54, %v9515_v49  ;;  %v9540_v56 = vpop.f32.mrf.mxu3  ;;  %v9516_v61 = vpop.f32.mrf.mxu1  ;;  %v15303_v35 = vld [vmem:[%s16106_s8 + $0x1418] sm:$0xff]  ;;  %v15301_v49 = vld [vmem:[%s16106_s8 + $0x1408] sm:$0xff]  ;;  %v15316_v57 = vld [vmem:[%s16106_s8 + $0x1480] sm:$0xff] }
 0x2a4   : > { %9779 = vmatpush.bf16.msrb.mxu2 %v15290_v36  ;;  %v15311_v36 = vld [vmem:[%s16106_s8 + $0x1458] sm:$0xff] }
 0x2a5   : > { %9792 = vmatpush.bf16.msrb.mxu3 %v15298_v37  ;;  %v16792_v58 = vadd.f32 %v9540_v56, %v9528_v55  ;;  %v15319_v37 = vld [vmem:[%s16106_s8 + $0x1498] sm:$0xff]  ;;  %v15300_v55 = vld [vmem:[%s16106_s8 + $0x1400] sm:$0xff] }
 0x2a6   : > { %9754 = vmatpush.bf16.msrb.mxu0 %v15273_v38  ;;  %v15327_v38 = vld [vmem:[%s16106_s8 + $0x14d8] sm:$0xff]  ;;  %v15308_v56 = vld [vmem:[%s16106_s8 + $0x1440] sm:$0xff] }
 0x2a7   : > { %9767 = vmatpush.bf16.msrb.mxu1 %v15281_v39  ;;  %v15355_v61 = vld [vmem:[%s16106_s8 + $0x15b8] sm:$0xff] }
 0x2a8   : > { %9780 = vmatpush.bf16.msrb.mxu2 %v15289_v40 }
 0x2a9   : > { %9793 = vmatpush.bf16.msrb.mxu3 %v15297_v41 }
 0x2aa   : > { %9755 = vmatpush.bf16.msrb.mxu0 %v15272_v44  ;;  %v9529_v6 = vpop.f32.mrf.mxu2  ;;  %v15302_v44 = vld [vmem:[%s16106_s8 + $0x1410] sm:$0xff] }
 0x2ab   : > { %9768 = vmatpush.bf16.msrb.mxu1 %v15280_v45  ;;  %v9542_v9 = vpop.f32.mrf.mxu3  ;;  %v15310_v45 = vld [vmem:[%s16106_s8 + $0x1450] sm:$0xff] }
 0x2ac   : > { %9781 = vmatpush.bf16.msrb.mxu2 %v15288_v47  ;;  %v15318_v47 = vld [vmem:[%s16106_s8 + $0x1490] sm:$0xff]  ;;  %v15353_v9 = vld [vmem:[%s16106_s8 + $0x15a8] sm:$0xff] }
 0x2ad   : > { %9794 = vmatpush.bf16.msrb.mxu3 %v15296_v48  ;;  %v15326_v48 = vld [vmem:[%s16106_s8 + $0x14d0] sm:$0xff] }
 0x2ae   : > { %9756 = vmatpush.bf16.msrb.mxu0 %v15271_v50  ;;  %v15309_v50 = vld [vmem:[%s16106_s8 + $0x1448] sm:$0xff]  ;;  %v15362_v6 = vld [vmem:[%s16106_s8 + $0x15f0] sm:$0xff] }
 0x2af   : > { %9769 = vmatpush.bf16.msrb.mxu1 %v15279_v51  ;;  %v15317_v51 = vld [vmem:[%s16106_s8 + $0x1488] sm:$0xff] }
 0x2b0   : > { %9782 = vmatpush.bf16.msrb.mxu2 %v15287_v52  ;;  %v15325_v52 = vld [vmem:[%s16106_s8 + $0x14c8] sm:$0xff] }
 0x2b1   : > { %9795 = vmatpush.bf16.msrb.mxu3 %v15295_v53 }
 0x2b2   : > { %9757 = vmatpush.bf16.msrb.mxu0 %v15270_v59  ;;  %v15339_v59 = vld [vmem:[%s16106_s8 + $0x1538] sm:$0xff] }
 0x2b3   : > { %9770 = vmatpush.bf16.msrb.mxu1 %v15278_v60  ;;  %v15347_v60 = vld [vmem:[%s16106_s8 + $0x1578] sm:$0xff] }
 0x2b4   : > { %9783 = vmatpush.bf16.msrb.mxu2 %v15286_v62  ;;  %v15363_v62 = vld [vmem:[%s16106_s8 + $0x15f8] sm:$0xff] }
 0x2b5   : > { %9796 = vmatpush.bf16.msrb.mxu3 %v15294_v63  ;;  %v2434_v63 = vld [vmem:[#allocation1] sm:$0xff] }
 0x2b6   : > { %9758 = vmatpush.bf16.msrb.mxu0 %v15269_v0  ;;  %v2436_v0 = vld [vmem:[#allocation1 + $0x12] sm:$0xff] }
 0x2b7   : > { %9771 = vmatpush.bf16.msrb.mxu1 %v15277_v1  ;;  %v2435_v1 = vld [vmem:[#allocation1 + $0x9] sm:$0xff] }
 0x2b8   : > { %9784 = vmatpush.bf16.msrb.mxu2 %v15285_v2  ;;  %v2437_v2 = vld [vmem:[#allocation1 + $0x1b] sm:$0xff] }
 0x2b9   : > { %9797 = vmatpush.bf16.msrb.mxu3 %v15293_v3  ;;  %v15338_v3 = vld [vmem:[%s16106_s8 + $0x1530] sm:$0xff] }
 0x2ba   : > { %9759 = vmatpush.bf16.msrb.mxu0 %v15268_v11  ;;  %v9553_v27 = vpop.f32.mrf.mxu0 }
 0x2bb   : > { %9772 = vmatpush.bf16.msrb.mxu1 %v15276_v12  ;;  %v9554_v28 = vadd.f32 %v9553_v27, %v16792_v58  ;;  %v9566_v31 = vpop.f32.mrf.mxu1  ;;  %v15324_v58 = vld [vmem:[%s16106_s8 + $0x14c0] sm:$0xff] }
 0x2bc   : > { %9785 = vmatpush.bf16.msrb.mxu2 %v15284_v13  ;;  %v15336_v13 = vld [vmem:[%s16106_s8 + $0x1520] sm:$0xff] }
 0x2bd   : > { %9798 = vmatpush.bf16.msrb.mxu3 %v15292_v14  ;;  %9760 = vmatmul.bf16.vlgmr.msrb.gmra.mxu0 %v2428_v4  ;;  %v9567_v34 = vadd.f32 %v9566_v31, %v9554_v28  ;;  %v15346_v4 = vld [vmem:[%s16106_s8 + $0x1570] sm:$0xff]  ;;  %v15344_v14 = vld [vmem:[%s16106_s8 + $0x1560] sm:$0xff] }
 0x2be   : > { %9804 = vmatpush.bf16.msra.mxu0 %v15307_v15  ;;  %9773 = vmatmul.bf16.vlgmr.msrb.gmra.mxu1 %v2429_v7  ;;  %v15337_v7 = vld [vmem:[%s16106_s8 + $0x1528] sm:$0xff]  ;;  %v15334_v28 = vld [vmem:[%s16106_s8 + $0x1510] sm:$0xff] }
 0x2bf   : > { %9817 = vmatpush.bf16.msra.mxu1 %v15315_v16  ;;  %9786 = vmatmul.bf16.vlgmr.msrb.gmra.mxu2 %v2430_v5  ;;  %v15354_v5 = vld [vmem:[%s16106_s8 + $0x15b0] sm:$0xff]  ;;  %v15352_v16 = vld [vmem:[%s16106_s8 + $0x15a0] sm:$0xff] }
 0x2c0   : > { %9830 = vmatpush.bf16.msra.mxu2 %v15323_v17  ;;  %9799 = vmatmul.bf16.vlgmr.msrb.gmra.mxu3 %v2431_v8  ;;  %v15345_v8 = vld [vmem:[%s16106_s8 + $0x1568] sm:$0xff]  ;;  %v15360_v17 = vld [vmem:[%s16106_s8 + $0x15e0] sm:$0xff]  ;;  %v15350_v31 = vld [vmem:[%s16106_s8 + $0x1590] sm:$0xff] }
 0x2c1   : > { %9843 = vmatpush.bf16.msra.mxu3 %v15331_v18 }
 0x2c2   : > { %9805 = vmatpush.bf16.msra.mxu0 %v15306_v19  ;;  %v9579_v39 = vpop.f32.mrf.mxu2  ;;  %v9555_v42 = vpop.f32.mrf.mxu0  ;;  %v15335_v19 = vld [vmem:[%s16106_s8 + $0x1518] sm:$0xff] }
 0x2c3   : > { %9818 = vmatpush.bf16.msra.mxu1 %v15314_v20  ;;  %v9580_v40 = vadd.f32 %v9579_v39, %v9567_v34  ;;  %v9592_v41 = vpop.f32.mrf.mxu3  ;;  %v9568_v46 = vpop.f32.mrf.mxu1  ;;  %v15343_v20 = vld [vmem:[%s16106_s8 + $0x1558] sm:$0xff]  ;;  %v15341_v34 = vld [vmem:[%s16106_s8 + $0x1548] sm:$0xff] }
 0x2c4   : > { %9831 = vmatpush.bf16.msra.mxu2 %v15322_v21  ;;  %v15351_v21 = vld [vmem:[%s16106_s8 + $0x1598] sm:$0xff]  ;;  %v15348_v46 = vld [vmem:[%s16106_s8 + $0x1580] sm:$0xff] }
 0x2c5   : > { %9844 = vmatpush.bf16.msra.mxu3 %v15330_v22  ;;  %v9593_v43 = vadd.f32 %v9592_v41, %v9580_v40  ;;  %v15359_v22 = vld [vmem:[%s16106_s8 + $0x15d8] sm:$0xff]  ;;  %v2439_v40 = vld [vmem:[#allocation1 + $0x2d] sm:$0xff] }
 0x2c6   : > { %9806 = vmatpush.bf16.msra.mxu0 %v15305_v23  ;;  %v2441_v41 = vld [vmem:[#allocation1 + $0x3f] sm:$0xff] }
 0x2c7   : > { %9819 = vmatpush.bf16.msra.mxu1 %v15313_v24 }
 0x2c8   : > { %9832 = vmatpush.bf16.msra.mxu2 %v15321_v25 }
 0x2c9   : > { %9845 = vmatpush.bf16.msra.mxu3 %v15329_v26 }
 0x2ca   : > { %9807 = vmatpush.bf16.msra.mxu0 %v15304_v29  ;;  %v9581_v53 = vpop.f32.mrf.mxu2  ;;  %v15342_v29 = vld [vmem:[%s16106_s8 + $0x1550] sm:$0xff] }
 0x2cb   : > { %9820 = vmatpush.bf16.msra.mxu1 %v15312_v30  ;;  %v9594_v54 = vpop.f32.mrf.mxu3  ;;  %v15378_v53 = vld [vmem:[%s16106_s8 + $0x1670] sm:$0xff] }
 0x2cc   : > { %9833 = vmatpush.bf16.msra.mxu2 %v15320_v32  ;;  %v15358_v32 = vld [vmem:[%s16106_s8 + $0x15d0] sm:$0xff] }
 0x2cd   : > { %9846 = vmatpush.bf16.msra.mxu3 %v15328_v33  ;;  %v15333_v33 = vld [vmem:[%s16106_s8 + $0x1508] sm:$0xff]  ;;  %v15386_v54 = vld [vmem:[%s16106_s8 + $0x16b0] sm:$0xff] }
 0x2ce   : > { %9808 = vmatpush.bf16.msra.mxu0 %v15303_v35  ;;  %v15349_v35 = vld [vmem:[%s16106_s8 + $0x1588] sm:$0xff] }
 0x2cf   : > { %9821 = vmatpush.bf16.msra.mxu1 %v15311_v36  ;;  %v15357_v36 = vld [vmem:[%s16106_s8 + $0x15c8] sm:$0xff] }
 0x2d0   : > { %9834 = vmatpush.bf16.msra.mxu2 %v15319_v37  ;;  %v2438_v37 = vld [vmem:[#allocation1 + $0x24] sm:$0xff] }
 0x2d1   : > { %9847 = vmatpush.bf16.msra.mxu3 %v15327_v38  ;;  %v2440_v38 = vld [vmem:[#allocation1 + $0x36] sm:$0xff] }
 0x2d2   : > { %9809 = vmatpush.bf16.msra.mxu0 %v15302_v44  ;;  %v15332_v44 = vld [vmem:[%s16106_s8 + $0x1500] sm:$0xff] }
 0x2d3   : > { %9822 = vmatpush.bf16.msra.mxu1 %v15310_v45  ;;  %v15340_v45 = vld [vmem:[%s16106_s8 + $0x1540] sm:$0xff] }
 0x2d4   : > { %9835 = vmatpush.bf16.msra.mxu2 %v15318_v47  ;;  %v15356_v47 = vld [vmem:[%s16106_s8 + $0x15c0] sm:$0xff] }
 0x2d5   : > { %9848 = vmatpush.bf16.msra.mxu3 %v15326_v48  ;;  %v15371_v48 = vld [vmem:[%s16106_s8 + $0x1638] sm:$0xff] }
 0x2d6   : > { %9810 = vmatpush.bf16.msra.mxu0 %v15301_v49  ;;  %v15379_v49 = vld [vmem:[%s16106_s8 + $0x1678] sm:$0xff] }
 0x2d7   : > { %9823 = vmatpush.bf16.msra.mxu1 %v15309_v50  ;;  %v15387_v50 = vld [vmem:[%s16106_s8 + $0x16b8] sm:$0xff] }
 0x2d8   : > { %9836 = vmatpush.bf16.msra.mxu2 %v15317_v51  ;;  %v15395_v51 = vld [vmem:[%s16106_s8 + $0x16f8] sm:$0xff] }
 0x2d9   : > { %9849 = vmatpush.bf16.msra.mxu3 %v15325_v52  ;;  %v15370_v52 = vld [vmem:[%s16106_s8 + $0x1630] sm:$0xff] }
 0x2da   : > { %9811 = vmatpush.bf16.msra.mxu0 %v15300_v55  ;;  %v9605_v11 = vpop.f32.mrf.mxu0  ;;  %v15394_v55 = vld [vmem:[%s16106_s8 + $0x16f0] sm:$0xff] }
 0x2db   : > { %9824 = vmatpush.bf16.msra.mxu1 %v15308_v56  ;;  %v9606_v12 = vadd.f32 %v9605_v11, %v9593_v43  ;;  %v9618_v15 = vpop.f32.mrf.mxu1  ;;  %v279_v43 = vld [vmem:[%s16125_s27 + $0x58] sm:$0xff] }
 0x2dc   : > { %9837 = vmatpush.bf16.msra.mxu2 %v15316_v57  ;;  %2443 = vst [vmem:[#allocation1] ss:$9 sm:$0xff] %v279_v43  ;;  %v15369_v56 = vld [vmem:[%s16106_s8 + $0x1628] sm:$0xff] }
 0x2dd   : > { %9850 = vmatpush.bf16.msra.mxu3 %v15324_v58  ;;  %9812 = vmatmul.bf16.vlgmr.msra.gmra.mxu0 %v2434_v63  ;;  %v9619_v18 = vadd.f32 %v9618_v15, %v9606_v12  ;;  %v15377_v57 = vld [vmem:[%s16106_s8 + $0x1668] sm:$0xff]  ;;  %v15376_v63 = vld [vmem:[%s16106_s8 + $0x1660] sm:$0xff] }
 0x2de   : > { %9856 = vmatpush.bf16.msrb.mxu0 %v15339_v59  ;;  %9825 = vmatmul.bf16.vlgmr.msra.gmra.mxu1 %v2435_v1  ;;  %v15385_v58 = vld [vmem:[%s16106_s8 + $0x16a8] sm:$0xff]  ;;  %v15384_v1 = vld [vmem:[%s16106_s8 + $0x16a0] sm:$0xff] }
 0x2df   : > { %9869 = vmatpush.bf16.msrb.mxu1 %v15347_v60  ;;  %9838 = vmatmul.bf16.vlgmr.msra.gmra.mxu2 %v2436_v0  ;;  %v15393_v59 = vld [vmem:[%s16106_s8 + $0x16e8] sm:$0xff] }
 0x2e0   : > { %9882 = vmatpush.bf16.msrb.mxu2 %v15355_v61  ;;  %9851 = vmatmul.bf16.vlgmr.msra.gmra.mxu3 %v2437_v2  ;;  %v15392_v2 = vld [vmem:[%s16106_s8 + $0x16e0] sm:$0xff]  ;;  %v15425_v43 = vld [vmem:[%s16106_s8 + $0x17e8] sm:$0xff] }
 0x2e1   : > { %9895 = vmatpush.bf16.msrb.mxu3 %v15363_v62  ;;  %v15368_v62 = vld [vmem:[%s16106_s8 + $0x1620] sm:$0xff] }
 0x2e2   : > { %9857 = vmatpush.bf16.msrb.mxu0 %v15338_v3  ;;  %v9631_v23 = vpop.f32.mrf.mxu2  ;;  %v9607_v26 = vpop.f32.mrf.mxu0 }
 0x2e3   : > { %9870 = vmatpush.bf16.msrb.mxu1 %v15346_v4  ;;  %v9632_v24 = vadd.f32 %v9631_v23, %v9619_v18  ;;  %v9644_v25 = vpop.f32.mrf.mxu3  ;;  %v9620_v30 = vpop.f32.mrf.mxu1  ;;  %v15367_v4 = vld [vmem:[%s16106_s8 + $0x1618] sm:$0xff]  ;;  %v15365_v18 = vld [vmem:[%s16106_s8 + $0x1608] sm:$0xff]  ;;  %v15380_v26 = vld [vmem:[%s16106_s8 + $0x1680] sm:$0xff] }
 0x2e4   : > { %9883 = vmatpush.bf16.msrb.mxu2 %v15354_v5  ;;  %v15375_v5 = vld [vmem:[%s16106_s8 + $0x1658] sm:$0xff] }
 0x2e5   : > { %9896 = vmatpush.bf16.msrb.mxu3 %v15362_v6  ;;  %v16860_v27 = vadd.f32 %v9644_v25, %v9632_v24  ;;  %v15383_v6 = vld [vmem:[%s16106_s8 + $0x1698] sm:$0xff]  ;;  %v15364_v24 = vld [vmem:[%s16106_s8 + $0x1600] sm:$0xff] }
 0x2e6   : > { %9858 = vmatpush.bf16.msrb.mxu0 %v15337_v7  ;;  %v15391_v7 = vld [vmem:[%s16106_s8 + $0x16d8] sm:$0xff]  ;;  %v15372_v25 = vld [vmem:[%s16106_s8 + $0x1640] sm:$0xff] }
 0x2e7   : > { %9871 = vmatpush.bf16.msrb.mxu1 %v15345_v8  ;;  %v15419_v30 = vld [vmem:[%s16106_s8 + $0x17b8] sm:$0xff] }
 0x2e8   : > { %9884 = vmatpush.bf16.msrb.mxu2 %v15353_v9 }
 0x2e9   : > { %9897 = vmatpush.bf16.msrb.mxu3 %v15361_v10 }
 0x2ea   : > { %9859 = vmatpush.bf16.msrb.mxu0 %v15336_v13  ;;  %v9633_v39 = vpop.f32.mrf.mxu2  ;;  %v15366_v13 = vld [vmem:[%s16106_s8 + $0x1610] sm:$0xff] }
 0x2eb   : > { %9872 = vmatpush.bf16.msrb.mxu1 %v15344_v14  ;;  %v9646_v42 = vpop.f32.mrf.mxu3  ;;  %v15374_v14 = vld [vmem:[%s16106_s8 + $0x1650] sm:$0xff] }
 0x2ec   : > { %9885 = vmatpush.bf16.msrb.mxu2 %v15352_v16  ;;  %v15382_v16 = vld [vmem:[%s16106_s8 + $0x1690] sm:$0xff]  ;;  %v15417_v42 = vld [vmem:[%s16106_s8 + $0x17a8] sm:$0xff] }
 0x2ed   : > { %9898 = vmatpush.bf16.msrb.mxu3 %v15360_v17  ;;  %v15390_v17 = vld [vmem:[%s16106_s8 + $0x16d0] sm:$0xff] }
 0x2ee   : > { %9860 = vmatpush.bf16.msrb.mxu0 %v15335_v19  ;;  %v15373_v19 = vld [vmem:[%s16106_s8 + $0x1648] sm:$0xff]  ;;  %v15426_v39 = vld [vmem:[%s16106_s8 + $0x17f0] sm:$0xff] }
 0x2ef   : > { %9873 = vmatpush.bf16.msrb.mxu1 %v15343_v20  ;;  %v15381_v20 = vld [vmem:[%s16106_s8 + $0x1688] sm:$0xff] }
 0x2f0   : > { %9886 = vmatpush.bf16.msrb.mxu2 %v15351_v21  ;;  %v15389_v21 = vld [vmem:[%s16106_s8 + $0x16c8] sm:$0xff] }
 0x2f1   : > { %9899 = vmatpush.bf16.msrb.mxu3 %v15359_v22 }
 0x2f2   : > { %9861 = vmatpush.bf16.msrb.mxu0 %v15334_v28  ;;  %v15403_v28 = vld [vmem:[%s16106_s8 + $0x1738] sm:$0xff] }
 0x2f3   : > { %9874 = vmatpush.bf16.msrb.mxu1 %v15342_v29  ;;  %v15411_v29 = vld [vmem:[%s16106_s8 + $0x1778] sm:$0xff] }
 0x2f4   : > { %9887 = vmatpush.bf16.msrb.mxu2 %v15350_v31  ;;  %v15427_v31 = vld [vmem:[%s16106_s8 + $0x17f8] sm:$0xff] }
 0x2f5   : > { %9900 = vmatpush.bf16.msrb.mxu3 %v15358_v32  ;;  %v2444_v32 = vld [vmem:[#allocation1] sm:$0xff] }
 0x2f6   : > { %9862 = vmatpush.bf16.msrb.mxu0 %v15333_v33  ;;  %v2446_v33 = vld [vmem:[#allocation1 + $0x12] sm:$0xff] }
 0x2f7   : > { %9875 = vmatpush.bf16.msrb.mxu1 %v15341_v34  ;;  %v2445_v34 = vld [vmem:[#allocation1 + $0x9] sm:$0xff] }
 0x2f8   : > { %9888 = vmatpush.bf16.msrb.mxu2 %v15349_v35  ;;  %v2447_v35 = vld [vmem:[#allocation1 + $0x1b] sm:$0xff] }
 0x2f9   : > { %9901 = vmatpush.bf16.msrb.mxu3 %v15357_v36  ;;  %v15402_v36 = vld [vmem:[%s16106_s8 + $0x1730] sm:$0xff] }
 0x2fa   : > { %9863 = vmatpush.bf16.msrb.mxu0 %v15332_v44  ;;  %v9657_v60 = vpop.f32.mrf.mxu0 }
 0x2fb   : > { %9876 = vmatpush.bf16.msrb.mxu1 %v15340_v45  ;;  %v9658_v61 = vadd.f32 %v9657_v60, %v16860_v27  ;;  %v9670_v0 = vpop.f32.mrf.mxu1  ;;  %v15388_v27 = vld [vmem:[%s16106_s8 + $0x16c0] sm:$0xff] }
 0x2fc   : > { %9889 = vmatpush.bf16.msrb.mxu2 %v15348_v46  ;;  %v15400_v46 = vld [vmem:[%s16106_s8 + $0x1720] sm:$0xff] }
 0x2fd   : > { %9902 = vmatpush.bf16.msrb.mxu3 %v15356_v47  ;;  %9864 = vmatmul.bf16.vlgmr.msrb.gmra.mxu0 %v2438_v37  ;;  %v9671_v3 = vadd.f32 %v9670_v0, %v9658_v61  ;;  %v15410_v37 = vld [vmem:[%s16106_s8 + $0x1770] sm:$0xff]  ;;  %v15408_v47 = vld [vmem:[%s16106_s8 + $0x1760] sm:$0xff] }
 0x2fe   : > { %9908 = vmatpush.bf16.msra.mxu0 %v15371_v48  ;;  %9877 = vmatmul.bf16.vlgmr.msrb.gmra.mxu1 %v2439_v40  ;;  %v15401_v40 = vld [vmem:[%s16106_s8 + $0x1728] sm:$0xff]  ;;  %v15398_v61 = vld [vmem:[%s16106_s8 + $0x1710] sm:$0xff] }
 0x2ff   : > { %9921 = vmatpush.bf16.msra.mxu1 %v15379_v49  ;;  %9890 = vmatmul.bf16.vlgmr.msrb.gmra.mxu2 %v2440_v38  ;;  %v15418_v38 = vld [vmem:[%s16106_s8 + $0x17b0] sm:$0xff]  ;;  %v15416_v49 = vld [vmem:[%s16106_s8 + $0x17a0] sm:$0xff] }
 0x300   : > { %9934 = vmatpush.bf16.msra.mxu2 %v15387_v50  ;;  %9903 = vmatmul.bf16.vlgmr.msrb.gmra.mxu3 %v2441_v41  ;;  %v15409_v41 = vld [vmem:[%s16106_s8 + $0x1768] sm:$0xff]  ;;  %v15424_v50 = vld [vmem:[%s16106_s8 + $0x17e0] sm:$0xff]  ;;  %v15414_v0 = vld [vmem:[%s16106_s8 + $0x1790] sm:$0xff] }
 0x301   : > { %9947 = vmatpush.bf16.msra.mxu3 %v15395_v51 }
 0x302   : > { %9909 = vmatpush.bf16.msra.mxu0 %v15370_v52  ;;  %v9683_v8 = vpop.f32.mrf.mxu2  ;;  %v9659_v11 = vpop.f32.mrf.mxu0  ;;  %v15399_v52 = vld [vmem:[%s16106_s8 + $0x1718] sm:$0xff] }
 0x303   : > { %9922 = vmatpush.bf16.msra.mxu1 %v15378_v53  ;;  %v9684_v9 = vadd.f32 %v9683_v8, %v9671_v3  ;;  %v9696_v10 = vpop.f32.mrf.mxu3  ;;  %v9672_v15 = vpop.f32.mrf.mxu1  ;;  %v15407_v53 = vld [vmem:[%s16106_s8 + $0x1758] sm:$0xff]  ;;  %v15405_v3 = vld [vmem:[%s16106_s8 + $0x1748] sm:$0xff] }
 0x304   : > { %9935 = vmatpush.bf16.msra.mxu2 %v15386_v54  ;;  %v15415_v54 = vld [vmem:[%s16106_s8 + $0x1798] sm:$0xff]  ;;  %v15412_v15 = vld [vmem:[%s16106_s8 + $0x1780] sm:$0xff] }
 0x305   : > { %9948 = vmatpush.bf16.msra.mxu3 %v15394_v55  ;;  %v9697_v12 = vadd.f32 %v9696_v10, %v9684_v9  ;;  %v15423_v55 = vld [vmem:[%s16106_s8 + $0x17d8] sm:$0xff]  ;;  %v2449_v9 = vld [vmem:[#allocation1 + $0x2d] sm:$0xff] }
 0x306   : > { %9910 = vmatpush.bf16.msra.mxu0 %v15369_v56  ;;  %v2451_v10 = vld [vmem:[#allocation1 + $0x3f] sm:$0xff] }
 0x307   : > { %9923 = vmatpush.bf16.msra.mxu1 %v15377_v57 }
 0x308   : > { %9936 = vmatpush.bf16.msra.mxu2 %v15385_v58 }
 0x309   : > { %9949 = vmatpush.bf16.msra.mxu3 %v15393_v59 }
 0x30a   : > { %9911 = vmatpush.bf16.msra.mxu0 %v15368_v62  ;;  %v9685_v22 = vpop.f32.mrf.mxu2  ;;  %v15406_v62 = vld [vmem:[%s16106_s8 + $0x1750] sm:$0xff] }
 0x30b   : > { %9924 = vmatpush.bf16.msra.mxu1 %v15376_v63  ;;  %v9698_v23 = vpop.f32.mrf.mxu3  ;;  %v15442_v22 = vld [vmem:[%s16106_s8 + $0x1870] sm:$0xff] }
 0x30c   : > { %9937 = vmatpush.bf16.msra.mxu2 %v15384_v1  ;;  %v15422_v1 = vld [vmem:[%s16106_s8 + $0x17d0] sm:$0xff] }
 0x30d   : > { %9950 = vmatpush.bf16.msra.mxu3 %v15392_v2  ;;  %v15397_v2 = vld [vmem:[%s16106_s8 + $0x1708] sm:$0xff]  ;;  %v15450_v23 = vld [vmem:[%s16106_s8 + $0x18b0] sm:$0xff] }
 0x30e   : > { %9912 = vmatpush.bf16.msra.mxu0 %v15367_v4  ;;  %v15413_v4 = vld [vmem:[%s16106_s8 + $0x1788] sm:$0xff] }
 0x30f   : > { %9925 = vmatpush.bf16.msra.mxu1 %v15375_v5  ;;  %v15421_v5 = vld [vmem:[%s16106_s8 + $0x17c8] sm:$0xff] }
 0x310   : > { %9938 = vmatpush.bf16.msra.mxu2 %v15383_v6  ;;  %v2448_v6 = vld [vmem:[#allocation1 + $0x24] sm:$0xff] }
 0x311   : > { %9951 = vmatpush.bf16.msra.mxu3 %v15391_v7  ;;  %v2450_v7 = vld [vmem:[#allocation1 + $0x36] sm:$0xff] }
 0x312   : > { %9913 = vmatpush.bf16.msra.mxu0 %v15366_v13  ;;  %v15396_v13 = vld [vmem:[%s16106_s8 + $0x1700] sm:$0xff] }
 0x313   : > { %9926 = vmatpush.bf16.msra.mxu1 %v15374_v14  ;;  %v15404_v14 = vld [vmem:[%s16106_s8 + $0x1740] sm:$0xff] }
 0x314   : > { %9939 = vmatpush.bf16.msra.mxu2 %v15382_v16  ;;  %v15420_v16 = vld [vmem:[%s16106_s8 + $0x17c0] sm:$0xff] }
 0x315   : > { %9952 = vmatpush.bf16.msra.mxu3 %v15390_v17  ;;  %v15435_v17 = vld [vmem:[%s16106_s8 + $0x1838] sm:$0xff] }
 0x316   : > { %9914 = vmatpush.bf16.msra.mxu0 %v15365_v18  ;;  %v15443_v18 = vld [vmem:[%s16106_s8 + $0x1878] sm:$0xff] }
 0x317   : > { %9927 = vmatpush.bf16.msra.mxu1 %v15373_v19  ;;  %v15451_v19 = vld [vmem:[%s16106_s8 + $0x18b8] sm:$0xff] }
 0x318   : > { %9940 = vmatpush.bf16.msra.mxu2 %v15381_v20  ;;  %v15459_v20 = vld [vmem:[%s16106_s8 + $0x18f8] sm:$0xff] }
 0x319   : > { %9953 = vmatpush.bf16.msra.mxu3 %v15389_v21  ;;  %v15434_v21 = vld [vmem:[%s16106_s8 + $0x1830] sm:$0xff] }
 0x31a   : > { %9915 = vmatpush.bf16.msra.mxu0 %v15364_v24  ;;  %v9709_v44 = vpop.f32.mrf.mxu0  ;;  %v15458_v24 = vld [vmem:[%s16106_s8 + $0x18f0] sm:$0xff] }
 0x31b   : > { %9928 = vmatpush.bf16.msra.mxu1 %v15372_v25  ;;  %v9710_v45 = vadd.f32 %v9709_v44, %v9697_v12  ;;  %v9722_v48 = vpop.f32.mrf.mxu1  ;;  %v280_v12 = vld [vmem:[%s16125_s27 + $0x60] sm:$0xff]  ;;  %v15433_v25 = vld [vmem:[%s16106_s8 + $0x1828] sm:$0xff] }
 0x31c   : > { %9941 = vmatpush.bf16.msra.mxu2 %v15380_v26  ;;  %2453 = vst [vmem:[#allocation1] ss:$9 sm:$0xff] %v280_v12  ;;  %v15441_v26 = vld [vmem:[%s16106_s8 + $0x1868] sm:$0xff] }
 0x31d   : > { %9954 = vmatpush.bf16.msra.mxu3 %v15388_v27  ;;  %9916 = vmatmul.bf16.vlgmr.msra.gmra.mxu0 %v2444_v32  ;;  %v9723_v51 = vadd.f32 %v9722_v48, %v9710_v45  ;;  %v15449_v27 = vld [vmem:[%s16106_s8 + $0x18a8] sm:$0xff]  ;;  %v15440_v32 = vld [vmem:[%s16106_s8 + $0x1860] sm:$0xff] }
 0x31e   : > { %9960 = vmatpush.bf16.msrb.mxu0 %v15403_v28  ;;  %9929 = vmatmul.bf16.vlgmr.msra.gmra.mxu1 %v2445_v34  ;;  %v15457_v28 = vld [vmem:[%s16106_s8 + $0x18e8] sm:$0xff]  ;;  %v15448_v34 = vld [vmem:[%s16106_s8 + $0x18a0] sm:$0xff] }
 0x31f   : > { %9973 = vmatpush.bf16.msrb.mxu1 %v15411_v29  ;;  %9942 = vmatmul.bf16.vlgmr.msra.gmra.mxu2 %v2446_v33  ;;  %v15489_v12 = vld [vmem:[%s16106_s8 + $0x19e8] sm:$0xff] }
 0x320   : > { %9986 = vmatpush.bf16.msrb.mxu2 %v15419_v30  ;;  %9955 = vmatmul.bf16.vlgmr.msra.gmra.mxu3 %v2447_v35  ;;  %v15456_v35 = vld [vmem:[%s16106_s8 + $0x18e0] sm:$0xff] }
 0x321   : > { %9999 = vmatpush.bf16.msrb.mxu3 %v15427_v31  ;;  %v15432_v31 = vld [vmem:[%s16106_s8 + $0x1820] sm:$0xff] }
 0x322   : > { %9961 = vmatpush.bf16.msrb.mxu0 %v15402_v36  ;;  %v9735_v56 = vpop.f32.mrf.mxu2  ;;  %v9711_v59 = vpop.f32.mrf.mxu0 }
 0x323   : > { %9974 = vmatpush.bf16.msrb.mxu1 %v15410_v37  ;;  %v9736_v57 = vadd.f32 %v9735_v56, %v9723_v51  ;;  %v9748_v58 = vpop.f32.mrf.mxu3  ;;  %v9724_v63 = vpop.f32.mrf.mxu1  ;;  %v15431_v37 = vld [vmem:[%s16106_s8 + $0x1818] sm:$0xff]  ;;  %v15429_v51 = vld [vmem:[%s16106_s8 + $0x1808] sm:$0xff]  ;;  %v15444_v59 = vld [vmem:[%s16106_s8 + $0x1880] sm:$0xff] }
 0x324   : > { %9987 = vmatpush.bf16.msrb.mxu2 %v15418_v38  ;;  %v15439_v38 = vld [vmem:[%s16106_s8 + $0x1858] sm:$0xff] }
 0x325   : > { %10000 = vmatpush.bf16.msrb.mxu3 %v15426_v39  ;;  %v16928_v60 = vadd.f32 %v9748_v58, %v9736_v57  ;;  %v15447_v39 = vld [vmem:[%s16106_s8 + $0x1898] sm:$0xff]  ;;  %v15428_v57 = vld [vmem:[%s16106_s8 + $0x1800] sm:$0xff] }
 0x326   : > { %9962 = vmatpush.bf16.msrb.mxu0 %v15401_v40  ;;  %v15455_v40 = vld [vmem:[%s16106_s8 + $0x18d8] sm:$0xff]  ;;  %v15436_v58 = vld [vmem:[%s16106_s8 + $0x1840] sm:$0xff] }
 0x327   : > { %9975 = vmatpush.bf16.msrb.mxu1 %v15409_v41  ;;  %v15483_v63 = vld [vmem:[%s16106_s8 + $0x19b8] sm:$0xff] }
 0x328   : > { %9988 = vmatpush.bf16.msrb.mxu2 %v15417_v42 }
 0x329   : > { %10001 = vmatpush.bf16.msrb.mxu3 %v15425_v43 }
 0x32a   : > { %9963 = vmatpush.bf16.msrb.mxu0 %v15400_v46  ;;  %v9737_v8 = vpop.f32.mrf.mxu2  ;;  %v15430_v46 = vld [vmem:[%s16106_s8 + $0x1810] sm:$0xff] }
 0x32b   : > { %9976 = vmatpush.bf16.msrb.mxu1 %v15408_v47  ;;  %v9750_v11 = vpop.f32.mrf.mxu3  ;;  %v15438_v47 = vld [vmem:[%s16106_s8 + $0x1850] sm:$0xff] }
 0x32c   : > { %9989 = vmatpush.bf16.msrb.mxu2 %v15416_v49  ;;  %v15446_v49 = vld [vmem:[%s16106_s8 + $0x1890] sm:$0xff]  ;;  %v15481_v11 = vld [vmem:[%s16106_s8 + $0x19a8] sm:$0xff] }
 0x32d   : > { %10002 = vmatpush.bf16.msrb.mxu3 %v15424_v50  ;;  %v15454_v50 = vld [vmem:[%s16106_s8 + $0x18d0] sm:$0xff] }
 0x32e   : > { %9964 = vmatpush.bf16.msrb.mxu0 %v15399_v52  ;;  %v15437_v52 = vld [vmem:[%s16106_s8 + $0x1848] sm:$0xff]  ;;  %v15490_v8 = vld [vmem:[%s16106_s8 + $0x19f0] sm:$0xff] }
 0x32f   : > { %9977 = vmatpush.bf16.msrb.mxu1 %v15407_v53  ;;  %v15445_v53 = vld [vmem:[%s16106_s8 + $0x1888] sm:$0xff] }
 0x330   : > { %9990 = vmatpush.bf16.msrb.mxu2 %v15415_v54  ;;  %v15453_v54 = vld [vmem:[%s16106_s8 + $0x18c8] sm:$0xff] }
 0x331   : > { %10003 = vmatpush.bf16.msrb.mxu3 %v15423_v55 }
 0x332   : > { %9965 = vmatpush.bf16.msrb.mxu0 %v15398_v61  ;;  %v15467_v61 = vld [vmem:[%s16106_s8 + $0x1938] sm:$0xff] }
 0x333   : > { %9978 = vmatpush.bf16.msrb.mxu1 %v15406_v62  ;;  %v15475_v62 = vld [vmem:[%s16106_s8 + $0x1978] sm:$0xff] }
 0x334   : > { %9991 = vmatpush.bf16.msrb.mxu2 %v15414_v0  ;;  %v15491_v0 = vld [vmem:[%s16106_s8 + $0x19f8] sm:$0xff] }
 0x335   : > { %10004 = vmatpush.bf16.msrb.mxu3 %v15422_v1  ;;  %v2454_v1 = vld [vmem:[#allocation1] sm:$0xff] }
 0x336   : > { %9966 = vmatpush.bf16.msrb.mxu0 %v15397_v2  ;;  %v2456_v2 = vld [vmem:[#allocation1 + $0x12] sm:$0xff] }
 0x337   : > { %9979 = vmatpush.bf16.msrb.mxu1 %v15405_v3  ;;  %v2455_v3 = vld [vmem:[#allocation1 + $0x9] sm:$0xff] }
 0x338   : > { %9992 = vmatpush.bf16.msrb.mxu2 %v15413_v4  ;;  %v2457_v4 = vld [vmem:[#allocation1 + $0x1b] sm:$0xff] }
 0x339   : > { %10005 = vmatpush.bf16.msrb.mxu3 %v15421_v5  ;;  %v15466_v5 = vld [vmem:[%s16106_s8 + $0x1930] sm:$0xff] }
 0x33a   : > { %9967 = vmatpush.bf16.msrb.mxu0 %v15396_v13  ;;  %v9761_v29 = vpop.f32.mrf.mxu0 }
 0x33b   : > { %9980 = vmatpush.bf16.msrb.mxu1 %v15404_v14  ;;  %v9762_v30 = vadd.f32 %v9761_v29, %v16928_v60  ;;  %v9774_v33 = vpop.f32.mrf.mxu1  ;;  %v15452_v60 = vld [vmem:[%s16106_s8 + $0x18c0] sm:$0xff] }
 0x33c   : > { %9993 = vmatpush.bf16.msrb.mxu2 %v15412_v15  ;;  %v15464_v15 = vld [vmem:[%s16106_s8 + $0x1920] sm:$0xff] }
 0x33d   : > { %10006 = vmatpush.bf16.msrb.mxu3 %v15420_v16  ;;  %9968 = vmatmul.bf16.vlgmr.msrb.gmra.mxu0 %v2448_v6  ;;  %v9775_v36 = vadd.f32 %v9774_v33, %v9762_v30  ;;  %v15474_v6 = vld [vmem:[%s16106_s8 + $0x1970] sm:$0xff]  ;;  %v15472_v16 = vld [vmem:[%s16106_s8 + $0x1960] sm:$0xff] }
 0x33e   : > { %10012 = vmatpush.bf16.msra.mxu0 %v15435_v17  ;;  %9981 = vmatmul.bf16.vlgmr.msrb.gmra.mxu1 %v2449_v9  ;;  %v15465_v9 = vld [vmem:[%s16106_s8 + $0x1928] sm:$0xff]  ;;  %v15462_v30 = vld [vmem:[%s16106_s8 + $0x1910] sm:$0xff] }
 0x33f   : > { %10025 = vmatpush.bf16.msra.mxu1 %v15443_v18  ;;  %9994 = vmatmul.bf16.vlgmr.msrb.gmra.mxu2 %v2450_v7  ;;  %v15482_v7 = vld [vmem:[%s16106_s8 + $0x19b0] sm:$0xff]  ;;  %v15480_v18 = vld [vmem:[%s16106_s8 + $0x19a0] sm:$0xff] }
 0x340   : > { %10038 = vmatpush.bf16.msra.mxu2 %v15451_v19  ;;  %10007 = vmatmul.bf16.vlgmr.msrb.gmra.mxu3 %v2451_v10  ;;  %v15473_v10 = vld [vmem:[%s16106_s8 + $0x1968] sm:$0xff]  ;;  %v15488_v19 = vld [vmem:[%s16106_s8 + $0x19e0] sm:$0xff]  ;;  %v15478_v33 = vld [vmem:[%s16106_s8 + $0x1990] sm:$0xff] }
 0x341   : > { %10051 = vmatpush.bf16.msra.mxu3 %v15459_v20 }
 0x342   : > { %10013 = vmatpush.bf16.msra.mxu0 %v15434_v21  ;;  %v9787_v41 = vpop.f32.mrf.mxu2  ;;  %v9763_v44 = vpop.f32.mrf.mxu0  ;;  %v15463_v21 = vld [vmem:[%s16106_s8 + $0x1918] sm:$0xff] }
 0x343   : > { %10026 = vmatpush.bf16.msra.mxu1 %v15442_v22  ;;  %v9788_v42 = vadd.f32 %v9787_v41, %v9775_v36  ;;  %v9800_v43 = vpop.f32.mrf.mxu3  ;;  %v9776_v48 = vpop.f32.mrf.mxu1  ;;  %v15471_v22 = vld [vmem:[%s16106_s8 + $0x1958] sm:$0xff]  ;;  %v15469_v36 = vld [vmem:[%s16106_s8 + $0x1948] sm:$0xff] }
 0x344   : > { %10039 = vmatpush.bf16.msra.mxu2 %v15450_v23  ;;  %v15479_v23 = vld [vmem:[%s16106_s8 + $0x1998] sm:$0xff]  ;;  %v15476_v48 = vld [vmem:[%s16106_s8 + $0x1980] sm:$0xff] }
 0x345   : > { %10052 = vmatpush.bf16.msra.mxu3 %v15458_v24  ;;  %v9801_v45 = vadd.f32 %v9800_v43, %v9788_v42  ;;  %v15487_v24 = vld [vmem:[%s16106_s8 + $0x19d8] sm:$0xff]  ;;  %v2459_v42 = vld [vmem:[#allocation1 + $0x2d] sm:$0xff] }
 0x346   : > { %10014 = vmatpush.bf16.msra.mxu0 %v15433_v25  ;;  %v2461_v43 = vld [vmem:[#allocation1 + $0x3f] sm:$0xff] }
 0x347   : > { %10027 = vmatpush.bf16.msra.mxu1 %v15441_v26 }
 0x348   : > { %10040 = vmatpush.bf16.msra.mxu2 %v15449_v27 }
 0x349   : > { %10053 = vmatpush.bf16.msra.mxu3 %v15457_v28 }
 0x34a   : > { %10015 = vmatpush.bf16.msra.mxu0 %v15432_v31  ;;  %v9789_v55 = vpop.f32.mrf.mxu2  ;;  %v15470_v31 = vld [vmem:[%s16106_s8 + $0x1950] sm:$0xff] }
 0x34b   : > { %10028 = vmatpush.bf16.msra.mxu1 %v15440_v32  ;;  %v9802_v56 = vpop.f32.mrf.mxu3  ;;  %v15506_v55 = vld [vmem:[%s16106_s8 + $0x1a70] sm:$0xff] }
 0x34c   : > { %10041 = vmatpush.bf16.msra.mxu2 %v15448_v34  ;;  %v15486_v34 = vld [vmem:[%s16106_s8 + $0x19d0] sm:$0xff] }
 0x34d   : > { %10054 = vmatpush.bf16.msra.mxu3 %v15456_v35  ;;  %v15461_v35 = vld [vmem:[%s16106_s8 + $0x1908] sm:$0xff]  ;;  %v15514_v56 = vld [vmem:[%s16106_s8 + $0x1ab0] sm:$0xff] }
 0x34e   : > { %10016 = vmatpush.bf16.msra.mxu0 %v15431_v37  ;;  %v15477_v37 = vld [vmem:[%s16106_s8 + $0x1988] sm:$0xff] }
 0x34f   : > { %10029 = vmatpush.bf16.msra.mxu1 %v15439_v38  ;;  %v15485_v38 = vld [vmem:[%s16106_s8 + $0x19c8] sm:$0xff] }
 0x350   : > { %10042 = vmatpush.bf16.msra.mxu2 %v15447_v39  ;;  %v2458_v39 = vld [vmem:[#allocation1 + $0x24] sm:$0xff] }
 0x351   : > { %10055 = vmatpush.bf16.msra.mxu3 %v15455_v40  ;;  %v2460_v40 = vld [vmem:[#allocation1 + $0x36] sm:$0xff] }
 0x352   : > { %10017 = vmatpush.bf16.msra.mxu0 %v15430_v46  ;;  %v15460_v46 = vld [vmem:[%s16106_s8 + $0x1900] sm:$0xff] }
 0x353   : > { %10030 = vmatpush.bf16.msra.mxu1 %v15438_v47  ;;  %v15468_v47 = vld [vmem:[%s16106_s8 + $0x1940] sm:$0xff] }
 0x354   : > { %10043 = vmatpush.bf16.msra.mxu2 %v15446_v49  ;;  %v15484_v49 = vld [vmem:[%s16106_s8 + $0x19c0] sm:$0xff] }
 0x355   : > { %10056 = vmatpush.bf16.msra.mxu3 %v15454_v50  ;;  %v15499_v50 = vld [vmem:[%s16106_s8 + $0x1a38] sm:$0xff] }
 0x356   : > { %10018 = vmatpush.bf16.msra.mxu0 %v15429_v51  ;;  %v15507_v51 = vld [vmem:[%s16106_s8 + $0x1a78] sm:$0xff] }
 0x357   : > { %10031 = vmatpush.bf16.msra.mxu1 %v15437_v52  ;;  %v15515_v52 = vld [vmem:[%s16106_s8 + $0x1ab8] sm:$0xff] }
 0x358   : > { %10044 = vmatpush.bf16.msra.mxu2 %v15445_v53  ;;  %v15523_v53 = vld [vmem:[%s16106_s8 + $0x1af8] sm:$0xff] }
 0x359   : > { %10057 = vmatpush.bf16.msra.mxu3 %v15453_v54  ;;  %v15498_v54 = vld [vmem:[%s16106_s8 + $0x1a30] sm:$0xff] }
 0x35a   : > { %10019 = vmatpush.bf16.msra.mxu0 %v15428_v57  ;;  %v9813_v13 = vpop.f32.mrf.mxu0  ;;  %v15522_v57 = vld [vmem:[%s16106_s8 + $0x1af0] sm:$0xff] }
 0x35b   : > { %10032 = vmatpush.bf16.msra.mxu1 %v15436_v58  ;;  %v9814_v14 = vadd.f32 %v9813_v13, %v9801_v45  ;;  %v9826_v17 = vpop.f32.mrf.mxu1  ;;  %v281_v45 = vld [vmem:[%s16125_s27 + $0x68] sm:$0xff]  ;;  %v15497_v58 = vld [vmem:[%s16106_s8 + $0x1a28] sm:$0xff] }
 0x35c   : > { %10045 = vmatpush.bf16.msra.mxu2 %v15444_v59  ;;  %2463 = vst [vmem:[#allocation1] ss:$9 sm:$0xff] %v281_v45  ;;  %v15505_v59 = vld [vmem:[%s16106_s8 + $0x1a68] sm:$0xff] }
 0x35d   : > { %10058 = vmatpush.bf16.msra.mxu3 %v15452_v60  ;;  %10020 = vmatmul.bf16.vlgmr.msra.gmra.mxu0 %v2454_v1  ;;  %v9827_v20 = vadd.f32 %v9826_v17, %v9814_v14  ;;  %v15513_v60 = vld [vmem:[%s16106_s8 + $0x1aa8] sm:$0xff]  ;;  %v15504_v1 = vld [vmem:[%s16106_s8 + $0x1a60] sm:$0xff] }
 0x35e   : > { %10064 = vmatpush.bf16.msrb.mxu0 %v15467_v61  ;;  %10033 = vmatmul.bf16.vlgmr.msra.gmra.mxu1 %v2455_v3  ;;  %v15521_v61 = vld [vmem:[%s16106_s8 + $0x1ae8] sm:$0xff]  ;;  %v15512_v3 = vld [vmem:[%s16106_s8 + $0x1aa0] sm:$0xff] }
 0x35f   : > { %10077 = vmatpush.bf16.msrb.mxu1 %v15475_v62  ;;  %10046 = vmatmul.bf16.vlgmr.msra.gmra.mxu2 %v2456_v2  ;;  %v15553_v45 = vld [vmem:[%s16106_s8 + $0x1be8] sm:$0xff] }
 0x360   : > { %10090 = vmatpush.bf16.msrb.mxu2 %v15483_v63  ;;  %10059 = vmatmul.bf16.vlgmr.msra.gmra.mxu3 %v2457_v4  ;;  %v15520_v4 = vld [vmem:[%s16106_s8 + $0x1ae0] sm:$0xff] }
 0x361   : > { %10103 = vmatpush.bf16.msrb.mxu3 %v15491_v0  ;;  %v15496_v0 = vld [vmem:[%s16106_s8 + $0x1a20] sm:$0xff] }
 0x362   : > { %10065 = vmatpush.bf16.msrb.mxu0 %v15466_v5  ;;  %v9839_v25 = vpop.f32.mrf.mxu2  ;;  %v9815_v28 = vpop.f32.mrf.mxu0 }
 0x363   : > { %10078 = vmatpush.bf16.msrb.mxu1 %v15474_v6  ;;  %v9840_v26 = vadd.f32 %v9839_v25, %v9827_v20  ;;  %v9852_v27 = vpop.f32.mrf.mxu3  ;;  %v9828_v32 = vpop.f32.mrf.mxu1  ;;  %v15495_v6 = vld [vmem:[%s16106_s8 + $0x1a18] sm:$0xff]  ;;  %v15493_v20 = vld [vmem:[%s16106_s8 + $0x1a08] sm:$0xff]  ;;  %v15508_v28 = vld [vmem:[%s16106_s8 + $0x1a80] sm:$0xff] }
 0x364   : > { %10091 = vmatpush.bf16.msrb.mxu2 %v15482_v7  ;;  %v15503_v7 = vld [vmem:[%s16106_s8 + $0x1a58] sm:$0xff] }
 0x365   : > { %10104 = vmatpush.bf16.msrb.mxu3 %v15490_v8  ;;  %v16996_v29 = vadd.f32 %v9852_v27, %v9840_v26  ;;  %v15511_v8 = vld [vmem:[%s16106_s8 + $0x1a98] sm:$0xff]  ;;  %v15492_v26 = vld [vmem:[%s16106_s8 + $0x1a00] sm:$0xff] }
 0x366   : > { %10066 = vmatpush.bf16.msrb.mxu0 %v15465_v9  ;;  %v15519_v9 = vld [vmem:[%s16106_s8 + $0x1ad8] sm:$0xff]  ;;  %v15500_v27 = vld [vmem:[%s16106_s8 + $0x1a40] sm:$0xff] }
 0x367   : > { %10079 = vmatpush.bf16.msrb.mxu1 %v15473_v10  ;;  %v15547_v32 = vld [vmem:[%s16106_s8 + $0x1bb8] sm:$0xff] }
 0x368   : > { %10092 = vmatpush.bf16.msrb.mxu2 %v15481_v11 }
 0x369   : > { %10105 = vmatpush.bf16.msrb.mxu3 %v15489_v12 }
 0x36a   : > { %10067 = vmatpush.bf16.msrb.mxu0 %v15464_v15  ;;  %v9841_v41 = vpop.f32.mrf.mxu2  ;;  %v15494_v15 = vld [vmem:[%s16106_s8 + $0x1a10] sm:$0xff] }
 0x36b   : > { %10080 = vmatpush.bf16.msrb.mxu1 %v15472_v16  ;;  %v9854_v44 = vpop.f32.mrf.mxu3  ;;  %v15502_v16 = vld [vmem:[%s16106_s8 + $0x1a50] sm:$0xff] }
 0x36c   : > { %10093 = vmatpush.bf16.msrb.mxu2 %v15480_v18  ;;  %v15510_v18 = vld [vmem:[%s16106_s8 + $0x1a90] sm:$0xff]  ;;  %v15545_v44 = vld [vmem:[%s16106_s8 + $0x1ba8] sm:$0xff] }
 0x36d   : > { %10106 = vmatpush.bf16.msrb.mxu3 %v15488_v19  ;;  %v15518_v19 = vld [vmem:[%s16106_s8 + $0x1ad0] sm:$0xff] }
 0x36e   : > { %10068 = vmatpush.bf16.msrb.mxu0 %v15463_v21  ;;  %v15501_v21 = vld [vmem:[%s16106_s8 + $0x1a48] sm:$0xff]  ;;  %v15554_v41 = vld [vmem:[%s16106_s8 + $0x1bf0] sm:$0xff] }
 0x36f   : > { %10081 = vmatpush.bf16.msrb.mxu1 %v15471_v22  ;;  %v15509_v22 = vld [vmem:[%s16106_s8 + $0x1a88] sm:$0xff] }
 0x370   : > { %10094 = vmatpush.bf16.msrb.mxu2 %v15479_v23  ;;  %v15517_v23 = vld [vmem:[%s16106_s8 + $0x1ac8] sm:$0xff] }
 0x371   : > { %10107 = vmatpush.bf16.msrb.mxu3 %v15487_v24 }
 0x372   : > { %10069 = vmatpush.bf16.msrb.mxu0 %v15462_v30  ;;  %v15531_v30 = vld [vmem:[%s16106_s8 + $0x1b38] sm:$0xff] }
 0x373   : > { %10082 = vmatpush.bf16.msrb.mxu1 %v15470_v31  ;;  %v15539_v31 = vld [vmem:[%s16106_s8 + $0x1b78] sm:$0xff] }
 0x374   : > { %10095 = vmatpush.bf16.msrb.mxu2 %v15478_v33  ;;  %v15555_v33 = vld [vmem:[%s16106_s8 + $0x1bf8] sm:$0xff] }
 0x375   : > { %10108 = vmatpush.bf16.msrb.mxu3 %v15486_v34  ;;  %v2464_v34 = vld [vmem:[#allocation1] sm:$0xff] }
 0x376   : > { %10070 = vmatpush.bf16.msrb.mxu0 %v15461_v35  ;;  %v2466_v35 = vld [vmem:[#allocation1 + $0x12] sm:$0xff] }
 0x377   : > { %10083 = vmatpush.bf16.msrb.mxu1 %v15469_v36  ;;  %v2465_v36 = vld [vmem:[#allocation1 + $0x9] sm:$0xff] }
 0x378   : > { %10096 = vmatpush.bf16.msrb.mxu2 %v15477_v37  ;;  %v2467_v37 = vld [vmem:[#allocation1 + $0x1b] sm:$0xff] }
 0x379   : > { %10109 = vmatpush.bf16.msrb.mxu3 %v15485_v38  ;;  %v15530_v38 = vld [vmem:[%s16106_s8 + $0x1b30] sm:$0xff] }
 0x37a   : > { %10071 = vmatpush.bf16.msrb.mxu0 %v15460_v46  ;;  %v9865_v62 = vpop.f32.mrf.mxu0 }
 0x37b   : > { %10084 = vmatpush.bf16.msrb.mxu1 %v15468_v47  ;;  %v9866_v63 = vadd.f32 %v9865_v62, %v16996_v29  ;;  %v9878_v2 = vpop.f32.mrf.mxu1  ;;  %v15516_v29 = vld [vmem:[%s16106_s8 + $0x1ac0] sm:$0xff] }
 0x37c   : > { %10097 = vmatpush.bf16.msrb.mxu2 %v15476_v48  ;;  %v15528_v48 = vld [vmem:[%s16106_s8 + $0x1b20] sm:$0xff] }
 0x37d   : > { %10110 = vmatpush.bf16.msrb.mxu3 %v15484_v49  ;;  %10072 = vmatmul.bf16.vlgmr.msrb.gmra.mxu0 %v2458_v39  ;;  %v9879_v5 = vadd.f32 %v9878_v2, %v9866_v63  ;;  %v15538_v39 = vld [vmem:[%s16106_s8 + $0x1b70] sm:$0xff]  ;;  %v15536_v49 = vld [vmem:[%s16106_s8 + $0x1b60] sm:$0xff] }
 0x37e   : > { %10116 = vmatpush.bf16.msra.mxu0 %v15499_v50  ;;  %10085 = vmatmul.bf16.vlgmr.msrb.gmra.mxu1 %v2459_v42  ;;  %v15529_v42 = vld [vmem:[%s16106_s8 + $0x1b28] sm:$0xff]  ;;  %v15526_v63 = vld [vmem:[%s16106_s8 + $0x1b10] sm:$0xff] }
 0x37f   : > { %10129 = vmatpush.bf16.msra.mxu1 %v15507_v51  ;;  %10098 = vmatmul.bf16.vlgmr.msrb.gmra.mxu2 %v2460_v40  ;;  %v15546_v40 = vld [vmem:[%s16106_s8 + $0x1bb0] sm:$0xff]  ;;  %v15544_v51 = vld [vmem:[%s16106_s8 + $0x1ba0] sm:$0xff] }
 0x380   : > { %10142 = vmatpush.bf16.msra.mxu2 %v15515_v52  ;;  %10111 = vmatmul.bf16.vlgmr.msrb.gmra.mxu3 %v2461_v43  ;;  %v15537_v43 = vld [vmem:[%s16106_s8 + $0x1b68] sm:$0xff]  ;;  %v15552_v52 = vld [vmem:[%s16106_s8 + $0x1be0] sm:$0xff]  ;;  %v15542_v2 = vld [vmem:[%s16106_s8 + $0x1b90] sm:$0xff] }
 0x381   : > { %10155 = vmatpush.bf16.msra.mxu3 %v15523_v53 }
 0x382   : > { %10117 = vmatpush.bf16.msra.mxu0 %v15498_v54  ;;  %v9891_v10 = vpop.f32.mrf.mxu2  ;;  %v9867_v13 = vpop.f32.mrf.mxu0  ;;  %v15527_v54 = vld [vmem:[%s16106_s8 + $0x1b18] sm:$0xff] }
 0x383   : > { %10130 = vmatpush.bf16.msra.mxu1 %v15506_v55  ;;  %v9892_v11 = vadd.f32 %v9891_v10, %v9879_v5  ;;  %v9904_v12 = vpop.f32.mrf.mxu3  ;;  %v9880_v17 = vpop.f32.mrf.mxu1  ;;  %v15535_v55 = vld [vmem:[%s16106_s8 + $0x1b58] sm:$0xff]  ;;  %v15533_v5 = vld [vmem:[%s16106_s8 + $0x1b48] sm:$0xff] }
 0x384   : > { %10143 = vmatpush.bf16.msra.mxu2 %v15514_v56  ;;  %v15543_v56 = vld [vmem:[%s16106_s8 + $0x1b98] sm:$0xff]  ;;  %v15540_v17 = vld [vmem:[%s16106_s8 + $0x1b80] sm:$0xff] }
 0x385   : > { %10156 = vmatpush.bf16.msra.mxu3 %v15522_v57  ;;  %v9905_v14 = vadd.f32 %v9904_v12, %v9892_v11  ;;  %v15551_v57 = vld [vmem:[%s16106_s8 + $0x1bd8] sm:$0xff]  ;;  %v2469_v11 = vld [vmem:[#allocation1 + $0x2d] sm:$0xff] }
 0x386   : > { %10118 = vmatpush.bf16.msra.mxu0 %v15497_v58  ;;  %v2471_v12 = vld [vmem:[#allocation1 + $0x3f] sm:$0xff] }
 0x387   : > { %10131 = vmatpush.bf16.msra.mxu1 %v15505_v59 }
 0x388   : > { %10144 = vmatpush.bf16.msra.mxu2 %v15513_v60 }
 0x389   : > { %10157 = vmatpush.bf16.msra.mxu3 %v15521_v61 }
 0x38a   : > { %10119 = vmatpush.bf16.msra.mxu0 %v15496_v0  ;;  %v9893_v24 = vpop.f32.mrf.mxu2  ;;  %v15534_v0 = vld [vmem:[%s16106_s8 + $0x1b50] sm:$0xff] }
 0x38b   : > { %10132 = vmatpush.bf16.msra.mxu1 %v15504_v1  ;;  %v9906_v25 = vpop.f32.mrf.mxu3  ;;  %v15570_v24 = vld [vmem:[%s16106_s8 + $0x1c70] sm:$0xff] }
 0x38c   : > { %10145 = vmatpush.bf16.msra.mxu2 %v15512_v3  ;;  %v15550_v3 = vld [vmem:[%s16106_s8 + $0x1bd0] sm:$0xff] }
 0x38d   : > { %10158 = vmatpush.bf16.msra.mxu3 %v15520_v4  ;;  %v15525_v4 = vld [vmem:[%s16106_s8 + $0x1b08] sm:$0xff]  ;;  %v15578_v25 = vld [vmem:[%s16106_s8 + $0x1cb0] sm:$0xff] }
 0x38e   : > { %10120 = vmatpush.bf16.msra.mxu0 %v15495_v6  ;;  %v15541_v6 = vld [vmem:[%s16106_s8 + $0x1b88] sm:$0xff] }
 0x38f   : > { %10133 = vmatpush.bf16.msra.mxu1 %v15503_v7  ;;  %v15549_v7 = vld [vmem:[%s16106_s8 + $0x1bc8] sm:$0xff] }
 0x390   : > { %10146 = vmatpush.bf16.msra.mxu2 %v15511_v8  ;;  %v2468_v8 = vld [vmem:[#allocation1 + $0x24] sm:$0xff] }
 0x391   : > { %10159 = vmatpush.bf16.msra.mxu3 %v15519_v9  ;;  %v2470_v9 = vld [vmem:[#allocation1 + $0x36] sm:$0xff] }
 0x392   : > { %10121 = vmatpush.bf16.msra.mxu0 %v15494_v15  ;;  %v15524_v15 = vld [vmem:[%s16106_s8 + $0x1b00] sm:$0xff] }
 0x393   : > { %10134 = vmatpush.bf16.msra.mxu1 %v15502_v16  ;;  %v15532_v16 = vld [vmem:[%s16106_s8 + $0x1b40] sm:$0xff] }
 0x394   : > { %10147 = vmatpush.bf16.msra.mxu2 %v15510_v18  ;;  %v15548_v18 = vld [vmem:[%s16106_s8 + $0x1bc0] sm:$0xff] }
 0x395   : > { %10160 = vmatpush.bf16.msra.mxu3 %v15518_v19  ;;  %v15563_v19 = vld [vmem:[%s16106_s8 + $0x1c38] sm:$0xff] }
 0x396   : > { %10122 = vmatpush.bf16.msra.mxu0 %v15493_v20  ;;  %v15571_v20 = vld [vmem:[%s16106_s8 + $0x1c78] sm:$0xff] }
 0x397   : > { %10135 = vmatpush.bf16.msra.mxu1 %v15501_v21  ;;  %v15579_v21 = vld [vmem:[%s16106_s8 + $0x1cb8] sm:$0xff] }
 0x398   : > { %10148 = vmatpush.bf16.msra.mxu2 %v15509_v22  ;;  %v15587_v22 = vld [vmem:[%s16106_s8 + $0x1cf8] sm:$0xff] }
 0x399   : > { %10161 = vmatpush.bf16.msra.mxu3 %v15517_v23  ;;  %v15562_v23 = vld [vmem:[%s16106_s8 + $0x1c30] sm:$0xff] }
 0x39a   : > { %10123 = vmatpush.bf16.msra.mxu0 %v15492_v26  ;;  %v9917_v46 = vpop.f32.mrf.mxu0  ;;  %v15586_v26 = vld [vmem:[%s16106_s8 + $0x1cf0] sm:$0xff] }
 0x39b   : > { %10136 = vmatpush.bf16.msra.mxu1 %v15500_v27  ;;  %v9918_v47 = vadd.f32 %v9917_v46, %v9905_v14  ;;  %v9930_v50 = vpop.f32.mrf.mxu1  ;;  %v282_v14 = vld [vmem:[%s16125_s27 + $0x70] sm:$0xff] }
 0x39c   : > { %10149 = vmatpush.bf16.msra.mxu2 %v15508_v28  ;;  %2473 = vst [vmem:[#allocation1] ss:$9 sm:$0xff] %v282_v14  ;;  %v15561_v27 = vld [vmem:[%s16106_s8 + $0x1c28] sm:$0xff] }
 0x39d   : > { %10162 = vmatpush.bf16.msra.mxu3 %v15516_v29  ;;  %10124 = vmatmul.bf16.vlgmr.msra.gmra.mxu0 %v2464_v34  ;;  %v9931_v53 = vadd.f32 %v9930_v50, %v9918_v47  ;;  %v15569_v28 = vld [vmem:[%s16106_s8 + $0x1c68] sm:$0xff]  ;;  %v15568_v34 = vld [vmem:[%s16106_s8 + $0x1c60] sm:$0xff] }
 0x39e   : > { %10168 = vmatpush.bf16.msrb.mxu0 %v15531_v30  ;;  %10137 = vmatmul.bf16.vlgmr.msra.gmra.mxu1 %v2465_v36  ;;  %v15577_v29 = vld [vmem:[%s16106_s8 + $0x1ca8] sm:$0xff]  ;;  %v15576_v36 = vld [vmem:[%s16106_s8 + $0x1ca0] sm:$0xff] }
 0x39f   : > { %10181 = vmatpush.bf16.msrb.mxu1 %v15539_v31  ;;  %10150 = vmatmul.bf16.vlgmr.msra.gmra.mxu2 %v2466_v35  ;;  %v15585_v30 = vld [vmem:[%s16106_s8 + $0x1ce8] sm:$0xff] }
 0x3a0   : > { %10194 = vmatpush.bf16.msrb.mxu2 %v15547_v32  ;;  %10163 = vmatmul.bf16.vlgmr.msra.gmra.mxu3 %v2467_v37  ;;  %v15584_v37 = vld [vmem:[%s16106_s8 + $0x1ce0] sm:$0xff]  ;;  %v15617_v14 = vld [vmem:[%s16106_s8 + $0x1de8] sm:$0xff] }
 0x3a1   : > { %10207 = vmatpush.bf16.msrb.mxu3 %v15555_v33  ;;  %v15560_v33 = vld [vmem:[%s16106_s8 + $0x1c20] sm:$0xff] }
 0x3a2   : > { %10169 = vmatpush.bf16.msrb.mxu0 %v15530_v38  ;;  %v9943_v58 = vpop.f32.mrf.mxu2  ;;  %v9919_v61 = vpop.f32.mrf.mxu0 }
 0x3a3   : > { %10182 = vmatpush.bf16.msrb.mxu1 %v15538_v39  ;;  %v9944_v59 = vadd.f32 %v9943_v58, %v9931_v53  ;;  %v9956_v60 = vpop.f32.mrf.mxu3  ;;  %v9932_v1 = vpop.f32.mrf.mxu1  ;;  %v15559_v39 = vld [vmem:[%s16106_s8 + $0x1c18] sm:$0xff]  ;;  %v15557_v53 = vld [vmem:[%s16106_s8 + $0x1c08] sm:$0xff]  ;;  %v15572_v61 = vld [vmem:[%s16106_s8 + $0x1c80] sm:$0xff] }
 0x3a4   : > { %10195 = vmatpush.bf16.msrb.mxu2 %v15546_v40  ;;  %v15567_v40 = vld [vmem:[%s16106_s8 + $0x1c58] sm:$0xff] }
 0x3a5   : > { %10208 = vmatpush.bf16.msrb.mxu3 %v15554_v41  ;;  %v17064_v62 = vadd.f32 %v9956_v60, %v9944_v59  ;;  %v15575_v41 = vld [vmem:[%s16106_s8 + $0x1c98] sm:$0xff]  ;;  %v15556_v59 = vld [vmem:[%s16106_s8 + $0x1c00] sm:$0xff] }
 0x3a6   : > { %10170 = vmatpush.bf16.msrb.mxu0 %v15529_v42  ;;  %v15583_v42 = vld [vmem:[%s16106_s8 + $0x1cd8] sm:$0xff]  ;;  %v15564_v60 = vld [vmem:[%s16106_s8 + $0x1c40] sm:$0xff] }
 0x3a7   : > { %10183 = vmatpush.bf16.msrb.mxu1 %v15537_v43  ;;  %v15611_v1 = vld [vmem:[%s16106_s8 + $0x1db8] sm:$0xff] }
 0x3a8   : > { %10196 = vmatpush.bf16.msrb.mxu2 %v15545_v44 }
 0x3a9   : > { %10209 = vmatpush.bf16.msrb.mxu3 %v15553_v45 }
 0x3aa   : > { %10171 = vmatpush.bf16.msrb.mxu0 %v15528_v48  ;;  %v9945_v10 = vpop.f32.mrf.mxu2  ;;  %v15558_v48 = vld [vmem:[%s16106_s8 + $0x1c10] sm:$0xff] }
 0x3ab   : > { %10184 = vmatpush.bf16.msrb.mxu1 %v15536_v49  ;;  %v9958_v13 = vpop.f32.mrf.mxu3  ;;  %v15566_v49 = vld [vmem:[%s16106_s8 + $0x1c50] sm:$0xff] }
 0x3ac   : > { %10197 = vmatpush.bf16.msrb.mxu2 %v15544_v51  ;;  %v15574_v51 = vld [vmem:[%s16106_s8 + $0x1c90] sm:$0xff]  ;;  %v15609_v13 = vld [vmem:[%s16106_s8 + $0x1da8] sm:$0xff] }
 0x3ad   : > { %10210 = vmatpush.bf16.msrb.mxu3 %v15552_v52  ;;  %v15582_v52 = vld [vmem:[%s16106_s8 + $0x1cd0] sm:$0xff] }
 0x3ae   : > { %10172 = vmatpush.bf16.msrb.mxu0 %v15527_v54  ;;  %v15565_v54 = vld [vmem:[%s16106_s8 + $0x1c48] sm:$0xff]  ;;  %v15618_v10 = vld [vmem:[%s16106_s8 + $0x1df0] sm:$0xff] }
 0x3af   : > { %10185 = vmatpush.bf16.msrb.mxu1 %v15535_v55  ;;  %v15573_v55 = vld [vmem:[%s16106_s8 + $0x1c88] sm:$0xff] }
 0x3b0   : > { %10198 = vmatpush.bf16.msrb.mxu2 %v15543_v56  ;;  %v15581_v56 = vld [vmem:[%s16106_s8 + $0x1cc8] sm:$0xff] }
 0x3b1   : > { %10211 = vmatpush.bf16.msrb.mxu3 %v15551_v57 }
 0x3b2   : > { %10173 = vmatpush.bf16.msrb.mxu0 %v15526_v63  ;;  %v15595_v63 = vld [vmem:[%s16106_s8 + $0x1d38] sm:$0xff] }
 0x3b3   : > { %10186 = vmatpush.bf16.msrb.mxu1 %v15534_v0  ;;  %v15603_v0 = vld [vmem:[%s16106_s8 + $0x1d78] sm:$0xff] }
 0x3b4   : > { %10199 = vmatpush.bf16.msrb.mxu2 %v15542_v2  ;;  %v15619_v2 = vld [vmem:[%s16106_s8 + $0x1df8] sm:$0xff] }
 0x3b5   : > { %10212 = vmatpush.bf16.msrb.mxu3 %v15550_v3  ;;  %v2474_v3 = vld [vmem:[#allocation1] sm:$0xff] }
 0x3b6   : > { %10174 = vmatpush.bf16.msrb.mxu0 %v15525_v4  ;;  %v2476_v4 = vld [vmem:[#allocation1 + $0x12] sm:$0xff] }
 0x3b7   : > { %10187 = vmatpush.bf16.msrb.mxu1 %v15533_v5  ;;  %v2475_v5 = vld [vmem:[#allocation1 + $0x9] sm:$0xff] }
 0x3b8   : > { %10200 = vmatpush.bf16.msrb.mxu2 %v15541_v6  ;;  %v2477_v6 = vld [vmem:[#allocation1 + $0x1b] sm:$0xff] }
 0x3b9   : > { %10213 = vmatpush.bf16.msrb.mxu3 %v15549_v7  ;;  %v15594_v7 = vld [vmem:[%s16106_s8 + $0x1d30] sm:$0xff] }
 0x3ba   : > { %10175 = vmatpush.bf16.msrb.mxu0 %v15524_v15  ;;  %v9969_v31 = vpop.f32.mrf.mxu0 }
 0x3bb   : > { %10188 = vmatpush.bf16.msrb.mxu1 %v15532_v16  ;;  %v9970_v32 = vadd.f32 %v9969_v31, %v17064_v62  ;;  %v9982_v35 = vpop.f32.mrf.mxu1  ;;  %v15580_v62 = vld [vmem:[%s16106_s8 + $0x1cc0] sm:$0xff] }
 0x3bc   : > { %10201 = vmatpush.bf16.msrb.mxu2 %v15540_v17  ;;  %v15592_v17 = vld [vmem:[%s16106_s8 + $0x1d20] sm:$0xff] }
 0x3bd   : > { %10214 = vmatpush.bf16.msrb.mxu3 %v15548_v18  ;;  %10176 = vmatmul.bf16.vlgmr.msrb.gmra.mxu0 %v2468_v8  ;;  %v9983_v38 = vadd.f32 %v9982_v35, %v9970_v32  ;;  %v15602_v8 = vld [vmem:[%s16106_s8 + $0x1d70] sm:$0xff]  ;;  %v15600_v18 = vld [vmem:[%s16106_s8 + $0x1d60] sm:$0xff] }
 0x3be   : > { %10220 = vmatpush.bf16.msra.mxu0 %v15563_v19  ;;  %10189 = vmatmul.bf16.vlgmr.msrb.gmra.mxu1 %v2469_v11  ;;  %v15593_v11 = vld [vmem:[%s16106_s8 + $0x1d28] sm:$0xff]  ;;  %v15590_v32 = vld [vmem:[%s16106_s8 + $0x1d10] sm:$0xff] }
 0x3bf   : > { %10233 = vmatpush.bf16.msra.mxu1 %v15571_v20  ;;  %10202 = vmatmul.bf16.vlgmr.msrb.gmra.mxu2 %v2470_v9  ;;  %v15610_v9 = vld [vmem:[%s16106_s8 + $0x1db0] sm:$0xff]  ;;  %v15608_v20 = vld [vmem:[%s16106_s8 + $0x1da0] sm:$0xff] }
 0x3c0   : > { %10246 = vmatpush.bf16.msra.mxu2 %v15579_v21  ;;  %10215 = vmatmul.bf16.vlgmr.msrb.gmra.mxu3 %v2471_v12  ;;  %v15601_v12 = vld [vmem:[%s16106_s8 + $0x1d68] sm:$0xff]  ;;  %v15616_v21 = vld [vmem:[%s16106_s8 + $0x1de0] sm:$0xff]  ;;  %v15606_v35 = vld [vmem:[%s16106_s8 + $0x1d90] sm:$0xff] }
 0x3c1   : > { %10259 = vmatpush.bf16.msra.mxu3 %v15587_v22 }
 0x3c2   : > { %10221 = vmatpush.bf16.msra.mxu0 %v15562_v23  ;;  %v9995_v43 = vpop.f32.mrf.mxu2  ;;  %v9971_v46 = vpop.f32.mrf.mxu0  ;;  %v15591_v23 = vld [vmem:[%s16106_s8 + $0x1d18] sm:$0xff] }
 0x3c3   : > { %10234 = vmatpush.bf16.msra.mxu1 %v15570_v24  ;;  %v9996_v44 = vadd.f32 %v9995_v43, %v9983_v38  ;;  %v10008_v45 = vpop.f32.mrf.mxu3  ;;  %v9984_v50 = vpop.f32.mrf.mxu1  ;;  %v15599_v24 = vld [vmem:[%s16106_s8 + $0x1d58] sm:$0xff]  ;;  %v15597_v38 = vld [vmem:[%s16106_s8 + $0x1d48] sm:$0xff] }
 0x3c4   : > { %10247 = vmatpush.bf16.msra.mxu2 %v15578_v25  ;;  %v15607_v25 = vld [vmem:[%s16106_s8 + $0x1d98] sm:$0xff]  ;;  %v15604_v50 = vld [vmem:[%s16106_s8 + $0x1d80] sm:$0xff] }
 0x3c5   : > { %10260 = vmatpush.bf16.msra.mxu3 %v15586_v26  ;;  %v10009_v47 = vadd.f32 %v10008_v45, %v9996_v44  ;;  %v15615_v26 = vld [vmem:[%s16106_s8 + $0x1dd8] sm:$0xff]  ;;  %v2479_v44 = vld [vmem:[#allocation1 + $0x2d] sm:$0xff] }
 0x3c6   : > { %10222 = vmatpush.bf16.msra.mxu0 %v15561_v27  ;;  %v2481_v45 = vld [vmem:[#allocation1 + $0x3f] sm:$0xff] }
 0x3c7   : > { %10235 = vmatpush.bf16.msra.mxu1 %v15569_v28 }
 0x3c8   : > { %10248 = vmatpush.bf16.msra.mxu2 %v15577_v29 }
 0x3c9   : > { %10261 = vmatpush.bf16.msra.mxu3 %v15585_v30 }
 0x3ca   : > { %10223 = vmatpush.bf16.msra.mxu0 %v15560_v33  ;;  %v9997_v57 = vpop.f32.mrf.mxu2  ;;  %v15598_v33 = vld [vmem:[%s16106_s8 + $0x1d50] sm:$0xff] }
 0x3cb   : > { %10236 = vmatpush.bf16.msra.mxu1 %v15568_v34  ;;  %v10010_v58 = vpop.f32.mrf.mxu3  ;;  %v15634_v57 = vld [vmem:[%s16106_s8 + $0x1e70] sm:$0xff] }
 0x3cc   : > { %10249 = vmatpush.bf16.msra.mxu2 %v15576_v36  ;;  %v15614_v36 = vld [vmem:[%s16106_s8 + $0x1dd0] sm:$0xff] }
 0x3cd   : > { %10262 = vmatpush.bf16.msra.mxu3 %v15584_v37  ;;  %v15589_v37 = vld [vmem:[%s16106_s8 + $0x1d08] sm:$0xff]  ;;  %v15642_v58 = vld [vmem:[%s16106_s8 + $0x1eb0] sm:$0xff] }
 0x3ce   : > { %10224 = vmatpush.bf16.msra.mxu0 %v15559_v39  ;;  %v15605_v39 = vld [vmem:[%s16106_s8 + $0x1d88] sm:$0xff] }
 0x3cf   : > { %10237 = vmatpush.bf16.msra.mxu1 %v15567_v40  ;;  %v15613_v40 = vld [vmem:[%s16106_s8 + $0x1dc8] sm:$0xff] }
 0x3d0   : > { %10250 = vmatpush.bf16.msra.mxu2 %v15575_v41  ;;  %v2478_v41 = vld [vmem:[#allocation1 + $0x24] sm:$0xff] }
 0x3d1   : > { %10263 = vmatpush.bf16.msra.mxu3 %v15583_v42  ;;  %v2480_v42 = vld [vmem:[#allocation1 + $0x36] sm:$0xff] }
 0x3d2   : > { %10225 = vmatpush.bf16.msra.mxu0 %v15558_v48  ;;  %v15588_v48 = vld [vmem:[%s16106_s8 + $0x1d00] sm:$0xff] }
 0x3d3   : > { %10238 = vmatpush.bf16.msra.mxu1 %v15566_v49  ;;  %v15596_v49 = vld [vmem:[%s16106_s8 + $0x1d40] sm:$0xff] }
 0x3d4   : > { %10251 = vmatpush.bf16.msra.mxu2 %v15574_v51  ;;  %v15612_v51 = vld [vmem:[%s16106_s8 + $0x1dc0] sm:$0xff] }
 0x3d5   : > { %10264 = vmatpush.bf16.msra.mxu3 %v15582_v52  ;;  %v15627_v52 = vld [vmem:[%s16106_s8 + $0x1e38] sm:$0xff] }
 0x3d6   : > { %10226 = vmatpush.bf16.msra.mxu0 %v15557_v53  ;;  %v15635_v53 = vld [vmem:[%s16106_s8 + $0x1e78] sm:$0xff] }
 0x3d7   : > { %10239 = vmatpush.bf16.msra.mxu1 %v15565_v54  ;;  %v15643_v54 = vld [vmem:[%s16106_s8 + $0x1eb8] sm:$0xff] }
 0x3d8   : > { %10252 = vmatpush.bf16.msra.mxu2 %v15573_v55  ;;  %v15651_v55 = vld [vmem:[%s16106_s8 + $0x1ef8] sm:$0xff] }
 0x3d9   : > { %10265 = vmatpush.bf16.msra.mxu3 %v15581_v56  ;;  %v15626_v56 = vld [vmem:[%s16106_s8 + $0x1e30] sm:$0xff] }
 0x3da   : > { %10227 = vmatpush.bf16.msra.mxu0 %v15556_v59  ;;  %v10021_v15 = vpop.f32.mrf.mxu0  ;;  %v15650_v59 = vld [vmem:[%s16106_s8 + $0x1ef0] sm:$0xff] }
 0x3db   : > { %10240 = vmatpush.bf16.msra.mxu1 %v15564_v60  ;;  %v10022_v16 = vadd.f32 %v10021_v15, %v10009_v47  ;;  %v10034_v19 = vpop.f32.mrf.mxu1  ;;  %v283_v47 = vld [vmem:[%s16125_s27 + $0x78] sm:$0xff] }
 0x3dc   : > { %10253 = vmatpush.bf16.msra.mxu2 %v15572_v61  ;;  %2483 = vst [vmem:[#allocation1] ss:$9 sm:$0xff] %v283_v47  ;;  %v15625_v60 = vld [vmem:[%s16106_s8 + $0x1e28] sm:$0xff] }
 0x3dd   : > { %10266 = vmatpush.bf16.msra.mxu3 %v15580_v62  ;;  %10228 = vmatmul.bf16.vlgmr.msra.gmra.mxu0 %v2474_v3  ;;  %v10035_v22 = vadd.f32 %v10034_v19, %v10022_v16  ;;  %v15633_v61 = vld [vmem:[%s16106_s8 + $0x1e68] sm:$0xff]  ;;  %v15632_v3 = vld [vmem:[%s16106_s8 + $0x1e60] sm:$0xff] }
 0x3de   : > { %10272 = vmatpush.bf16.msrb.mxu0 %v15595_v63  ;;  %10241 = vmatmul.bf16.vlgmr.msra.gmra.mxu1 %v2475_v5  ;;  %v15641_v62 = vld [vmem:[%s16106_s8 + $0x1ea8] sm:$0xff]  ;;  %v15640_v5 = vld [vmem:[%s16106_s8 + $0x1ea0] sm:$0xff] }
 0x3df   : > { %10285 = vmatpush.bf16.msrb.mxu1 %v15603_v0  ;;  %10254 = vmatmul.bf16.vlgmr.msra.gmra.mxu2 %v2476_v4  ;;  %v15649_v63 = vld [vmem:[%s16106_s8 + $0x1ee8] sm:$0xff] }
 0x3e0   : > { %10298 = vmatpush.bf16.msrb.mxu2 %v15611_v1  ;;  %10267 = vmatmul.bf16.vlgmr.msra.gmra.mxu3 %v2477_v6  ;;  %v15648_v6 = vld [vmem:[%s16106_s8 + $0x1ee0] sm:$0xff]  ;;  %v15681_v47 = vld [vmem:[%s16106_s8 + $0x1fe8] sm:$0xff] }
 0x3e1   : > { %10311 = vmatpush.bf16.msrb.mxu3 %v15619_v2  ;;  %v15624_v2 = vld [vmem:[%s16106_s8 + $0x1e20] sm:$0xff] }
 0x3e2   : > { %10273 = vmatpush.bf16.msrb.mxu0 %v15594_v7  ;;  %v10047_v27 = vpop.f32.mrf.mxu2  ;;  %v10023_v30 = vpop.f32.mrf.mxu0 }
 0x3e3   : > { %10286 = vmatpush.bf16.msrb.mxu1 %v15602_v8  ;;  %v10048_v28 = vadd.f32 %v10047_v27, %v10035_v22  ;;  %v10060_v29 = vpop.f32.mrf.mxu3  ;;  %v10036_v34 = vpop.f32.mrf.mxu1  ;;  %v15623_v8 = vld [vmem:[%s16106_s8 + $0x1e18] sm:$0xff]  ;;  %v15621_v22 = vld [vmem:[%s16106_s8 + $0x1e08] sm:$0xff]  ;;  %v15636_v30 = vld [vmem:[%s16106_s8 + $0x1e80] sm:$0xff] }
 0x3e4   : > { %10299 = vmatpush.bf16.msrb.mxu2 %v15610_v9  ;;  %v15631_v9 = vld [vmem:[%s16106_s8 + $0x1e58] sm:$0xff] }
 0x3e5   : > { %10312 = vmatpush.bf16.msrb.mxu3 %v15618_v10  ;;  %v17132_v31 = vadd.f32 %v10060_v29, %v10048_v28  ;;  %v15639_v10 = vld [vmem:[%s16106_s8 + $0x1e98] sm:$0xff]  ;;  %v15620_v28 = vld [vmem:[%s16106_s8 + $0x1e00] sm:$0xff] }
 0x3e6   : > { %10274 = vmatpush.bf16.msrb.mxu0 %v15593_v11  ;;  %v15647_v11 = vld [vmem:[%s16106_s8 + $0x1ed8] sm:$0xff]  ;;  %v15628_v29 = vld [vmem:[%s16106_s8 + $0x1e40] sm:$0xff] }
 0x3e7   : > { %10287 = vmatpush.bf16.msrb.mxu1 %v15601_v12  ;;  %v15675_v34 = vld [vmem:[%s16106_s8 + $0x1fb8] sm:$0xff] }
 0x3e8   : > { %10300 = vmatpush.bf16.msrb.mxu2 %v15609_v13 }
 0x3e9   : > { %10313 = vmatpush.bf16.msrb.mxu3 %v15617_v14 }
 0x3ea   : > { %10275 = vmatpush.bf16.msrb.mxu0 %v15592_v17  ;;  %v10049_v43 = vpop.f32.mrf.mxu2  ;;  %v15622_v17 = vld [vmem:[%s16106_s8 + $0x1e10] sm:$0xff] }
 0x3eb   : > { %10288 = vmatpush.bf16.msrb.mxu1 %v15600_v18  ;;  %v10062_v46 = vpop.f32.mrf.mxu3  ;;  %v15630_v18 = vld [vmem:[%s16106_s8 + $0x1e50] sm:$0xff] }
 0x3ec   : > { %10301 = vmatpush.bf16.msrb.mxu2 %v15608_v20  ;;  %v15638_v20 = vld [vmem:[%s16106_s8 + $0x1e90] sm:$0xff]  ;;  %v15673_v46 = vld [vmem:[%s16106_s8 + $0x1fa8] sm:$0xff] }
 0x3ed   : > { %10314 = vmatpush.bf16.msrb.mxu3 %v15616_v21  ;;  %v15646_v21 = vld [vmem:[%s16106_s8 + $0x1ed0] sm:$0xff] }
 0x3ee   : > { %10276 = vmatpush.bf16.msrb.mxu0 %v15591_v23  ;;  %v15629_v23 = vld [vmem:[%s16106_s8 + $0x1e48] sm:$0xff]  ;;  %v15682_v43 = vld [vmem:[%s16106_s8 + $0x1ff0] sm:$0xff] }
 0x3ef   : > { %10289 = vmatpush.bf16.msrb.mxu1 %v15599_v24  ;;  %v15637_v24 = vld [vmem:[%s16106_s8 + $0x1e88] sm:$0xff] }
 0x3f0   : > { %10302 = vmatpush.bf16.msrb.mxu2 %v15607_v25  ;;  %v15645_v25 = vld [vmem:[%s16106_s8 + $0x1ec8] sm:$0xff] }
 0x3f1   : > { %10315 = vmatpush.bf16.msrb.mxu3 %v15615_v26 }
 0x3f2   : > { %10277 = vmatpush.bf16.msrb.mxu0 %v15590_v32  ;;  %v15659_v32 = vld [vmem:[%s16106_s8 + $0x1f38] sm:$0xff] }
 0x3f3   : > { %10290 = vmatpush.bf16.msrb.mxu1 %v15598_v33  ;;  %v15667_v33 = vld [vmem:[%s16106_s8 + $0x1f78] sm:$0xff] }
 0x3f4   : > { %10303 = vmatpush.bf16.msrb.mxu2 %v15606_v35  ;;  %v15683_v35 = vld [vmem:[%s16106_s8 + $0x1ff8] sm:$0xff] }
 0x3f5   : > { %10316 = vmatpush.bf16.msrb.mxu3 %v15614_v36  ;;  %v2484_v36 = vld [vmem:[#allocation1] sm:$0xff] }
 0x3f6   : > { %10278 = vmatpush.bf16.msrb.mxu0 %v15589_v37  ;;  %v2486_v37 = vld [vmem:[#allocation1 + $0x12] sm:$0xff] }
 0x3f7   : > { %10291 = vmatpush.bf16.msrb.mxu1 %v15597_v38  ;;  %v2485_v38 = vld [vmem:[#allocation1 + $0x9] sm:$0xff] }
 0x3f8   : > { %10304 = vmatpush.bf16.msrb.mxu2 %v15605_v39  ;;  %v2487_v39 = vld [vmem:[#allocation1 + $0x1b] sm:$0xff] }
 0x3f9   : > { %10317 = vmatpush.bf16.msrb.mxu3 %v15613_v40  ;;  %v15658_v40 = vld [vmem:[%s16106_s8 + $0x1f30] sm:$0xff] }
 0x3fa   : > { %10279 = vmatpush.bf16.msrb.mxu0 %v15588_v48  ;;  %v10073_v0 = vpop.f32.mrf.mxu0 }
 0x3fb   : > { %10292 = vmatpush.bf16.msrb.mxu1 %v15596_v49  ;;  %v10074_v1 = vadd.f32 %v10073_v0, %v17132_v31  ;;  %v10086_v4 = vpop.f32.mrf.mxu1  ;;  %v15644_v31 = vld [vmem:[%s16106_s8 + $0x1ec0] sm:$0xff] }
 0x3fc   : > { %10305 = vmatpush.bf16.msrb.mxu2 %v15604_v50  ;;  %v15656_v50 = vld [vmem:[%s16106_s8 + $0x1f20] sm:$0xff] }
 0x3fd   : > { %10318 = vmatpush.bf16.msrb.mxu3 %v15612_v51  ;;  %10280 = vmatmul.bf16.vlgmr.msrb.gmra.mxu0 %v2478_v41  ;;  %v10087_v7 = vadd.f32 %v10086_v4, %v10074_v1  ;;  %v15666_v41 = vld [vmem:[%s16106_s8 + $0x1f70] sm:$0xff]  ;;  %v15664_v51 = vld [vmem:[%s16106_s8 + $0x1f60] sm:$0xff] }
 0x3fe   : > { %10324 = vmatpush.bf16.msra.mxu0 %v15627_v52  ;;  %10293 = vmatmul.bf16.vlgmr.msrb.gmra.mxu1 %v2479_v44  ;;  %v15657_v44 = vld [vmem:[%s16106_s8 + $0x1f28] sm:$0xff]  ;;  %v15654_v1 = vld [vmem:[%s16106_s8 + $0x1f10] sm:$0xff] }
 0x3ff   : > { %10337 = vmatpush.bf16.msra.mxu1 %v15635_v53  ;;  %10306 = vmatmul.bf16.vlgmr.msrb.gmra.mxu2 %v2480_v42  ;;  %v15674_v42 = vld [vmem:[%s16106_s8 + $0x1fb0] sm:$0xff]  ;;  %v15672_v53 = vld [vmem:[%s16106_s8 + $0x1fa0] sm:$0xff] }
 0x400   : > { %10350 = vmatpush.bf16.msra.mxu2 %v15643_v54  ;;  %10319 = vmatmul.bf16.vlgmr.msrb.gmra.mxu3 %v2481_v45  ;;  %v15665_v45 = vld [vmem:[%s16106_s8 + $0x1f68] sm:$0xff]  ;;  %v15680_v54 = vld [vmem:[%s16106_s8 + $0x1fe0] sm:$0xff]  ;;  %v15670_v4 = vld [vmem:[%s16106_s8 + $0x1f90] sm:$0xff] }
 0x401   : > { %10363 = vmatpush.bf16.msra.mxu3 %v15651_v55 }
 0x402   : > { %10325 = vmatpush.bf16.msra.mxu0 %v15626_v56  ;;  %v10099_v12 = vpop.f32.mrf.mxu2  ;;  %v10075_v15 = vpop.f32.mrf.mxu0  ;;  %v15655_v56 = vld [vmem:[%s16106_s8 + $0x1f18] sm:$0xff] }
 0x403   : > { %10338 = vmatpush.bf16.msra.mxu1 %v15634_v57  ;;  %v10100_v13 = vadd.f32 %v10099_v12, %v10087_v7  ;;  %v10112_v14 = vpop.f32.mrf.mxu3  ;;  %v10088_v19 = vpop.f32.mrf.mxu1  ;;  %v15663_v57 = vld [vmem:[%s16106_s8 + $0x1f58] sm:$0xff]  ;;  %v15661_v7 = vld [vmem:[%s16106_s8 + $0x1f48] sm:$0xff]  ;;  %v15652_v12 = vld [vmem:[%s16106_s8 + $0x1f00] sm:$0xff] }
 0x404   : > { %10351 = vmatpush.bf16.msra.mxu2 %v15642_v58  ;;  %v15671_v58 = vld [vmem:[%s16106_s8 + $0x1f98] sm:$0xff]  ;;  %v15676_v15 = vld [vmem:[%s16106_s8 + $0x1fc0] sm:$0xff] }
 0x405   : > { %10364 = vmatpush.bf16.msra.mxu3 %v15650_v59  ;;  %v10113_v16 = vadd.f32 %v10112_v14, %v10100_v13  ;;  %v15679_v59 = vld [vmem:[%s16106_s8 + $0x1fd8] sm:$0xff]  ;;  %v15660_v13 = vld [vmem:[%s16106_s8 + $0x1f40] sm:$0xff] }
 0x406   : > { %10326 = vmatpush.bf16.msra.mxu0 %v15625_v60  ;;  %v15668_v14 = vld [vmem:[%s16106_s8 + $0x1f80] sm:$0xff]  ;;  %v2491_v19 = vld [vmem:[#allocation1 + $0x3f] sm:$0xff] }
 0x407   : > { %10339 = vmatpush.bf16.msra.mxu1 %v15633_v61 }
 0x408   : > { %10352 = vmatpush.bf16.msra.mxu2 %v15641_v62 }
 0x409   : > { %10365 = vmatpush.bf16.msra.mxu3 %v15649_v63 }
 0x40a   : > { %10327 = vmatpush.bf16.msra.mxu0 %v15624_v2  ;;  %v10101_v26 = vpop.f32.mrf.mxu2  ;;  %v15662_v2 = vld [vmem:[%s16106_s8 + $0x1f50] sm:$0xff] }
 0x40b   : > { %10340 = vmatpush.bf16.msra.mxu1 %v15632_v3  ;;  %v10114_v27 = vpop.f32.mrf.mxu3 }
 0x40c   : > { %10353 = vmatpush.bf16.msra.mxu2 %v15640_v5  ;;  %v15678_v5 = vld [vmem:[%s16106_s8 + $0x1fd0] sm:$0xff] }
 0x40d   : > { %10366 = vmatpush.bf16.msra.mxu3 %v15648_v6  ;;  %v15653_v6 = vld [vmem:[%s16106_s8 + $0x1f08] sm:$0xff] }
 0x40e   : > { %10328 = vmatpush.bf16.msra.mxu0 %v15623_v8  ;;  %v15669_v8 = vld [vmem:[%s16106_s8 + $0x1f88] sm:$0xff] }
 0x40f   : > { %10341 = vmatpush.bf16.msra.mxu1 %v15631_v9  ;;  %v15677_v9 = vld [vmem:[%s16106_s8 + $0x1fc8] sm:$0xff] }
 0x410   : > { %10354 = vmatpush.bf16.msra.mxu2 %v15639_v10 }
 0x411   : > { %10367 = vmatpush.bf16.msra.mxu3 %v15647_v11 }
 0x412   : > { %10329 = vmatpush.bf16.msra.mxu0 %v15622_v17  ;;  %v2489_v17 = vld [vmem:[#allocation1 + $0x2d] sm:$0xff] }
 0x413   : > { %10342 = vmatpush.bf16.msra.mxu1 %v15630_v18  ;;  %v2490_v18 = vld [vmem:[#allocation1 + $0x36] sm:$0xff] }
 0x414   : > { %10355 = vmatpush.bf16.msra.mxu2 %v15638_v20 }
 0x415   : > { %10368 = vmatpush.bf16.msra.mxu3 %v15646_v21 }
 0x416   : > { %10330 = vmatpush.bf16.msra.mxu0 %v15621_v22 }
 0x417   : > { %10343 = vmatpush.bf16.msra.mxu1 %v15629_v23 }
 0x418   : > { %10356 = vmatpush.bf16.msra.mxu2 %v15637_v24 }
 0x419   : > { %10369 = vmatpush.bf16.msra.mxu3 %v15645_v25 }
 0x41a   : > { %10331 = vmatpush.bf16.msra.mxu0 %v15620_v28  ;;  %v10125_v48 = vpop.f32.mrf.mxu0 }
 0x41b   : > { %10344 = vmatpush.bf16.msra.mxu1 %v15628_v29  ;;  %v10126_v49 = vadd.f32 %v10125_v48, %v10113_v16  ;;  %v10138_v52 = vpop.f32.mrf.mxu1  ;;  %v2488_v16 = vld [vmem:[#allocation1 + $0x24] sm:$0xff] }
 0x41c   : > { %10357 = vmatpush.bf16.msra.mxu2 %v15636_v30 }
 0x41d   : > { %10370 = vmatpush.bf16.msra.mxu3 %v15644_v31  ;;  %10332 = vmatmul.bf16.vlgmr.msra.gmra.mxu0 %v2484_v36  ;;  %v10139_v55 = vadd.f32 %v10138_v52, %v10126_v49 }
 0x41e   : > { %10376 = vmatpush.bf16.msrb.mxu0 %v15659_v32  ;;  %10345 = vmatmul.bf16.vlgmr.msra.gmra.mxu1 %v2485_v38 }
 0x41f   : > { %10389 = vmatpush.bf16.msrb.mxu1 %v15667_v33  ;;  %10358 = vmatmul.bf16.vlgmr.msra.gmra.mxu2 %v2486_v37 }
 0x420   : > { %10402 = vmatpush.bf16.msrb.mxu2 %v15675_v34  ;;  %10371 = vmatmul.bf16.vlgmr.msra.gmra.mxu3 %v2487_v39 }
 0x421   : > { %10415 = vmatpush.bf16.msrb.mxu3 %v15683_v35 }
 0x422   : > { %10377 = vmatpush.bf16.msrb.mxu0 %v15658_v40  ;;  %v10151_v60 = vpop.f32.mrf.mxu2  ;;  %v10127_v63 = vpop.f32.mrf.mxu0 }
 0x423   : > { %10390 = vmatpush.bf16.msrb.mxu1 %v15666_v41  ;;  %v10152_v61 = vadd.f32 %v10151_v60, %v10139_v55  ;;  %v10164_v62 = vpop.f32.mrf.mxu3  ;;  %v10140_v3 = vpop.f32.mrf.mxu1 }
 0x424   : > { %10403 = vmatpush.bf16.msrb.mxu2 %v15674_v42 }
 0x425   : > { %10416 = vmatpush.bf16.msrb.mxu3 %v15682_v43  ;;  %v10165_v0 = vadd.f32 %v10164_v62, %v10152_v61 }
 0x426   : > { %10378 = vmatpush.bf16.msrb.mxu0 %v15657_v44 }
 0x427   : > { %10391 = vmatpush.bf16.msrb.mxu1 %v15665_v45 }
 0x428   : > { %10404 = vmatpush.bf16.msrb.mxu2 %v15673_v46 }
 0x429   : > { %10417 = vmatpush.bf16.msrb.mxu3 %v15681_v47 }
 0x42a   : > { %10379 = vmatpush.bf16.msrb.mxu0 %v15656_v50  ;;  %v10153_v10 = vpop.f32.mrf.mxu2 }
 0x42b   : > { %10392 = vmatpush.bf16.msrb.mxu1 %v15664_v51  ;;  %v10166_v11 = vpop.f32.mrf.mxu3 }
 0x42c   : > { %10405 = vmatpush.bf16.msrb.mxu2 %v15672_v53 }
 0x42d   : > { %10418 = vmatpush.bf16.msrb.mxu3 %v15680_v54 }
 0x42e   : > { %10380 = vmatpush.bf16.msrb.mxu0 %v15655_v56 }
 0x42f   : > { %10393 = vmatpush.bf16.msrb.mxu1 %v15663_v57 }
 0x430   : > { %10406 = vmatpush.bf16.msrb.mxu2 %v15671_v58 }
 0x431   : > { %10419 = vmatpush.bf16.msrb.mxu3 %v15679_v59 }
 0x432   : > { %10381 = vmatpush.bf16.msrb.mxu0 %v15654_v1 }
 0x433   : > { %10394 = vmatpush.bf16.msrb.mxu1 %v15662_v2 }
 0x434   : > { %10407 = vmatpush.bf16.msrb.mxu2 %v15670_v4 }
 0x435   : > { %10420 = vmatpush.bf16.msrb.mxu3 %v15678_v5 }
 0x436   : > { %10382 = vmatpush.bf16.msrb.mxu0 %v15653_v6 }
 0x437   : > { %10395 = vmatpush.bf16.msrb.mxu1 %v15661_v7 }
 0x438   : > { %10408 = vmatpush.bf16.msrb.mxu2 %v15669_v8 }
 0x439   : > { %10421 = vmatpush.bf16.msrb.mxu3 %v15677_v9 }
 0x43a   : > { %10383 = vmatpush.bf16.msrb.mxu0 %v15652_v12  ;;  %v10177_v20 = vpop.f32.mrf.mxu0 }
 0x43b   : > { %10396 = vmatpush.bf16.msrb.mxu1 %v15660_v13  ;;  %v10178_v21 = vadd.f32 %v10177_v20, %v10165_v0  ;;  %v10190_v22 = vpop.f32.mrf.mxu1  ;;  %v267_v13 = vld [vmem:[#allocation2] sm:$0x3] }
 0x43c   : > { %10409 = vmatpush.bf16.msrb.mxu2 %v15668_v14 }
 0x43d   : > { %10422 = vmatpush.bf16.msrb.mxu3 %v15676_v15  ;;  %10384 = vmatmul.bf16.vlgmr.msrb.gmra.mxu0 %v2488_v16  ;;  %v10191_v23 = vadd.f32 %v10190_v22, %v10178_v21 }
 0x43e   : > { %10397 = vmatmul.bf16.vlgmr.msrb.gmra.mxu1 %v2489_v17 }
 0x43f   : > { %10410 = vmatmul.bf16.vlgmr.msrb.gmra.mxu2 %v2490_v18 }
 0x440   : > { %10423 = vmatmul.bf16.vlgmr.msrb.gmra.mxu3 %v2491_v19 }
 0x442   : > { %v10203_v24 = vpop.f32.mrf.mxu2  ;;  %v10179_v27 = vpop.f32.mrf.mxu0 }
 0x443   : > { %v10204_v25 = vadd.f32 %v10203_v24, %v10191_v23  ;;  %v10216_v26 = vpop.f32.mrf.mxu3  ;;  %v10192_v29 = vpop.f32.mrf.mxu1 }
 0x445   : > { %v10217_v28 = vadd.f32 %v10216_v26, %v10204_v25 }
 0x44a   : > { %v10205_v30 = vpop.f32.mrf.mxu2 }
 0x44b   : > { %v10218_v31 = vpop.f32.mrf.mxu3 }
 0x45a   : > { %v10229_v32 = vpop.f32.mrf.mxu0 }
 0x45b   : > { %v10230_v33 = vadd.f32 %v10229_v32, %v10217_v28  ;;  %v10242_v34 = vpop.f32.mrf.mxu1 }
 0x45d   : > { %v10243_v35 = vadd.f32 %v10242_v34, %v10230_v33 }
 0x462   : > { %v10255_v36 = vpop.f32.mrf.mxu2  ;;  %v10231_v39 = vpop.f32.mrf.mxu0 }
 0x463   : > { %v10256_v37 = vadd.f32 %v10255_v36, %v10243_v35  ;;  %v10268_v38 = vpop.f32.mrf.mxu3  ;;  %v10244_v41 = vpop.f32.mrf.mxu1 }
 0x465   : > { %v10269_v40 = vadd.f32 %v10268_v38, %v10256_v37 }
 0x46a   : > { %v10257_v42 = vpop.f32.mrf.mxu2 }
 0x46b   : > { %v10270_v43 = vpop.f32.mrf.mxu3 }
 0x47a   : > { %v10281_v44 = vpop.f32.mrf.mxu0 }
 0x47b   : > { %v10294_v45 = vpop.f32.mrf.mxu1  ;;  %v10282_v55 = vadd.f32 %v10281_v44, %v10269_v40 }
 0x47d   : > { %v10295_v59 = vadd.f32 %v10294_v45, %v10282_v55 }
 0x482   : > { %v10307_v46 = vpop.f32.mrf.mxu2  ;;  %v10283_v48 = vpop.f32.mrf.mxu0 }
 0x483   : > { %v10320_v47 = vpop.f32.mrf.mxu3  ;;  %v10296_v49 = vpop.f32.mrf.mxu1  ;;  %v10308_v60 = vadd.f32 %v10307_v46, %v10295_v59 }
 0x485   : > { %v10321_v63 = vadd.f32 %v10320_v47, %v10308_v60 }
 0x48a   : > { %v10309_v50 = vpop.f32.mrf.mxu2 }
 0x48b   : > { %v10322_v51 = vpop.f32.mrf.mxu3 }
 0x49a   : > { %v10333_v52 = vpop.f32.mrf.mxu0 }
 0x49b   : > { %v10346_v53 = vpop.f32.mrf.mxu1  ;;  %v10334_v0 = vadd.f32 %v10333_v52, %v10321_v63 }
 0x49d   : > { %v10347_v1 = vadd.f32 %v10346_v53, %v10334_v0 }
 0x4a2   : > { %v10359_v54 = vpop.f32.mrf.mxu2  ;;  %v10335_v57 = vpop.f32.mrf.mxu0 }
 0x4a3   : > { %v10372_v56 = vpop.f32.mrf.mxu3  ;;  %v10348_v58 = vpop.f32.mrf.mxu1  ;;  %v10360_v2 = vadd.f32 %v10359_v54, %v10347_v1 }
 0x4a5   : > { %v10373_v3 = vadd.f32 %v10372_v56, %v10360_v2 }
 0x4aa   : > { %v10361_v61 = vpop.f32.mrf.mxu2 }
 0x4ab   : > { %v10374_v62 = vpop.f32.mrf.mxu3 }
 0x4ba   : > { %v10385_v4 = vpop.f32.mrf.mxu0 }
 0x4bb   : > { %v10398_v5 = vpop.f32.mrf.mxu1  ;;  %v10386_v6 = vadd.f32 %v10385_v4, %v10373_v3 }
 0x4bd   : > { %v10399_v7 = vadd.f32 %v10398_v5, %v10386_v6 }
 0x4c2   : > { %v10411_v8 = vpop.f32.mrf.mxu2  ;;  %v10387_v11 = vpop.f32.mrf.mxu0 }
 0x4c3   : > { %v10424_v9 = vpop.f32.mrf.mxu3  ;;  %v10412_v10 = vadd.f32 %v10411_v8, %v10399_v7  ;;  %v10400_v12 = vpop.f32.mrf.mxu1 }
 0x4c5   : > { %v10425_v14 = vadd.f32 %v10424_v9, %v10412_v10 }
 0x4c7   : > { %v10428_v15 = vadd.f32 %v10425_v14, %v267_v13  ;;  %10433 = sbr.rel (%p14656_p9) target bundleno = 1236 (0x4d4), region = 48 }
 0x4c9   : > { %10429 = vst [vmem:[#allocation2] sm:$0x3] %v10428_v15 }
 0x4ca   : > { %v10413_v16 = vpop.f32.mrf.mxu2 }
 0x4cb   : > { %v10426_v17 = vpop.f32.mrf.mxu3 }
 0x4cc   : > { %v15788_v19 = vld [vmem:[%s16113_s5] ss:$0 sm:$0xff] }
 0x4d0   : > { %v10434_v18 = vld [vmem:[#allocation2] sm:$0x3] }
 0x4d1   : > { %v10439_v20 = vadd.f32 %v15788_v19, %v10434_v18 }
 0x4d3   : > { %10440 = vst [vmem:[%s16130_s26] sm:$0x3] %v10439_v20 }
 0x4d4 PF: > { %s19_s22 = sadd.s32 1, %s15943_s22   ;;  %s17261_s24 = sld [smem:[#allocation9_spill]] }
 0x4d5   : > { %p16_p10 = scmp.ge.s32.totalorder %s19_s22, 26   ;;  %s17262_s12 = smov %s15907_s13 }
 0x4d6   : > { %s17263_s13 = smov %s15911_s14  ;;  %s17264_s14 = smov %s16088_s9 }
 0x4d7   : > { %s17265_s15 = smov %s15919_s16  ;;  %s17266_s16 = smov %s15923_s17 }
 0x4d8   : > { %s17267_s17 = smov %s16093_s10  ;;  %s17268_s18 = smov %s15935_s20 }
 0x4d9   : > { %s17269_s19 = smov %s15939_s21  ;;  %s17270_s20 = smov %s17273_s23 }
 0x4da   : > { %s17271_s21 = smov %s17261_s24  ;;  %18 = sbr.rel (!%p16_p10) target bundleno = 11 (0xb), region = 96 }
 0x4df   :  { %10460 = vsyncpa [#allocation4], 1 }
 0x4e0   :  { %10462 = vsyncpa [#allocation4 + $0x1], 1 }
 0x4e1   :  { %10463 = vsyncpa [#allocation6], 1 }
 0x4e2   :  { %10465 = vsyncpa [#allocation6 + $0x1], 1 }

</bundles_post_ra>
